<compile_context>
chip_gen: v5e
topology: v5e:2x2
jax: 0.10.0
libtpu: 0.0.40
codegen_flags: <defaults>
</compile_context>

<pallas_src>
import math

import numpy as np
import jax
import jax.numpy as jnp
from jax.experimental import pallas as pl
from jax.experimental.pallas import tpu as pltpu


# ----------------------------------------------------------------------------
# Small host-side helpers
# ----------------------------------------------------------------------------

def _round_up(v, m):
    return ((v + m - 1) // m) * m


def _blockdiag_repeat(w, n):
    """Block-diagonal matrix with the same [d_in, d_out] block repeated n times."""
    d_in, d_out = w.shape
    out = np.zeros((n * d_in, n * d_out), np.float32)
    for k in range(n):
        out[k * d_in:(k + 1) * d_in, k * d_out:(k + 1) * d_out] = w
    return out


def _pearson_consts(N, L, n_groups=1):
    """Constants for a fully lane-dense pearson + upper-tri(offset=1) extraction.

    Flat column layout of the node series: g*(N*L) + n*L + l.
    Returns (ccen, sela, selb, scov, svar, seli, selj) as np.float32:
      yc   = y @ ccen                         (per-node mean centering)
      ab   = (yc @ sela) * (yc @ selb)        (pairwise products, pairs then diag)
      cov  = ab @ scov ; var = ab @ svar      (1/(L-1) folded in)
      corr_ut = cov / (sqrt(var)@seli * sqrt(var)@selj + eps)
    """
    E = N * (N - 1) // 2
    pairs = [(i, j) for i in range(N) for j in range(i + 1, N)]  # triu_indices order
    P = E + N
    NL = N * L
    dim = n_groups * NL
    cen_blk = np.eye(L, dtype=np.float32) - np.full((L, L), 1.0 / L, np.float32)
    ccen = np.zeros((dim, dim), np.float32)
    for gn in range(n_groups * N):
        ccen[gn * L:(gn + 1) * L, gn * L:(gn + 1) * L] = cen_blk
    sela = np.zeros((dim, n_groups * P * L), np.float32)
    selb = np.zeros_like(sela)
    scov = np.zeros((n_groups * P * L, n_groups * E), np.float32)
    svar = np.zeros((n_groups * P * L, n_groups * N), np.float32)
    seli = np.zeros((n_groups * N, n_groups * E), np.float32)
    selj = np.zeros_like(seli)
    inv = 1.0 / (L - 1)
    for g in range(n_groups):
        plist = pairs + [(n, n) for n in range(N)]
        for p, (i, j) in enumerate(plist):
            col0 = (g * P + p) * L
            for l in range(L):
                sela[g * NL + i * L + l, col0 + l] = 1.0
                selb[g * NL + j * L + l, col0 + l] = 1.0
            if p < E:
                scov[col0:col0 + L, g * E + p] = inv
            else:
                svar[col0:col0 + L, g * N + (p - E)] = inv
        for e, (i, j) in enumerate(pairs):
            seli[g * N + i, g * E + e] = 1.0
            selj[g * N + j, g * E + e] = 1.0
    return ccen, sela, selb, scov, svar, seli, selj


def _eigen_node_weights(mode_node_ws, mode_node_bs, N):
    """Fold all per-mode node MLPs into one set of wide / block-structured weights.

    Column layout of the hidden activations: (m*N + n)*d_out + j.
    Layer 0 reuses each node's input block for every mode; deeper layers are
    block-diagonal over (mode, node)."""
    n_modes = len(mode_node_ws)
    n_layers = len(mode_node_ws[0])
    Ws, Bs = [], []
    for l in range(n_layers):
        d_in, d_out = np.asarray(mode_node_ws[0][l]).shape
        if l == 0:
            W = np.zeros((N * d_in, n_modes * N * d_out), np.float32)
            for m in range(n_modes):
                wm = np.asarray(mode_node_ws[m][l])
                for n in range(N):
                    W[n * d_in:(n + 1) * d_in,
                      (m * N + n) * d_out:(m * N + n + 1) * d_out] = wm
        else:
            W = np.zeros((n_modes * N * d_in, n_modes * N * d_out), np.float32)
            for m in range(n_modes):
                wm = np.asarray(mode_node_ws[m][l])
                for n in range(N):
                    blk = m * N + n
                    W[blk * d_in:(blk + 1) * d_in,
                      blk * d_out:(blk + 1) * d_out] = wm
        B = np.zeros((1, n_modes * N * d_out), np.float32)
        for m in range(n_modes):
            bm = np.asarray(mode_node_bs[m][l]).reshape(-1)
            for n in range(N):
                blk = m * N + n
                B[0, blk * d_out:(blk + 1) * d_out] = bm
        Ws.append(W)
        Bs.append(B)
    return Ws, Bs


def _koopman_consts(num_real, num_cpairs):
    """Constant maps for the Koopman advancement (replaces runtime roll/iota)."""
    n_md = num_real + 2 * num_cpairs
    Q = np.zeros((n_md, n_md), np.float32)       # theta map: both pair cols use even col's omega
    Ps = np.zeros((n_md, n_md), np.float32)      # signed partner map
    cmask = np.zeros((1, n_md), np.float32)      # 1 for complex columns
    for j in range(num_cpairs):
        Q[2 * j, 2 * j] = 1.0
        Q[2 * j, 2 * j + 1] = 1.0
        Ps[2 * j + 1, 2 * j] = -1.0
        Ps[2 * j, 2 * j + 1] = 1.0
        cmask[0, 2 * j] = 1.0
        cmask[0, 2 * j + 1] = 1.0
    for r in range(2 * num_cpairs, n_md):
        Q[r, r] = 1.0
    return Q, Ps, cmask


# ----------------------------------------------------------------------------
# In-kernel helpers (traced inside Pallas kernels)
# ----------------------------------------------------------------------------

def _dense_layers(h, ws, bs, act):
    """Linear stack on a 2-D [rows, d] tile. bf16 MXU inputs, f32 accumulation."""
    n = len(ws)
    for li in range(n):
        w, b = ws[li], bs[li]
        h = jnp.dot(h.astype(w.dtype), w, preferred_element_type=jnp.float32) + b
        if li < n - 1:
            h = act(h)
    return h


def _tap_mlp(x, w_taps, b_taps, act):
    """Scalar MLP (widths [1, h, ..., 1]) applied elementwise over a lane-dense
    [R, C] tile.  Per-element weights are broadcast rows of width 1 or C
    (the latter lets per-mode weights vary along lanes)."""
    units = [x]
    n = len(w_taps)
    for li in range(n):
        w, b = w_taps[li], b_taps[li]
        d_out = b.shape[0]
        d_in = w.shape[0] // d_out
        outs = []
        for j in range(d_out):
            acc = units[0] * w[j:j + 1, :] + b[j:j + 1, :]
            for i in range(1, d_in):
                acc = acc + units[i] * w[i * d_out + j:i * d_out + j + 1, :]
            outs.append(act(acc) if li < n - 1 else acc)
        units = outs
    return units[0]


def _pearson_upper_tri(y_flat, ccen, sela, selb, scov, svar, seli, selj, eps=1e-5):
    """Lane-dense pearson correlation + upper-triangular extraction via constant
    selection matmuls.  y_flat: [R, n_groups*N*L] f32 -> [R, n_groups*E] f32."""
    yc = jnp.dot(y_flat, ccen, preferred_element_type=jnp.float32)
    aa = jnp.dot(yc, sela, preferred_element_type=jnp.float32)
    bb = jnp.dot(yc, selb, preferred_element_type=jnp.float32)
    ab = aa * bb
    cov = jnp.dot(ab, scov, preferred_element_type=jnp.float32)
    var = jnp.dot(ab, svar, preferred_element_type=jnp.float32)
    s = jnp.sqrt(var)
    sprod = (jnp.dot(s, seli, preferred_element_type=jnp.float32) *
             jnp.dot(s, selj, preferred_element_type=jnp.float32))
    return cov / (sprod + eps)


_PC_NAMES = ("ccen", "sela", "selb", "scov", "svar", "seli", "selj")


# ----------------------------------------------------------------------------
# Pallas kernels / wrappers
# ----------------------------------------------------------------------------

def eigen_modes_pallas(x, eig, n_modes, activation=jnp.tanh):
    """Fused EigenFunctionNN for ALL modes in one kernel step.
    x: [B, N, T].  Returns U: [B, E, n_modes]."""
    B, N, T = x.shape
    node_ws, node_bs = eig["node_ws"], eig["node_bs"]
    tap_w, tap_b = eig["tap_w"], eig["tap_b"]
    consts = [eig[k] for k in _PC_NAMES]
    n_node, n_tap = len(node_ws), len(tap_w)
    EM = eig["scov"].shape[-1]                       # n_modes * E
    x_flat = x.reshape(B, N * T).astype(jnp.float32)

    def kernel(x_ref, *refs):
        out_ref = refs[-1]
        wr = refs[:-1]
        pos = [0]

        def take(n):
            vals = [wr[pos[0] + t][...] for t in range(n)]
            pos[0] += n
            return vals

        nw, nb = take(n_node), take(n_node)
        tw, tb = take(n_tap), take(n_tap)
        pc = take(7)

        h = _dense_layers(x_ref[...], nw, nb, activation)   # [B, n_modes*N*Lm]
        ge = _pearson_upper_tri(h, *pc)                     # [B, n_modes*E]
        out_ref[...] = _tap_mlp(ge, tw, tb, activation)     # per-mode edge MLP

    args = [x_flat]
    in_specs = [pl.BlockSpec(x_flat.shape, lambda i: (0, 0))]
    for group in (node_ws, node_bs, tap_w, tap_b, consts):
        for a in group:
            args.append(a)
            in_specs.append(pl.BlockSpec(a.shape, lambda i, nd=a.ndim: (0,) * nd))

    out = pl.pallas_call(
        kernel,
        out_shape=jax.ShapeDtypeStruct((B, EM), jnp.float32),
        grid=(1,),
        in_specs=in_specs,
        out_specs=pl.BlockSpec((B, EM), lambda i: (0, 0)),
        compiler_params=pltpu.CompilerParams(dimension_semantics=("arbitrary",)),
    )(*args)
    E = EM // n_modes
    return out.reshape(B, n_modes, E).transpose(0, 2, 1)    # [B, E, n_modes]


def edge_embedder_pallas(x_flat, emb, activation=jnp.tanh, tile=512):
    """Fused main EdgeEmbeddingNN + eig_val MLP, tiled over the B*F group axis.

    x_flat: [M, N*sw].  Returns (y [M, N*latent], g [M, E], omega [M, n_modes],
    x_recon [M, N*sw]) -- all lane-dense."""
    M, NS = x_flat.shape
    enc_ws, enc_bs = emb["enc_ws"], emb["enc_bs"]
    dec_ws, dec_bs = emb["dec_ws"], emb["dec_bs"]
    eig_ws, eig_bs = emb["eig_ws"], emb["eig_bs"]
    ep_w, ep_b = emb["ep_w"], emb["ep_b"]
    consts = [emb[k] for k in _PC_NAMES]
    NL = enc_ws[-1].shape[-1]
    NSw = dec_ws[-1].shape[-1]
    E = emb["scov"].shape[-1]
    n_md = eig_ws[-1].shape[-1]
    n_enc, n_dec, n_eig, n_ep = len(enc_ws), len(dec_ws), len(eig_ws), len(ep_w)

    # Tile selection: multiple of 8 (2-D blocks), >=2 even "parallel" steps when
    # the row count allows (v7x dual-TC), capped at `tile`.
    tile = max(8, (tile // 8) * 8)
    if M >= 2 * tile:
        Gt = tile
    else:
        Gt = min(tile, max(8, _round_up((M + 1) // 2, 8)))
    M_pad = max(_round_up(M, Gt), Gt)
    x_in = x_flat.astype(jnp.float32)
    if M_pad != M:
        x_in = jnp.pad(x_in, ((0, M_pad - M), (0, 0)))

    def kernel(x_ref, *refs):
        y_ref, g_ref, om_ref, xr_ref = refs[-4:]
        wr = refs[:-4]
        pos = [0]

        def take(n):
            vals = [wr[pos[0] + t][...] for t in range(n)]
            pos[0] += n
            return vals

        enc_w, enc_b = take(n_enc), take(n_enc)
        dec_w, dec_b = take(n_dec), take(n_dec)
        eig_w, eig_b = take(n_eig), take(n_eig)
        epw, epb = take(n_ep), take(n_ep)
        pc = take(7)

        xb = x_ref[...]                                        # [Gt, N*sw]
        y_flat = _dense_layers(xb, enc_w, enc_b, activation)   # [Gt, N*latent]
        y_ref[...] = y_flat
        xr_ref[...] = _dense_layers(y_flat, dec_w, dec_b, activation)   # decoder
        om_ref[...] = _dense_layers(y_flat, eig_w, eig_b, activation)   # eig_val (fused)
        ge = _pearson_upper_tri(y_flat, *pc)                   # [Gt, E]
        g_ref[...] = _tap_mlp(ge, epw, epb, activation)        # edge projection

    args = [x_in]
    in_specs = [pl.BlockSpec((Gt, NS), lambda i: (i, 0))]
    for group in (enc_ws, enc_bs, dec_ws, dec_bs, eig_ws, eig_bs, ep_w, ep_b, consts):
        for a in group:
            args.append(a)
            in_specs.append(pl.BlockSpec(a.shape, lambda i, nd=a.ndim: (0,) * nd))

    y_f, g_f, om_f, xr_f = pl.pallas_call(
        kernel,
        out_shape=(jax.ShapeDtypeStruct((M_pad, NL), jnp.float32),
                   jax.ShapeDtypeStruct((M_pad, E), jnp.float32),
                   jax.ShapeDtypeStruct((M_pad, n_md), jnp.float32),
                   jax.ShapeDtypeStruct((M_pad, NSw), jnp.float32)),
        grid=(M_pad // Gt,),
        in_specs=in_specs,
        out_specs=(pl.BlockSpec((Gt, NL), lambda i: (i, 0)),
                   pl.BlockSpec((Gt, E), lambda i: (i, 0)),
                   pl.BlockSpec((Gt, n_md), lambda i: (i, 0)),
                   pl.BlockSpec((Gt, NSw), lambda i: (i, 0))),
        compiler_params=pltpu.CompilerParams(dimension_semantics=("parallel",)),
    )(*args)
    return y_f[:M], g_f[:M], om_f[:M], xr_f[:M]


def varying_multiply_all_pallas(g, U, omega, Q, Ps, cmask, delta_t, max_k):
    """All k = 1..max_k Koopman advancements fused; parallel grid over batch.
    yp = g@U is computed once; the complex-pair rotation uses constant maps."""
    B, F, E = g.shape
    n_md = U.shape[-1]

    def kernel(g_ref, u_ref, om_ref, q_ref, p_ref, m_ref, out_ref):
        gb = g_ref[0]                                           # [F, E]
        ub = u_ref[0]                                           # [E, n_md]
        omb = om_ref[0]                                         # [F, n_md]
        q, ps, cm = q_ref[...], p_ref[...], m_ref[...]
        yp = jnp.dot(gb, ub, preferred_element_type=jnp.float32)          # [F, n_md]
        theta_base = jnp.dot(omb, q, preferred_element_type=jnp.float32)  # [F, n_md]
        partner = jnp.dot(yp, ps, preferred_element_type=jnp.float32)     # signed partner
        for k in range(1, max_k + 1):
            dtk = float(delta_t) * k
            scale = math.exp(dtk)            # exp(ones_like(mu) * delta_t * k)
            theta = theta_base * dtk
            cosv = cm * (jnp.cos(theta) * scale) + (1.0 - cm) * jnp.exp(theta)
            sinv = cm * (jnp.sin(theta) * scale)
            y_next = cosv * yp + sinv * partner
            # g_next[f, e] = sum_m y_next[f, m] * U[e, m]
            out_ref[k - 1, 0] = jax.lax.dot_general(
                y_next, ub, (((1,), (1,)), ((), ())),
                preferred_element_type=jnp.float32)

    return pl.pallas_call(
        kernel,
        out_shape=jax.ShapeDtypeStruct((max_k, B, F, E), jnp.float32),
        grid=(B,),
        in_specs=[pl.BlockSpec((1, F, E), lambda b: (b, 0, 0)),
                  pl.BlockSpec((1, E, n_md), lambda b: (b, 0, 0)),
                  pl.BlockSpec((1, F, n_md), lambda b: (b, 0, 0)),
                  pl.BlockSpec(Q.shape, lambda b: (0, 0)),
                  pl.BlockSpec(Ps.shape, lambda b: (0, 0)),
                  pl.BlockSpec(cmask.shape, lambda b: (0, 0))],
        out_specs=pl.BlockSpec((max_k, 1, F, E), lambda b: (0, b, 0, 0)),
        compiler_params=pltpu.CompilerParams(dimension_semantics=("parallel",)),
    )(g.astype(jnp.float32), U.astype(jnp.float32), omega.astype(jnp.float32),
      Q, Ps, cmask)


# ----------------------------------------------------------------------------
# Parameter initialization (deterministic, PyTorch-Linear-style uniform)
# ----------------------------------------------------------------------------

def init_linear(key, d_in, d_out):
    kw, kb = jax.random.split(key)
    bound = 1.0 / math.sqrt(d_in)
    w = jax.random.uniform(kw, (d_in, d_out), jnp.float32, -bound, bound)
    b = jax.random.uniform(kb, (d_out,), jnp.float32, -bound, bound)
    return w, b


def init_mlp(key, widths):
    ws, bs = [], []
    keys = jax.random.split(key, len(widths) - 1)
    for kk, d_in, d_out in zip(keys, widths[:-1], widths[1:]):
        w, b = init_linear(kk, d_in, d_out)
        ws.append(w)
        bs.append(b)
    return ws, bs


def init_koopman_params(key, cfg):
    n_modes = cfg["num_real_modes"] + 2 * cfg["num_complex_modes"]
    params = {"modes": []}
    # EigenFunctionNN: one EdgeEmbeddingNN per mode (node_func_inv is unused in
    # its forward path, so its parameters are not materialized).
    for i in range(n_modes):
        k1, k2 = jax.random.split(jax.random.fold_in(key, 100 + i))
        params["modes"].append({
            "node": init_mlp(k1, cfg["edge_func_enc_width"]),
            "edge": init_mlp(k2, cfg["edge_func_proj_width"]),
        })
    params["enc"] = init_mlp(jax.random.fold_in(key, 1), cfg["encoder_width_list"])
    params["dec"] = init_mlp(jax.random.fold_in(key, 2), cfg["decoder_width_list"])
    params["edge_proj"] = init_mlp(jax.random.fold_in(key, 3), cfg["edge_proj_width_list"])
    latent = cfg["encoder_width_list"][-1]
    eig_widths = [latent * cfg["num_nodes"], 128, 128, 128, n_modes]
    params["eig_val"] = init_mlp(jax.random.fold_in(key, 4), eig_widths)
    return params


def pack_params(params, cfg, dense_dtype=jnp.bfloat16):
    """One-time packing:
       * all per-mode node MLPs folded into one wide/block-structured stack,
       * encoder/decoder turned into N-node block-diagonal matrices,
       * scalar edge MLPs turned into broadcast 'tap' rows,
       * pearson / upper-tri / Koopman constants precomputed."""
    N = cfg["num_nodes"]
    n_modes = cfg["num_real_modes"] + 2 * cfg["num_complex_modes"]
    E = N * (N - 1) // 2
    latent = cfg["encoder_width_list"][-1]
    Lm = cfg["edge_func_enc_width"][-1]

    # ---- EigenFunctionNN (all modes) ----
    mode_node_ws = [m["node"][0] for m in params["modes"]]
    mode_node_bs = [m["node"][1] for m in params["modes"]]
    big_ws, big_bs = _eigen_node_weights(mode_node_ws, mode_node_bs, N)
    eig = {
        "node_ws": [jnp.asarray(w, dense_dtype) for w in big_ws],
        "node_bs": [jnp.asarray(b, jnp.float32) for b in big_bs],
    }
    n_tap = len(params["modes"][0]["edge"][0])
    tap_w, tap_b = [], []
    for l in range(n_tap):
        d_in, d_out = np.asarray(params["modes"][0]["edge"][0][l]).shape
        wrow = np.zeros((d_in * d_out, n_modes * E), np.float32)
        brow = np.zeros((d_out, n_modes * E), np.float32)
        for m in range(n_modes):
            wm = np.asarray(params["modes"][m]["edge"][0][l])
            bm = np.asarray(params["modes"][m]["edge"][1][l]).reshape(-1)
            for i in range(d_in):
                for j in range(d_out):
                    wrow[i * d_out + j, m * E:(m + 1) * E] = wm[i, j]
            for j in range(d_out):
                brow[j, m * E:(m + 1) * E] = bm[j]
        tap_w.append(jnp.asarray(wrow))
        tap_b.append(jnp.asarray(brow))
    eig["tap_w"], eig["tap_b"] = tap_w, tap_b
    for name, c in zip(_PC_NAMES, _pearson_consts(N, Lm, n_groups=n_modes)):
        eig[name] = jnp.asarray(c)

    # ---- main EdgeEmbeddingNN + eig_val (fused kernel) ----
    emb = {}
    enc_ws, enc_bs = params["enc"]
    emb["enc_ws"] = [jnp.asarray(_blockdiag_repeat(np.asarray(w), N), dense_dtype)
                     for w in enc_ws]
    emb["enc_bs"] = [jnp.asarray(np.tile(np.asarray(b).reshape(1, -1), (1, N)),
                                 jnp.float32) for b in enc_bs]
    dec_ws, dec_bs = params["dec"]
    emb["dec_ws"] = [jnp.asarray(_blockdiag_repeat(np.asarray(w), N), dense_dtype)
                     for w in dec_ws]
    emb["dec_bs"] = [jnp.asarray(np.tile(np.asarray(b).reshape(1, -1), (1, N)),
                                 jnp.float32) for b in dec_bs]
    eigval_ws, eigval_bs = params["eig_val"]
    emb["eig_ws"] = [jnp.asarray(w, dense_dtype) for w in eigval_ws]
    emb["eig_bs"] = [jnp.asarray(np.asarray(b).reshape(1, -1), jnp.float32)
                     for b in eigval_bs]
    ep_ws, ep_bs = params["edge_proj"]
    emb["ep_w"] = [jnp.asarray(np.asarray(w).reshape(-1, 1), jnp.float32) for w in ep_ws]
    emb["ep_b"] = [jnp.asarray(np.asarray(b).reshape(-1, 1), jnp.float32) for b in ep_bs]
    for name, c in zip(_PC_NAMES, _pearson_consts(N, latent, n_groups=1)):
        emb[name] = jnp.asarray(c)

    # ---- Koopman advancement constants ----
    Q, Ps, cmask = _koopman_consts(cfg["num_real_modes"], cfg["num_complex_modes"])
    koop = {"Q": jnp.asarray(Q), "Ps": jnp.asarray(Ps), "cmask": jnp.asarray(cmask)}

    return {"eigen": eig, "embed": emb, "koop": koop}


# ----------------------------------------------------------------------------
# Forward pass (glue in XLA, compute in 3 Pallas kernels)
# ----------------------------------------------------------------------------

def koopman_forward(packed, x, cfg, max_k=1):
    B, N, T = x.shape
    sw = cfg["encoder_width_list"][0]
    latent = cfg["encoder_width_list"][-1]
    n_modes = cfg["num_real_modes"] + 2 * cfg["num_complex_modes"]
    E = N * (N - 1) // 2
    F = T // sw                              # same windows as torch.unfold(sw, sw)

    # --- EigenFunctionNN: Koopman eigenvector measurements U (one kernel step) ---
    U = eigen_modes_pallas(x, packed["eigen"], n_modes)                 # [B, E, n_modes]

    # --- sliding-window unfold + lane-dense flatten: [B, N, T] -> [B*F, N*sw] ---
    xw = x.reshape(B, N, F, sw).transpose(0, 2, 1, 3)                   # [B, F, N, sw]
    x_flat = xw.reshape(B * F, N * sw)

    # --- EdgeEmbeddingNN (encoder / pearson / edge proj / decoder) + eig_val, fused ---
    y_f, g_f, om_f, xr_f = edge_embedder_pallas(x_flat, packed["embed"])
    y = y_f.reshape(B, F, N, latent)
    g = g_f.reshape(B, F, E)
    omega = om_f.reshape(B, F, n_modes)
    x_recon = xr_f.reshape(B, F, N, sw).transpose(0, 2, 1, 3).reshape(B, N, F * sw)

    # --- Koopman advancement for k = 1..max_k (single fused kernel, grid over B) ---
    kp = packed["koop"]
    g_next = varying_multiply_all_pallas(g, U, omega, kp["Q"], kp["Ps"], kp["cmask"],
                                         cfg["delta_t"], max_k)
    g_next_list = [g_next[k] for k in range(max_k)]
    return y, g, g_next_list, U, omega, x_recon


# ----------------------------------------------------------------------------
# Example run
# ----------------------------------------------------------------------------

if __name__ == "__main__":
    cfg = {
        "num_nodes": 4,
        "num_real_modes": 1,
        "num_complex_modes": 1,
        "delta_t": 0.1,
        "encoder_width_list": [8, 16, 8],     # sw_size = 8, latent_dim = 8
        "decoder_width_list": [8, 16, 8],
        "edge_proj_width_list": [1, 8, 1],
        "edge_func_enc_width": [16, 16, 8],   # input dim == T
        "edge_func_dec_width": [8, 16, 16],   # node_func_inv unused in forward
        "edge_func_proj_width": [1, 8, 1],
    }
    B, N, T = 2, cfg["num_nodes"], 16
    max_k = 2

    key = jax.random.PRNGKey(0)
    k_param, k_data = jax.random.split(key)
    params = init_koopman_params(k_param, cfg)
    packed = pack_params(params, cfg)
    x = jax.random.normal(k_data, (B, N, T), dtype=jnp.float32)

    fwd = jax.jit(lambda p, xx: koopman_forward(p, xx, cfg, max_k=max_k))
    y, g, g_next_list, U, omega, x_recon = fwd(packed, x)

    for leaf in jax.tree_util.tree_leaves((y, g, g_next_list, U, omega, x_recon)):
        jax.block_until_ready(leaf)

    F = T // cfg["encoder_width_list"][0]
    E = N * (N - 1) // 2
    n_modes = cfg["num_real_modes"] + 2 * cfg["num_complex_modes"]
    assert y.shape == (B, F, N, cfg["encoder_width_list"][-1])
    assert g.shape == (B, F, E)
    assert U.shape == (B, E, n_modes)
    assert omega.shape == (B, F, n_modes)
    assert x_recon.shape == (B, N, T)
    assert len(g_next_list) == max_k and g_next_list[0].shape == g.shape
    assert bool(jnp.all(jnp.isfinite(y)))
    assert bool(jnp.all(jnp.isfinite(g)))
    assert bool(jnp.all(jnp.isfinite(U)))
    assert bool(jnp.all(jnp.isfinite(omega)))
    assert bool(jnp.all(jnp.isfinite(x_recon)))
    assert bool(jnp.all(jnp.isfinite(g_next_list[-1])))

    print("KERNEL_OK")
</pallas_src>

<mosaic_0001>
module attributes {stable_mosaic.version = 11 : i64} {
  func.func @kernel(%arg0: i32, %arg1: memref<8x32xf32, #tpu.memory_space<vmem>>, %arg2: memref<32x64xbf16, #tpu.memory_space<vmem>>, %arg3: memref<64x32xbf16, #tpu.memory_space<vmem>>, %arg4: memref<1x64xf32, #tpu.memory_space<vmem>>, %arg5: memref<1x32xf32, #tpu.memory_space<vmem>>, %arg6: memref<32x64xbf16, #tpu.memory_space<vmem>>, %arg7: memref<64x32xbf16, #tpu.memory_space<vmem>>, %arg8: memref<1x64xf32, #tpu.memory_space<vmem>>, %arg9: memref<1x32xf32, #tpu.memory_space<vmem>>, %arg10: memref<32x128xbf16, #tpu.memory_space<vmem>>, %arg11: memref<128x128xbf16, #tpu.memory_space<vmem>>, %arg12: memref<128x128xbf16, #tpu.memory_space<vmem>>, %arg13: memref<128x3xbf16, #tpu.memory_space<vmem>>, %arg14: memref<1x128xf32, #tpu.memory_space<vmem>>, %arg15: memref<1x128xf32, #tpu.memory_space<vmem>>, %arg16: memref<1x128xf32, #tpu.memory_space<vmem>>, %arg17: memref<1x3xf32, #tpu.memory_space<vmem>>, %arg18: memref<8x1xf32, #tpu.memory_space<vmem>>, %arg19: memref<8x1xf32, #tpu.memory_space<vmem>>, %arg20: memref<8x1xf32, #tpu.memory_space<vmem>>, %arg21: memref<1x1xf32, #tpu.memory_space<vmem>>, %arg22: memref<32x32xf32, #tpu.memory_space<vmem>>, %arg23: memref<32x80xf32, #tpu.memory_space<vmem>>, %arg24: memref<32x80xf32, #tpu.memory_space<vmem>>, %arg25: memref<80x6xf32, #tpu.memory_space<vmem>>, %arg26: memref<80x4xf32, #tpu.memory_space<vmem>>, %arg27: memref<4x6xf32, #tpu.memory_space<vmem>>, %arg28: memref<4x6xf32, #tpu.memory_space<vmem>>, %arg29: memref<8x32xf32, #tpu.memory_space<vmem>>, %arg30: memref<8x6xf32, #tpu.memory_space<vmem>>, %arg31: memref<8x3xf32, #tpu.memory_space<vmem>>, %arg32: memref<8x32xf32, #tpu.memory_space<vmem>>) attributes {dimension_semantics = [#tpu.dimension_semantics<parallel>], iteration_bounds = array<i64: 1>, scalar_prefetch = 0 : i64, scratch_operands = 0 : i64, tpu.core_type = #tpu.core_type<tc>, window_params = [{transform_indices = @transform_0, window_bounds = array<i64: 8, 32>}, {pipeline_mode = #tpu.pipeline_mode<synchronous>, transform_indices = @transform_1, window_bounds = array<i64: 32, 64>}, {pipeline_mode = #tpu.pipeline_mode<synchronous>, transform_indices = @transform_2, window_bounds = array<i64: 64, 32>}, {pipeline_mode = #tpu.pipeline_mode<synchronous>, transform_indices = @transform_3, window_bounds = array<i64: 1, 64>}, {pipeline_mode = #tpu.pipeline_mode<synchronous>, transform_indices = @transform_4, window_bounds = array<i64: 1, 32>}, {pipeline_mode = #tpu.pipeline_mode<synchronous>, transform_indices = @transform_5, window_bounds = array<i64: 32, 64>}, {pipeline_mode = #tpu.pipeline_mode<synchronous>, transform_indices = @transform_6, window_bounds = array<i64: 64, 32>}, {pipeline_mode = #tpu.pipeline_mode<synchronous>, transform_indices = @transform_7, window_bounds = array<i64: 1, 64>}, {pipeline_mode = #tpu.pipeline_mode<synchronous>, transform_indices = @transform_8, window_bounds = array<i64: 1, 32>}, {pipeline_mode = #tpu.pipeline_mode<synchronous>, transform_indices = @transform_9, window_bounds = array<i64: 32, 128>}, {pipeline_mode = #tpu.pipeline_mode<synchronous>, transform_indices = @transform_10, window_bounds = array<i64: 128, 128>}, {pipeline_mode = #tpu.pipeline_mode<synchronous>, transform_indices = @transform_11, window_bounds = array<i64: 128, 128>}, {pipeline_mode = #tpu.pipeline_mode<synchronous>, transform_indices = @transform_12, window_bounds = array<i64: 128, 3>}, {pipeline_mode = #tpu.pipeline_mode<synchronous>, transform_indices = @transform_13, window_bounds = array<i64: 1, 128>}, {pipeline_mode = #tpu.pipeline_mode<synchronous>, transform_indices = @transform_14, window_bounds = array<i64: 1, 128>}, {pipeline_mode = #tpu.pipeline_mode<synchronous>, transform_indices = @transform_15, window_bounds = array<i64: 1, 128>}, {pipeline_mode = #tpu.pipeline_mode<synchronous>, transform_indices = @transform_16, window_bounds = array<i64: 1, 3>}, {pipeline_mode = #tpu.pipeline_mode<synchronous>, transform_indices = @transform_17, window_bounds = array<i64: 8, 1>}, {pipeline_mode = #tpu.pipeline_mode<synchronous>, transform_indices = @transform_18, window_bounds = array<i64: 8, 1>}, {pipeline_mode = #tpu.pipeline_mode<synchronous>, transform_indices = @transform_19, window_bounds = array<i64: 8, 1>}, {pipeline_mode = #tpu.pipeline_mode<synchronous>, transform_indices = @transform_20, window_bounds = array<i64: 1, 1>}, {pipeline_mode = #tpu.pipeline_mode<synchronous>, transform_indices = @transform_21, window_bounds = array<i64: 32, 32>}, {pipeline_mode = #tpu.pipeline_mode<synchronous>, transform_indices = @transform_22, window_bounds = array<i64: 32, 80>}, {pipeline_mode = #tpu.pipeline_mode<synchronous>, transform_indices = @transform_23, window_bounds = array<i64: 32, 80>}, {pipeline_mode = #tpu.pipeline_mode<synchronous>, transform_indices = @transform_24, window_bounds = array<i64: 80, 6>}, {pipeline_mode = #tpu.pipeline_mode<synchronous>, transform_indices = @transform_25, window_bounds = array<i64: 80, 4>}, {pipeline_mode = #tpu.pipeline_mode<synchronous>, transform_indices = @transform_26, window_bounds = array<i64: 4, 6>}, {pipeline_mode = #tpu.pipeline_mode<synchronous>, transform_indices = @transform_27, window_bounds = array<i64: 4, 6>}, {transform_indices = @transform_28, window_bounds = array<i64: 8, 32>}, {transform_indices = @transform_29, window_bounds = array<i64: 8, 6>}, {transform_indices = @transform_30, window_bounds = array<i64: 8, 3>}, {transform_indices = @transform_31, window_bounds = array<i64: 8, 32>}]} {
    %c0 = arith.constant 0 : index
    %c0_0 = arith.constant 0 : index
    %0 = vector.load %arg2[%c0, %c0_0] : memref<32x64xbf16, #tpu.memory_space<vmem>>, vector<32x64xbf16>
    %c0_1 = arith.constant 0 : index
    %c0_2 = arith.constant 0 : index
    %1 = vector.load %arg3[%c0_1, %c0_2] : memref<64x32xbf16, #tpu.memory_space<vmem>>, vector<64x32xbf16>
    %c0_3 = arith.constant 0 : index
    %c0_4 = arith.constant 0 : index
    %2 = vector.load %arg4[%c0_3, %c0_4] : memref<1x64xf32, #tpu.memory_space<vmem>>, vector<1x64xf32>
    %c0_5 = arith.constant 0 : index
    %c0_6 = arith.constant 0 : index
    %3 = vector.load %arg5[%c0_5, %c0_6] : memref<1x32xf32, #tpu.memory_space<vmem>>, vector<1x32xf32>
    %c0_7 = arith.constant 0 : index
    %c0_8 = arith.constant 0 : index
    %4 = vector.load %arg6[%c0_7, %c0_8] : memref<32x64xbf16, #tpu.memory_space<vmem>>, vector<32x64xbf16>
    %c0_9 = arith.constant 0 : index
    %c0_10 = arith.constant 0 : index
    %5 = vector.load %arg7[%c0_9, %c0_10] : memref<64x32xbf16, #tpu.memory_space<vmem>>, vector<64x32xbf16>
    %c0_11 = arith.constant 0 : index
    %c0_12 = arith.constant 0 : index
    %6 = vector.load %arg8[%c0_11, %c0_12] : memref<1x64xf32, #tpu.memory_space<vmem>>, vector<1x64xf32>
    %c0_13 = arith.constant 0 : index
    %c0_14 = arith.constant 0 : index
    %7 = vector.load %arg9[%c0_13, %c0_14] : memref<1x32xf32, #tpu.memory_space<vmem>>, vector<1x32xf32>
    %c0_15 = arith.constant 0 : index
    %c0_16 = arith.constant 0 : index
    %8 = vector.load %arg10[%c0_15, %c0_16] : memref<32x128xbf16, #tpu.memory_space<vmem>>, vector<32x128xbf16>
    %c0_17 = arith.constant 0 : index
    %c0_18 = arith.constant 0 : index
    %9 = vector.load %arg11[%c0_17, %c0_18] : memref<128x128xbf16, #tpu.memory_space<vmem>>, vector<128x128xbf16>
    %c0_19 = arith.constant 0 : index
    %c0_20 = arith.constant 0 : index
    %10 = vector.load %arg12[%c0_19, %c0_20] : memref<128x128xbf16, #tpu.memory_space<vmem>>, vector<128x128xbf16>
    %c0_21 = arith.constant 0 : index
    %c0_22 = arith.constant 0 : index
    %11 = vector.load %arg13[%c0_21, %c0_22] : memref<128x3xbf16, #tpu.memory_space<vmem>>, vector<128x3xbf16>
    %c0_23 = arith.constant 0 : index
    %c0_24 = arith.constant 0 : index
    %12 = vector.load %arg14[%c0_23, %c0_24] : memref<1x128xf32, #tpu.memory_space<vmem>>, vector<1x128xf32>
    %c0_25 = arith.constant 0 : index
    %c0_26 = arith.constant 0 : index
    %13 = vector.load %arg15[%c0_25, %c0_26] : memref<1x128xf32, #tpu.memory_space<vmem>>, vector<1x128xf32>
    %c0_27 = arith.constant 0 : index
    %c0_28 = arith.constant 0 : index
    %14 = vector.load %arg16[%c0_27, %c0_28] : memref<1x128xf32, #tpu.memory_space<vmem>>, vector<1x128xf32>
    %c0_29 = arith.constant 0 : index
    %c0_30 = arith.constant 0 : index
    %15 = vector.load %arg17[%c0_29, %c0_30] : memref<1x3xf32, #tpu.memory_space<vmem>>, vector<1x3xf32>
    %c0_31 = arith.constant 0 : index
    %c0_32 = arith.constant 0 : index
    %16 = vector.load %arg18[%c0_31, %c0_32] : memref<8x1xf32, #tpu.memory_space<vmem>>, vector<8x1xf32>
    %c0_33 = arith.constant 0 : index
    %c0_34 = arith.constant 0 : index
    %17 = vector.load %arg19[%c0_33, %c0_34] : memref<8x1xf32, #tpu.memory_space<vmem>>, vector<8x1xf32>
    %c0_35 = arith.constant 0 : index
    %c0_36 = arith.constant 0 : index
    %18 = vector.load %arg20[%c0_35, %c0_36] : memref<8x1xf32, #tpu.memory_space<vmem>>, vector<8x1xf32>
    %c0_37 = arith.constant 0 : index
    %c0_38 = arith.constant 0 : index
    %19 = vector.load %arg21[%c0_37, %c0_38] : memref<1x1xf32, #tpu.memory_space<vmem>>, vector<1x1xf32>
    %c0_39 = arith.constant 0 : index
    %c0_40 = arith.constant 0 : index
    %20 = vector.load %arg22[%c0_39, %c0_40] : memref<32x32xf32, #tpu.memory_space<vmem>>, vector<32x32xf32>
    %c0_41 = arith.constant 0 : index
    %c0_42 = arith.constant 0 : index
    %21 = vector.load %arg23[%c0_41, %c0_42] : memref<32x80xf32, #tpu.memory_space<vmem>>, vector<32x80xf32>
    %c0_43 = arith.constant 0 : index
    %c0_44 = arith.constant 0 : index
    %22 = vector.load %arg24[%c0_43, %c0_44] : memref<32x80xf32, #tpu.memory_space<vmem>>, vector<32x80xf32>
    %c0_45 = arith.constant 0 : index
    %c0_46 = arith.constant 0 : index
    %23 = vector.load %arg25[%c0_45, %c0_46] : memref<80x6xf32, #tpu.memory_space<vmem>>, vector<80x6xf32>
    %c0_47 = arith.constant 0 : index
    %c0_48 = arith.constant 0 : index
    %24 = vector.load %arg26[%c0_47, %c0_48] : memref<80x4xf32, #tpu.memory_space<vmem>>, vector<80x4xf32>
    %c0_49 = arith.constant 0 : index
    %c0_50 = arith.constant 0 : index
    %25 = vector.load %arg27[%c0_49, %c0_50] : memref<4x6xf32, #tpu.memory_space<vmem>>, vector<4x6xf32>
    %c0_51 = arith.constant 0 : index
    %c0_52 = arith.constant 0 : index
    %26 = vector.load %arg28[%c0_51, %c0_52] : memref<4x6xf32, #tpu.memory_space<vmem>>, vector<4x6xf32>
    %c0_53 = arith.constant 0 : index
    %c0_54 = arith.constant 0 : index
    %27 = vector.load %arg1[%c0_53, %c0_54] : memref<8x32xf32, #tpu.memory_space<vmem>>, vector<8x32xf32>
    %28 = arith.truncf %27 : vector<8x32xf32> to vector<8x32xbf16>
    %cst = arith.constant dense<0.000000e+00> : vector<8x64xf32>
    %29 = tpu.matmul %28, %0, %cst {dimension_numbers = #tpu.dot_dimension_numbers<[1], [0], [0], [1], [0, 0, 1, 1], [], []>} : vector<8x32xbf16>, vector<32x64xbf16>, vector<8x64xf32> -> vector<8x64xf32>
    %30 = vector.broadcast %2 : vector<1x64xf32> to vector<8x64xf32>
    %31 = arith.addf %29, %30 : vector<8x64xf32>
    %32 = math.tanh %31 : vector<8x64xf32>
    %33 = arith.truncf %32 : vector<8x64xf32> to vector<8x64xbf16>
    %cst_55 = arith.constant dense<0.000000e+00> : vector<8x32xf32>
    %34 = tpu.matmul %33, %1, %cst_55 {dimension_numbers = #tpu.dot_dimension_numbers<[1], [0], [0], [1], [0, 0, 1, 1], [], []>} : vector<8x64xbf16>, vector<64x32xbf16>, vector<8x32xf32> -> vector<8x32xf32>
    %35 = vector.broadcast %3 : vector<1x32xf32> to vector<8x32xf32>
    %36 = arith.addf %34, %35 : vector<8x32xf32>
    %c0_56 = arith.constant 0 : index
    %c0_57 = arith.constant 0 : index
    %37 = vector.load %arg29[%c0_56, %c0_57] : memref<8x32xf32, #tpu.memory_space<vmem>>, vector<8x32xf32>
    tpu.vector_store %arg29[%c0_56, %c0_57], %36 {strides = array<i32>} : memref<8x32xf32, #tpu.memory_space<vmem>>, vector<8x32xf32>,
    %38 = arith.truncf %36 : vector<8x32xf32> to vector<8x32xbf16>
    %cst_58 = arith.constant dense<0.000000e+00> : vector<8x64xf32>
    %39 = tpu.matmul %38, %4, %cst_58 {dimension_numbers = #tpu.dot_dimension_numbers<[1], [0], [0], [1], [0, 0, 1, 1], [], []>} : vector<8x32xbf16>, vector<32x64xbf16>, vector<8x64xf32> -> vector<8x64xf32>
    %40 = vector.broadcast %6 : vector<1x64xf32> to vector<8x64xf32>
    %41 = arith.addf %39, %40 : vector<8x64xf32>
    %42 = math.tanh %41 : vector<8x64xf32>
    %43 = arith.truncf %42 : vector<8x64xf32> to vector<8x64xbf16>
    %cst_59 = arith.constant dense<0.000000e+00> : vector<8x32xf32>
    %44 = tpu.matmul %43, %5, %cst_59 {dimension_numbers = #tpu.dot_dimension_numbers<[1], [0], [0], [1], [0, 0, 1, 1], [], []>} : vector<8x64xbf16>, vector<64x32xbf16>, vector<8x32xf32> -> vector<8x32xf32>
    %45 = vector.broadcast %7 : vector<1x32xf32> to vector<8x32xf32>
    %46 = arith.addf %44, %45 : vector<8x32xf32>
    %c0_60 = arith.constant 0 : index
    %c0_61 = arith.constant 0 : index
    %47 = vector.load %arg32[%c0_60, %c0_61] : memref<8x32xf32, #tpu.memory_space<vmem>>, vector<8x32xf32>
    tpu.vector_store %arg32[%c0_60, %c0_61], %46 {strides = array<i32>} : memref<8x32xf32, #tpu.memory_space<vmem>>, vector<8x32xf32>,
    %48 = arith.truncf %36 : vector<8x32xf32> to vector<8x32xbf16>
    %cst_62 = arith.constant dense<0.000000e+00> : vector<8x128xf32>
    %49 = tpu.matmul %48, %8, %cst_62 {dimension_numbers = #tpu.dot_dimension_numbers<[1], [0], [0], [1], [0, 0, 1, 1], [], []>} : vector<8x32xbf16>, vector<32x128xbf16>, vector<8x128xf32> -> vector<8x128xf32>
    %50 = vector.broadcast %12 : vector<1x128xf32> to vector<8x128xf32>
    %51 = arith.addf %49, %50 : vector<8x128xf32>
    %52 = math.tanh %51 : vector<8x128xf32>
    %53 = arith.truncf %52 : vector<8x128xf32> to vector<8x128xbf16>
    %cst_63 = arith.constant dense<0.000000e+00> : vector<8x128xf32>
    %54 = tpu.matmul %53, %9, %cst_63 {dimension_numbers = #tpu.dot_dimension_numbers<[1], [0], [0], [1], [0, 0, 1, 1], [], []>} : vector<8x128xbf16>, vector<128x128xbf16>, vector<8x128xf32> -> vector<8x128xf32>
    %55 = vector.broadcast %13 : vector<1x128xf32> to vector<8x128xf32>
    %56 = arith.addf %54, %55 : vector<8x128xf32>
    %57 = math.tanh %56 : vector<8x128xf32>
    %58 = arith.truncf %57 : vector<8x128xf32> to vector<8x128xbf16>
    %cst_64 = arith.constant dense<0.000000e+00> : vector<8x128xf32>
    %59 = tpu.matmul %58, %10, %cst_64 {dimension_numbers = #tpu.dot_dimension_numbers<[1], [0], [0], [1], [0, 0, 1, 1], [], []>} : vector<8x128xbf16>, vector<128x128xbf16>, vector<8x128xf32> -> vector<8x128xf32>
    %60 = vector.broadcast %14 : vector<1x128xf32> to vector<8x128xf32>
    %61 = arith.addf %59, %60 : vector<8x128xf32>
    %62 = math.tanh %61 : vector<8x128xf32>
    %63 = arith.truncf %62 : vector<8x128xf32> to vector<8x128xbf16>
    %cst_65 = arith.constant dense<0.000000e+00> : vector<8x3xf32>
    %64 = tpu.matmul %63, %11, %cst_65 {dimension_numbers = #tpu.dot_dimension_numbers<[1], [0], [0], [1], [0, 0, 1, 1], [], []>} : vector<8x128xbf16>, vector<128x3xbf16>, vector<8x3xf32> -> vector<8x3xf32>
    %65 = vector.broadcast %15 : vector<1x3xf32> to vector<8x3xf32>
    %66 = arith.addf %64, %65 : vector<8x3xf32>
    %c0_66 = arith.constant 0 : index
    %c0_67 = arith.constant 0 : index
    %67 = vector.load %arg31[%c0_66, %c0_67] : memref<8x3xf32, #tpu.memory_space<vmem>>, vector<8x3xf32>
    tpu.vector_store %arg31[%c0_66, %c0_67], %66 {strides = array<i32>} : memref<8x3xf32, #tpu.memory_space<vmem>>, vector<8x3xf32>,
    %cst_68 = arith.constant dense<0.000000e+00> : vector<8x32xf32>
    %68 = tpu.matmul %36, %20, %cst_68 {dimension_numbers = #tpu.dot_dimension_numbers<[1], [0], [0], [1], [0, 0, 1, 1], [], []>} : vector<8x32xf32>, vector<32x32xf32>, vector<8x32xf32> -> vector<8x32xf32>
    %cst_69 = arith.constant dense<0.000000e+00> : vector<8x80xf32>
    %69 = tpu.matmul %68, %21, %cst_69 {dimension_numbers = #tpu.dot_dimension_numbers<[1], [0], [0], [1], [0, 0, 1, 1], [], []>} : vector<8x32xf32>, vector<32x80xf32>, vector<8x80xf32> -> vector<8x80xf32>
    %cst_70 = arith.constant dense<0.000000e+00> : vector<8x80xf32>
    %70 = tpu.matmul %68, %22, %cst_70 {dimension_numbers = #tpu.dot_dimension_numbers<[1], [0], [0], [1], [0, 0, 1, 1], [], []>} : vector<8x32xf32>, vector<32x80xf32>, vector<8x80xf32> -> vector<8x80xf32>
    %71 = arith.mulf %69, %70 : vector<8x80xf32>
    %cst_71 = arith.constant dense<0.000000e+00> : vector<8x6xf32>
    %72 = tpu.matmul %71, %23, %cst_71 {dimension_numbers = #tpu.dot_dimension_numbers<[1], [0], [0], [1], [0, 0, 1, 1], [], []>} : vector<8x80xf32>, vector<80x6xf32>, vector<8x6xf32> -> vector<8x6xf32>
    %cst_72 = arith.constant dense<0.000000e+00> : vector<8x4xf32>
    %73 = tpu.matmul %71, %24, %cst_72 {dimension_numbers = #tpu.dot_dimension_numbers<[1], [0], [0], [1], [0, 0, 1, 1], [], []>} : vector<8x80xf32>, vector<80x4xf32>, vector<8x4xf32> -> vector<8x4xf32>
    %74 = math.sqrt %73 : vector<8x4xf32>
    %cst_73 = arith.constant dense<0.000000e+00> : vector<8x6xf32>
    %75 = tpu.matmul %74, %25, %cst_73 {dimension_numbers = #tpu.dot_dimension_numbers<[1], [0], [0], [1], [0, 0, 1, 1], [], []>} : vector<8x4xf32>, vector<4x6xf32>, vector<8x6xf32> -> vector<8x6xf32>
    %cst_74 = arith.constant dense<0.000000e+00> : vector<8x6xf32>
    %76 = tpu.matmul %74, %26, %cst_74 {dimension_numbers = #tpu.dot_dimension_numbers<[1], [0], [0], [1], [0, 0, 1, 1], [], []>} : vector<8x4xf32>, vector<4x6xf32>, vector<8x6xf32> -> vector<8x6xf32>
    %77 = arith.mulf %75, %76 : vector<8x6xf32>
    %cst_75 = arith.constant 9.99999974E-6 : f32
    %78 = vector.broadcast %cst_75 : f32 to vector<8x6xf32>
    %79 = arith.addf %77, %78 : vector<8x6xf32>
    %80 = arith.divf %72, %79 : vector<8x6xf32>
    %81 = vector.extract_strided_slice %16 {offsets = [0, 0], sizes = [1, 1], strides = [1, 1]} : vector<8x1xf32> to vector<1x1xf32>
    %82 = vector.broadcast %81 : vector<1x1xf32> to vector<8x6xf32>
    %83 = arith.mulf %80, %82 : vector<8x6xf32>
    %84 = vector.extract_strided_slice %18 {offsets = [0, 0], sizes = [1, 1], strides = [1, 1]} : vector<8x1xf32> to vector<1x1xf32>
    %85 = vector.broadcast %84 : vector<1x1xf32> to vector<8x6xf32>
    %86 = arith.addf %83, %85 : vector<8x6xf32>
    %87 = math.tanh %86 : vector<8x6xf32>
    %88 = vector.extract_strided_slice %16 {offsets = [1, 0], sizes = [1, 1], strides = [1, 1]} : vector<8x1xf32> to vector<1x1xf32>
    %89 = vector.broadcast %88 : vector<1x1xf32> to vector<8x6xf32>
    %90 = arith.mulf %80, %89 : vector<8x6xf32>
    %91 = vector.extract_strided_slice %18 {offsets = [1, 0], sizes = [1, 1], strides = [1, 1]} : vector<8x1xf32> to vector<1x1xf32>
    %92 = vector.broadcast %91 : vector<1x1xf32> to vector<8x6xf32>
    %93 = arith.addf %90, %92 : vector<8x6xf32>
    %94 = math.tanh %93 : vector<8x6xf32>
    %95 = vector.extract_strided_slice %16 {offsets = [2, 0], sizes = [1, 1], strides = [1, 1]} : vector<8x1xf32> to vector<1x1xf32>
    %96 = vector.broadcast %95 : vector<1x1xf32> to vector<8x6xf32>
    %97 = arith.mulf %80, %96 : vector<8x6xf32>
    %98 = vector.extract_strided_slice %18 {offsets = [2, 0], sizes = [1, 1], strides = [1, 1]} : vector<8x1xf32> to vector<1x1xf32>
    %99 = vector.broadcast %98 : vector<1x1xf32> to vector<8x6xf32>
    %100 = arith.addf %97, %99 : vector<8x6xf32>
    %101 = math.tanh %100 : vector<8x6xf32>
    %102 = vector.extract_strided_slice %16 {offsets = [3, 0], sizes = [1, 1], strides = [1, 1]} : vector<8x1xf32> to vector<1x1xf32>
    %103 = vector.broadcast %102 : vector<1x1xf32> to vector<8x6xf32>
    %104 = arith.mulf %80, %103 : vector<8x6xf32>
    %105 = vector.extract_strided_slice %18 {offsets = [3, 0], sizes = [1, 1], strides = [1, 1]} : vector<8x1xf32> to vector<1x1xf32>
    %106 = vector.broadcast %105 : vector<1x1xf32> to vector<8x6xf32>
    %107 = arith.addf %104, %106 : vector<8x6xf32>
    %108 = math.tanh %107 : vector<8x6xf32>
    %109 = vector.extract_strided_slice %16 {offsets = [4, 0], sizes = [1, 1], strides = [1, 1]} : vector<8x1xf32> to vector<1x1xf32>
    %110 = vector.broadcast %109 : vector<1x1xf32> to vector<8x6xf32>
    %111 = arith.mulf %80, %110 : vector<8x6xf32>
    %112 = vector.extract_strided_slice %18 {offsets = [4, 0], sizes = [1, 1], strides = [1, 1]} : vector<8x1xf32> to vector<1x1xf32>
    %113 = vector.broadcast %112 : vector<1x1xf32> to vector<8x6xf32>
    %114 = arith.addf %111, %113 : vector<8x6xf32>
    %115 = math.tanh %114 : vector<8x6xf32>
    %116 = vector.extract_strided_slice %16 {offsets = [5, 0], sizes = [1, 1], strides = [1, 1]} : vector<8x1xf32> to vector<1x1xf32>
    %117 = vector.broadcast %116 : vector<1x1xf32> to vector<8x6xf32>
    %118 = arith.mulf %80, %117 : vector<8x6xf32>
    %119 = vector.extract_strided_slice %18 {offsets = [5, 0], sizes = [1, 1], strides = [1, 1]} : vector<8x1xf32> to vector<1x1xf32>
    %120 = vector.broadcast %119 : vector<1x1xf32> to vector<8x6xf32>
    %121 = arith.addf %118, %120 : vector<8x6xf32>
    %122 = math.tanh %121 : vector<8x6xf32>
    %123 = vector.extract_strided_slice %16 {offsets = [6, 0], sizes = [1, 1], strides = [1, 1]} : vector<8x1xf32> to vector<1x1xf32>
    %124 = vector.broadcast %123 : vector<1x1xf32> to vector<8x6xf32>
    %125 = arith.mulf %80, %124 : vector<8x6xf32>
    %126 = vector.extract_strided_slice %18 {offsets = [6, 0], sizes = [1, 1], strides = [1, 1]} : vector<8x1xf32> to vector<1x1xf32>
    %127 = vector.broadcast %126 : vector<1x1xf32> to vector<8x6xf32>
    %128 = arith.addf %125, %127 : vector<8x6xf32>
    %129 = math.tanh %128 : vector<8x6xf32>
    %130 = vector.extract_strided_slice %16 {offsets = [7, 0], sizes = [1, 1], strides = [1, 1]} : vector<8x1xf32> to vector<1x1xf32>
    %131 = vector.broadcast %130 : vector<1x1xf32> to vector<8x6xf32>
    %132 = arith.mulf %80, %131 : vector<8x6xf32>
    %133 = vector.extract_strided_slice %18 {offsets = [7, 0], sizes = [1, 1], strides = [1, 1]} : vector<8x1xf32> to vector<1x1xf32>
    %134 = vector.broadcast %133 : vector<1x1xf32> to vector<8x6xf32>
    %135 = arith.addf %132, %134 : vector<8x6xf32>
    %136 = math.tanh %135 : vector<8x6xf32>
    %137 = vector.extract_strided_slice %17 {offsets = [0, 0], sizes = [1, 1], strides = [1, 1]} : vector<8x1xf32> to vector<1x1xf32>
    %138 = vector.broadcast %137 : vector<1x1xf32> to vector<8x6xf32>
    %139 = arith.mulf %87, %138 : vector<8x6xf32>
    %140 = vector.broadcast %19 : vector<1x1xf32> to vector<8x6xf32>
    %141 = arith.addf %139, %140 : vector<8x6xf32>
    %142 = vector.extract_strided_slice %17 {offsets = [1, 0], sizes = [1, 1], strides = [1, 1]} : vector<8x1xf32> to vector<1x1xf32>
    %143 = vector.broadcast %142 : vector<1x1xf32> to vector<8x6xf32>
    %144 = arith.mulf %94, %143 : vector<8x6xf32>
    %145 = arith.addf %141, %144 : vector<8x6xf32>
    %146 = vector.extract_strided_slice %17 {offsets = [2, 0], sizes = [1, 1], strides = [1, 1]} : vector<8x1xf32> to vector<1x1xf32>
    %147 = vector.broadcast %146 : vector<1x1xf32> to vector<8x6xf32>
    %148 = arith.mulf %101, %147 : vector<8x6xf32>
    %149 = arith.addf %145, %148 : vector<8x6xf32>
    %150 = vector.extract_strided_slice %17 {offsets = [3, 0], sizes = [1, 1], strides = [1, 1]} : vector<8x1xf32> to vector<1x1xf32>
    %151 = vector.broadcast %150 : vector<1x1xf32> to vector<8x6xf32>
    %152 = arith.mulf %108, %151 : vector<8x6xf32>
    %153 = arith.addf %149, %152 : vector<8x6xf32>
    %154 = vector.extract_strided_slice %17 {offsets = [4, 0], sizes = [1, 1], strides = [1, 1]} : vector<8x1xf32> to vector<1x1xf32>
    %155 = vector.broadcast %154 : vector<1x1xf32> to vector<8x6xf32>
    %156 = arith.mulf %115, %155 : vector<8x6xf32>
    %157 = arith.addf %153, %156 : vector<8x6xf32>
    %158 = vector.extract_strided_slice %17 {offsets = [5, 0], sizes = [1, 1], strides = [1, 1]} : vector<8x1xf32> to vector<1x1xf32>
    %159 = vector.broadcast %158 : vector<1x1xf32> to vector<8x6xf32>
    %160 = arith.mulf %122, %159 : vector<8x6xf32>
    %161 = arith.addf %157, %160 : vector<8x6xf32>
    %162 = vector.extract_strided_slice %17 {offsets = [6, 0], sizes = [1, 1], strides = [1, 1]} : vector<8x1xf32> to vector<1x1xf32>
    %163 = vector.broadcast %162 : vector<1x1xf32> to vector<8x6xf32>
    %164 = arith.mulf %129, %163 : vector<8x6xf32>
    %165 = arith.addf %161, %164 : vector<8x6xf32>
    %166 = vector.extract_strided_slice %17 {offsets = [7, 0], sizes = [1, 1], strides = [1, 1]} : vector<8x1xf32> to vector<1x1xf32>
    %167 = vector.broadcast %166 : vector<1x1xf32> to vector<8x6xf32>
    %168 = arith.mulf %136, %167 : vector<8x6xf32>
    %169 = arith.addf %165, %168 : vector<8x6xf32>
    %c0_76 = arith.constant 0 : index
    %c0_77 = arith.constant 0 : index
    %170 = vector.load %arg30[%c0_76, %c0_77] : memref<8x6xf32, #tpu.memory_space<vmem>>, vector<8x6xf32>
    tpu.vector_store %arg30[%c0_76, %c0_77], %169 {strides = array<i32>} : memref<8x6xf32, #tpu.memory_space<vmem>>, vector<8x6xf32>,
    return
  }
  func.func @transform_0(%arg0: i32) -> (i32, i32) {
    %c0_i32 = arith.constant 0 : i32
    %c0_i32_0 = arith.constant 0 : i32
    return %arg0, %c0_i32 : i32, i32
  }
  func.func @transform_1(%arg0: i32) -> (i32, i32) {
    %c0_i32 = arith.constant 0 : i32
    %c0_i32_0 = arith.constant 0 : i32
    %c0_i32_1 = arith.constant 0 : i32
    return %c0_i32, %c0_i32_0 : i32, i32
  }
  func.func @transform_2(%arg0: i32) -> (i32, i32) {
    %c0_i32 = arith.constant 0 : i32
    %c0_i32_0 = arith.constant 0 : i32
    %c0_i32_1 = arith.constant 0 : i32
    return %c0_i32, %c0_i32_0 : i32, i32
  }
  func.func @transform_3(%arg0: i32) -> (i32, i32) {
    %c0_i32 = arith.constant 0 : i32
    %c0_i32_0 = arith.constant 0 : i32
    %c0_i32_1 = arith.constant 0 : i32
    return %c0_i32, %c0_i32_0 : i32, i32
  }
  func.func @transform_4(%arg0: i32) -> (i32, i32) {
    %c0_i32 = arith.constant 0 : i32
    %c0_i32_0 = arith.constant 0 : i32
    %c0_i32_1 = arith.constant 0 : i32
    return %c0_i32, %c0_i32_0 : i32, i32
  }
  func.func @transform_5(%arg0: i32) -> (i32, i32) {
    %c0_i32 = arith.constant 0 : i32
    %c0_i32_0 = arith.constant 0 : i32
    %c0_i32_1 = arith.constant 0 : i32
    return %c0_i32, %c0_i32_0 : i32, i32
  }
  func.func @transform_6(%arg0: i32) -> (i32, i32) {
    %c0_i32 = arith.constant 0 : i32
    %c0_i32_0 = arith.constant 0 : i32
    %c0_i32_1 = arith.constant 0 : i32
    return %c0_i32, %c0_i32_0 : i32, i32
  }
  func.func @transform_7(%arg0: i32) -> (i32, i32) {
    %c0_i32 = arith.constant 0 : i32
    %c0_i32_0 = arith.constant 0 : i32
    %c0_i32_1 = arith.constant 0 : i32
    return %c0_i32, %c0_i32_0 : i32, i32
  }
  func.func @transform_8(%arg0: i32) -> (i32, i32) {
    %c0_i32 = arith.constant 0 : i32
    %c0_i32_0 = arith.constant 0 : i32
    %c0_i32_1 = arith.constant 0 : i32
    return %c0_i32, %c0_i32_0 : i32, i32
  }
  func.func @transform_9(%arg0: i32) -> (i32, i32) {
    %c0_i32 = arith.constant 0 : i32
    %c0_i32_0 = arith.constant 0 : i32
    %c0_i32_1 = arith.constant 0 : i32
    return %c0_i32, %c0_i32_0 : i32, i32
  }
  func.func @transform_10(%arg0: i32) -> (i32, i32) {
    %c0_i32 = arith.constant 0 : i32
    %c0_i32_0 = arith.constant 0 : i32
    %c0_i32_1 = arith.constant 0 : i32
    return %c0_i32, %c0_i32_0 : i32, i32
  }
  func.func @transform_11(%arg0: i32) -> (i32, i32) {
    %c0_i32 = arith.constant 0 : i32
    %c0_i32_0 = arith.constant 0 : i32
    %c0_i32_1 = arith.constant 0 : i32
    return %c0_i32, %c0_i32_0 : i32, i32
  }
  func.func @transform_12(%arg0: i32) -> (i32, i32) {
    %c0_i32 = arith.constant 0 : i32
    %c0_i32_0 = arith.constant 0 : i32
    %c0_i32_1 = arith.constant 0 : i32
    return %c0_i32, %c0_i32_0 : i32, i32
  }
  func.func @transform_13(%arg0: i32) -> (i32, i32) {
    %c0_i32 = arith.constant 0 : i32
    %c0_i32_0 = arith.constant 0 : i32
    %c0_i32_1 = arith.constant 0 : i32
    return %c0_i32, %c0_i32_0 : i32, i32
  }
  func.func @transform_14(%arg0: i32) -> (i32, i32) {
    %c0_i32 = arith.constant 0 : i32
    %c0_i32_0 = arith.constant 0 : i32
    %c0_i32_1 = arith.constant 0 : i32
    return %c0_i32, %c0_i32_0 : i32, i32
  }
  func.func @transform_15(%arg0: i32) -> (i32, i32) {
    %c0_i32 = arith.constant 0 : i32
    %c0_i32_0 = arith.constant 0 : i32
    %c0_i32_1 = arith.constant 0 : i32
    return %c0_i32, %c0_i32_0 : i32, i32
  }
  func.func @transform_16(%arg0: i32) -> (i32, i32) {
    %c0_i32 = arith.constant 0 : i32
    %c0_i32_0 = arith.constant 0 : i32
    %c0_i32_1 = arith.constant 0 : i32
    return %c0_i32, %c0_i32_0 : i32, i32
  }
  func.func @transform_17(%arg0: i32) -> (i32, i32) {
    %c0_i32 = arith.constant 0 : i32
    %c0_i32_0 = arith.constant 0 : i32
    %c0_i32_1 = arith.constant 0 : i32
    return %c0_i32, %c0_i32_0 : i32, i32
  }
  func.func @transform_18(%arg0: i32) -> (i32, i32) {
    %c0_i32 = arith.constant 0 : i32
    %c0_i32_0 = arith.constant 0 : i32
    %c0_i32_1 = arith.constant 0 : i32
    return %c0_i32, %c0_i32_0 : i32, i32
  }
  func.func @transform_19(%arg0: i32) -> (i32, i32) {
    %c0_i32 = arith.constant 0 : i32
    %c0_i32_0 = arith.constant 0 : i32
    %c0_i32_1 = arith.constant 0 : i32
    return %c0_i32, %c0_i32_0 : i32, i32
  }
  func.func @transform_20(%arg0: i32) -> (i32, i32) {
    %c0_i32 = arith.constant 0 : i32
    %c0_i32_0 = arith.constant 0 : i32
    %c0_i32_1 = arith.constant 0 : i32
    return %c0_i32, %c0_i32_0 : i32, i32
  }
  func.func @transform_21(%arg0: i32) -> (i32, i32) {
    %c0_i32 = arith.constant 0 : i32
    %c0_i32_0 = arith.constant 0 : i32
    %c0_i32_1 = arith.constant 0 : i32
    return %c0_i32, %c0_i32_0 : i32, i32
  }
  func.func @transform_22(%arg0: i32) -> (i32, i32) {
    %c0_i32 = arith.constant 0 : i32
    %c0_i32_0 = arith.constant 0 : i32
    %c0_i32_1 = arith.constant 0 : i32
    return %c0_i32, %c0_i32_0 : i32, i32
  }
  func.func @transform_23(%arg0: i32) -> (i32, i32) {
    %c0_i32 = arith.constant 0 : i32
    %c0_i32_0 = arith.constant 0 : i32
    %c0_i32_1 = arith.constant 0 : i32
    return %c0_i32, %c0_i32_0 : i32, i32
  }
  func.func @transform_24(%arg0: i32) -> (i32, i32) {
    %c0_i32 = arith.constant 0 : i32
    %c0_i32_0 = arith.constant 0 : i32
    %c0_i32_1 = arith.constant 0 : i32
    return %c0_i32, %c0_i32_0 : i32, i32
  }
  func.func @transform_25(%arg0: i32) -> (i32, i32) {
    %c0_i32 = arith.constant 0 : i32
    %c0_i32_0 = arith.constant 0 : i32
    %c0_i32_1 = arith.constant 0 : i32
    return %c0_i32, %c0_i32_0 : i32, i32
  }
  func.func @transform_26(%arg0: i32) -> (i32, i32) {
    %c0_i32 = arith.constant 0 : i32
    %c0_i32_0 = arith.constant 0 : i32
    %c0_i32_1 = arith.constant 0 : i32
    return %c0_i32, %c0_i32_0 : i32, i32
  }
  func.func @transform_27(%arg0: i32) -> (i32, i32) {
    %c0_i32 = arith.constant 0 : i32
    %c0_i32_0 = arith.constant 0 : i32
    %c0_i32_1 = arith.constant 0 : i32
    return %c0_i32, %c0_i32_0 : i32, i32
  }
  func.func @transform_28(%arg0: i32) -> (i32, i32) {
    %c0_i32 = arith.constant 0 : i32
    %c0_i32_0 = arith.constant 0 : i32
    return %arg0, %c0_i32 : i32, i32
  }
  func.func @transform_29(%arg0: i32) -> (i32, i32) {
    %c0_i32 = arith.constant 0 : i32
    %c0_i32_0 = arith.constant 0 : i32
    return %arg0, %c0_i32 : i32, i32
  }
  func.func @transform_30(%arg0: i32) -> (i32, i32) {
    %c0_i32 = arith.constant 0 : i32
    %c0_i32_0 = arith.constant 0 : i32
    return %arg0, %c0_i32 : i32, i32
  }
  func.func @transform_31(%arg0: i32) -> (i32, i32) {
    %c0_i32 = arith.constant 0 : i32
    %c0_i32_0 = arith.constant 0 : i32
    return %arg0, %c0_i32 : i32, i32
  }
}

module attributes {stable_mosaic.version = 11 : i64} {
  func.func @kernel(%arg0: i32, %arg1: memref<2x64xf32, #tpu.memory_space<vmem>>, %arg2: memref<64x192xbf16, #tpu.memory_space<vmem>>, %arg3: memref<192x96xbf16, #tpu.memory_space<vmem>>, %arg4: memref<1x192xf32, #tpu.memory_space<vmem>>, %arg5: memref<1x96xf32, #tpu.memory_space<vmem>>, %arg6: memref<8x18xf32, #tpu.memory_space<vmem>>, %arg7: memref<8x18xf32, #tpu.memory_space<vmem>>, %arg8: memref<8x18xf32, #tpu.memory_space<vmem>>, %arg9: memref<1x18xf32, #tpu.memory_space<vmem>>, %arg10: memref<96x96xf32, #tpu.memory_space<vmem>>, %arg11: memref<96x240xf32, #tpu.memory_space<vmem>>, %arg12: memref<96x240xf32, #tpu.memory_space<vmem>>, %arg13: memref<240x18xf32, #tpu.memory_space<vmem>>, %arg14: memref<240x12xf32, #tpu.memory_space<vmem>>, %arg15: memref<12x18xf32, #tpu.memory_space<vmem>>, %arg16: memref<12x18xf32, #tpu.memory_space<vmem>>, %arg17: memref<2x18xf32, #tpu.memory_space<vmem>>) attributes {dimension_semantics = [#tpu.dimension_semantics<arbitrary>], iteration_bounds = array<i64: 1>, scalar_prefetch = 0 : i64, scratch_operands = 0 : i64, tpu.core_type = #tpu.core_type<tc>, window_params = [{pipeline_mode = #tpu.pipeline_mode<synchronous>, transform_indices = @transform_0, window_bounds = array<i64: 2, 64>}, {pipeline_mode = #tpu.pipeline_mode<synchronous>, transform_indices = @transform_1, window_bounds = array<i64: 64, 192>}, {pipeline_mode = #tpu.pipeline_mode<synchronous>, transform_indices = @transform_2, window_bounds = array<i64: 192, 96>}, {pipeline_mode = #tpu.pipeline_mode<synchronous>, transform_indices = @transform_3, window_bounds = array<i64: 1, 192>}, {pipeline_mode = #tpu.pipeline_mode<synchronous>, transform_indices = @transform_4, window_bounds = array<i64: 1, 96>}, {pipeline_mode = #tpu.pipeline_mode<synchronous>, transform_indices = @transform_5, window_bounds = array<i64: 8, 18>}, {pipeline_mode = #tpu.pipeline_mode<synchronous>, transform_indices = @transform_6, window_bounds = array<i64: 8, 18>}, {pipeline_mode = #tpu.pipeline_mode<synchronous>, transform_indices = @transform_7, window_bounds = array<i64: 8, 18>}, {pipeline_mode = #tpu.pipeline_mode<synchronous>, transform_indices = @transform_8, window_bounds = array<i64: 1, 18>}, {pipeline_mode = #tpu.pipeline_mode<synchronous>, transform_indices = @transform_9, window_bounds = array<i64: 96, 96>}, {pipeline_mode = #tpu.pipeline_mode<synchronous>, transform_indices = @transform_10, window_bounds = array<i64: 96, 240>}, {pipeline_mode = #tpu.pipeline_mode<synchronous>, transform_indices = @transform_11, window_bounds = array<i64: 96, 240>}, {pipeline_mode = #tpu.pipeline_mode<synchronous>, transform_indices = @transform_12, window_bounds = array<i64: 240, 18>}, {pipeline_mode = #tpu.pipeline_mode<synchronous>, transform_indices = @transform_13, window_bounds = array<i64: 240, 12>}, {pipeline_mode = #tpu.pipeline_mode<synchronous>, transform_indices = @transform_14, window_bounds = array<i64: 12, 18>}, {pipeline_mode = #tpu.pipeline_mode<synchronous>, transform_indices = @transform_15, window_bounds = array<i64: 12, 18>}, {pipeline_mode = #tpu.pipeline_mode<synchronous>, transform_indices = @transform_16, window_bounds = array<i64: 2, 18>}]} {
    %c0 = arith.constant 0 : index
    %c0_0 = arith.constant 0 : index
    %0 = vector.load %arg2[%c0, %c0_0] : memref<64x192xbf16, #tpu.memory_space<vmem>>, vector<64x192xbf16>
    %c0_1 = arith.constant 0 : index
    %c0_2 = arith.constant 0 : index
    %1 = vector.load %arg3[%c0_1, %c0_2] : memref<192x96xbf16, #tpu.memory_space<vmem>>, vector<192x96xbf16>
    %c0_3 = arith.constant 0 : index
    %c0_4 = arith.constant 0 : index
    %2 = vector.load %arg4[%c0_3, %c0_4] : memref<1x192xf32, #tpu.memory_space<vmem>>, vector<1x192xf32>
    %c0_5 = arith.constant 0 : index
    %c0_6 = arith.constant 0 : index
    %3 = vector.load %arg5[%c0_5, %c0_6] : memref<1x96xf32, #tpu.memory_space<vmem>>, vector<1x96xf32>
    %c0_7 = arith.constant 0 : index
    %c0_8 = arith.constant 0 : index
    %4 = vector.load %arg6[%c0_7, %c0_8] : memref<8x18xf32, #tpu.memory_space<vmem>>, vector<8x18xf32>
    %c0_9 = arith.constant 0 : index
    %c0_10 = arith.constant 0 : index
    %5 = vector.load %arg7[%c0_9, %c0_10] : memref<8x18xf32, #tpu.memory_space<vmem>>, vector<8x18xf32>
    %c0_11 = arith.constant 0 : index
    %c0_12 = arith.constant 0 : index
    %6 = vector.load %arg8[%c0_11, %c0_12] : memref<8x18xf32, #tpu.memory_space<vmem>>, vector<8x18xf32>
    %c0_13 = arith.constant 0 : index
    %c0_14 = arith.constant 0 : index
    %7 = vector.load %arg9[%c0_13, %c0_14] : memref<1x18xf32, #tpu.memory_space<vmem>>, vector<1x18xf32>
    %c0_15 = arith.constant 0 : index
    %c0_16 = arith.constant 0 : index
    %8 = vector.load %arg10[%c0_15, %c0_16] : memref<96x96xf32, #tpu.memory_space<vmem>>, vector<96x96xf32>
    %c0_17 = arith.constant 0 : index
    %c0_18 = arith.constant 0 : index
    %9 = vector.load %arg11[%c0_17, %c0_18] : memref<96x240xf32, #tpu.memory_space<vmem>>, vector<96x240xf32>
    %c0_19 = arith.constant 0 : index
    %c0_20 = arith.constant 0 : index
    %10 = vector.load %arg12[%c0_19, %c0_20] : memref<96x240xf32, #tpu.memory_space<vmem>>, vector<96x240xf32>
    %c0_21 = arith.constant 0 : index
    %c0_22 = arith.constant 0 : index
    %11 = vector.load %arg13[%c0_21, %c0_22] : memref<240x18xf32, #tpu.memory_space<vmem>>, vector<240x18xf32>
    %c0_23 = arith.constant 0 : index
    %c0_24 = arith.constant 0 : index
    %12 = vector.load %arg14[%c0_23, %c0_24] : memref<240x12xf32, #tpu.memory_space<vmem>>, vector<240x12xf32>
    %c0_25 = arith.constant 0 : index
    %c0_26 = arith.constant 0 : index
    %13 = vector.load %arg15[%c0_25, %c0_26] : memref<12x18xf32, #tpu.memory_space<vmem>>, vector<12x18xf32>
    %c0_27 = arith.constant 0 : index
    %c0_28 = arith.constant 0 : index
    %14 = vector.load %arg16[%c0_27, %c0_28] : memref<12x18xf32, #tpu.memory_space<vmem>>, vector<12x18xf32>
    %c0_29 = arith.constant 0 : index
    %c0_30 = arith.constant 0 : index
    %15 = vector.load %arg1[%c0_29, %c0_30] : memref<2x64xf32, #tpu.memory_space<vmem>>, vector<2x64xf32>
    %16 = arith.truncf %15 : vector<2x64xf32> to vector<2x64xbf16>
    %cst = arith.constant dense<0.000000e+00> : vector<2x192xf32>
    %17 = tpu.matmul %16, %0, %cst {dimension_numbers = #tpu.dot_dimension_numbers<[1], [0], [0], [1], [0, 0, 1, 1], [], []>} : vector<2x64xbf16>, vector<64x192xbf16>, vector<2x192xf32> -> vector<2x192xf32>
    %18 = vector.broadcast %2 : vector<1x192xf32> to vector<2x192xf32>
    %19 = arith.addf %17, %18 : vector<2x192xf32>
    %20 = math.tanh %19 : vector<2x192xf32>
    %21 = arith.truncf %20 : vector<2x192xf32> to vector<2x192xbf16>
    %cst_31 = arith.constant dense<0.000000e+00> : vector<2x96xf32>
    %22 = tpu.matmul %21, %1, %cst_31 {dimension_numbers = #tpu.dot_dimension_numbers<[1], [0], [0], [1], [0, 0, 1, 1], [], []>} : vector<2x192xbf16>, vector<192x96xbf16>, vector<2x96xf32> -> vector<2x96xf32>
    %23 = vector.broadcast %3 : vector<1x96xf32> to vector<2x96xf32>
    %24 = arith.addf %22, %23 : vector<2x96xf32>
    %cst_32 = arith.constant dense<0.000000e+00> : vector<2x96xf32>
    %25 = tpu.matmul %24, %8, %cst_32 {dimension_numbers = #tpu.dot_dimension_numbers<[1], [0], [0], [1], [0, 0, 1, 1], [], []>} : vector<2x96xf32>, vector<96x96xf32>, vector<2x96xf32> -> vector<2x96xf32>
    %cst_33 = arith.constant dense<0.000000e+00> : vector<2x240xf32>
    %26 = tpu.matmul %25, %9, %cst_33 {dimension_numbers = #tpu.dot_dimension_numbers<[1], [0], [0], [1], [0, 0, 1, 1], [], []>} : vector<2x96xf32>, vector<96x240xf32>, vector<2x240xf32> -> vector<2x240xf32>
    %cst_34 = arith.constant dense<0.000000e+00> : vector<2x240xf32>
    %27 = tpu.matmul %25, %10, %cst_34 {dimension_numbers = #tpu.dot_dimension_numbers<[1], [0], [0], [1], [0, 0, 1, 1], [], []>} : vector<2x96xf32>, vector<96x240xf32>, vector<2x240xf32> -> vector<2x240xf32>
    %28 = arith.mulf %26, %27 : vector<2x240xf32>
    %cst_35 = arith.constant dense<0.000000e+00> : vector<2x18xf32>
    %29 = tpu.matmul %28, %11, %cst_35 {dimension_numbers = #tpu.dot_dimension_numbers<[1], [0], [0], [1], [0, 0, 1, 1], [], []>} : vector<2x240xf32>, vector<240x18xf32>, vector<2x18xf32> -> vector<2x18xf32>
    %cst_36 = arith.constant dense<0.000000e+00> : vector<2x12xf32>
    %30 = tpu.matmul %28, %12, %cst_36 {dimension_numbers = #tpu.dot_dimension_numbers<[1], [0], [0], [1], [0, 0, 1, 1], [], []>} : vector<2x240xf32>, vector<240x12xf32>, vector<2x12xf32> -> vector<2x12xf32>
    %31 = math.sqrt %30 : vector<2x12xf32>
    %cst_37 = arith.constant dense<0.000000e+00> : vector<2x18xf32>
    %32 = tpu.matmul %31, %13, %cst_37 {dimension_numbers = #tpu.dot_dimension_numbers<[1], [0], [0], [1], [0, 0, 1, 1], [], []>} : vector<2x12xf32>, vector<12x18xf32>, vector<2x18xf32> -> vector<2x18xf32>
    %cst_38 = arith.constant dense<0.000000e+00> : vector<2x18xf32>
    %33 = tpu.matmul %31, %14, %cst_38 {dimension_numbers = #tpu.dot_dimension_numbers<[1], [0], [0], [1], [0, 0, 1, 1], [], []>} : vector<2x12xf32>, vector<12x18xf32>, vector<2x18xf32> -> vector<2x18xf32>
    %34 = arith.mulf %32, %33 : vector<2x18xf32>
    %cst_39 = arith.constant 9.99999974E-6 : f32
    %35 = vector.broadcast %cst_39 : f32 to vector<2x18xf32>
    %36 = arith.addf %34, %35 : vector<2x18xf32>
    %37 = arith.divf %29, %36 : vector<2x18xf32>
    %38 = vector.extract_strided_slice %4 {offsets = [0, 0], sizes = [1, 18], strides = [1, 1]} : vector<8x18xf32> to vector<1x18xf32>
    %39 = vector.broadcast %38 : vector<1x18xf32> to vector<2x18xf32>
    %40 = arith.mulf %37, %39 : vector<2x18xf32>
    %41 = vector.extract_strided_slice %6 {offsets = [0, 0], sizes = [1, 18], strides = [1, 1]} : vector<8x18xf32> to vector<1x18xf32>
    %42 = vector.broadcast %41 : vector<1x18xf32> to vector<2x18xf32>
    %43 = arith.addf %40, %42 : vector<2x18xf32>
    %44 = math.tanh %43 : vector<2x18xf32>
    %45 = vector.extract_strided_slice %4 {offsets = [1, 0], sizes = [1, 18], strides = [1, 1]} : vector<8x18xf32> to vector<1x18xf32>
    %46 = vector.broadcast %45 : vector<1x18xf32> to vector<2x18xf32>
    %47 = arith.mulf %37, %46 : vector<2x18xf32>
    %48 = vector.extract_strided_slice %6 {offsets = [1, 0], sizes = [1, 18], strides = [1, 1]} : vector<8x18xf32> to vector<1x18xf32>
    %49 = vector.broadcast %48 : vector<1x18xf32> to vector<2x18xf32>
    %50 = arith.addf %47, %49 : vector<2x18xf32>
    %51 = math.tanh %50 : vector<2x18xf32>
    %52 = vector.extract_strided_slice %4 {offsets = [2, 0], sizes = [1, 18], strides = [1, 1]} : vector<8x18xf32> to vector<1x18xf32>
    %53 = vector.broadcast %52 : vector<1x18xf32> to vector<2x18xf32>
    %54 = arith.mulf %37, %53 : vector<2x18xf32>
    %55 = vector.extract_strided_slice %6 {offsets = [2, 0], sizes = [1, 18], strides = [1, 1]} : vector<8x18xf32> to vector<1x18xf32>
    %56 = vector.broadcast %55 : vector<1x18xf32> to vector<2x18xf32>
    %57 = arith.addf %54, %56 : vector<2x18xf32>
    %58 = math.tanh %57 : vector<2x18xf32>
    %59 = vector.extract_strided_slice %4 {offsets = [3, 0], sizes = [1, 18], strides = [1, 1]} : vector<8x18xf32> to vector<1x18xf32>
    %60 = vector.broadcast %59 : vector<1x18xf32> to vector<2x18xf32>
    %61 = arith.mulf %37, %60 : vector<2x18xf32>
    %62 = vector.extract_strided_slice %6 {offsets = [3, 0], sizes = [1, 18], strides = [1, 1]} : vector<8x18xf32> to vector<1x18xf32>
    %63 = vector.broadcast %62 : vector<1x18xf32> to vector<2x18xf32>
    %64 = arith.addf %61, %63 : vector<2x18xf32>
    %65 = math.tanh %64 : vector<2x18xf32>
    %66 = vector.extract_strided_slice %4 {offsets = [4, 0], sizes = [1, 18], strides = [1, 1]} : vector<8x18xf32> to vector<1x18xf32>
    %67 = vector.broadcast %66 : vector<1x18xf32> to vector<2x18xf32>
    %68 = arith.mulf %37, %67 : vector<2x18xf32>
    %69 = vector.extract_strided_slice %6 {offsets = [4, 0], sizes = [1, 18], strides = [1, 1]} : vector<8x18xf32> to vector<1x18xf32>
    %70 = vector.broadcast %69 : vector<1x18xf32> to vector<2x18xf32>
    %71 = arith.addf %68, %70 : vector<2x18xf32>
    %72 = math.tanh %71 : vector<2x18xf32>
    %73 = vector.extract_strided_slice %4 {offsets = [5, 0], sizes = [1, 18], strides = [1, 1]} : vector<8x18xf32> to vector<1x18xf32>
    %74 = vector.broadcast %73 : vector<1x18xf32> to vector<2x18xf32>
    %75 = arith.mulf %37, %74 : vector<2x18xf32>
    %76 = vector.extract_strided_slice %6 {offsets = [5, 0], sizes = [1, 18], strides = [1, 1]} : vector<8x18xf32> to vector<1x18xf32>
    %77 = vector.broadcast %76 : vector<1x18xf32> to vector<2x18xf32>
    %78 = arith.addf %75, %77 : vector<2x18xf32>
    %79 = math.tanh %78 : vector<2x18xf32>
    %80 = vector.extract_strided_slice %4 {offsets = [6, 0], sizes = [1, 18], strides = [1, 1]} : vector<8x18xf32> to vector<1x18xf32>
    %81 = vector.broadcast %80 : vector<1x18xf32> to vector<2x18xf32>
    %82 = arith.mulf %37, %81 : vector<2x18xf32>
    %83 = vector.extract_strided_slice %6 {offsets = [6, 0], sizes = [1, 18], strides = [1, 1]} : vector<8x18xf32> to vector<1x18xf32>
    %84 = vector.broadcast %83 : vector<1x18xf32> to vector<2x18xf32>
    %85 = arith.addf %82, %84 : vector<2x18xf32>
    %86 = math.tanh %85 : vector<2x18xf32>
    %87 = vector.extract_strided_slice %4 {offsets = [7, 0], sizes = [1, 18], strides = [1, 1]} : vector<8x18xf32> to vector<1x18xf32>
    %88 = vector.broadcast %87 : vector<1x18xf32> to vector<2x18xf32>
    %89 = arith.mulf %37, %88 : vector<2x18xf32>
    %90 = vector.extract_strided_slice %6 {offsets = [7, 0], sizes = [1, 18], strides = [1, 1]} : vector<8x18xf32> to vector<1x18xf32>
    %91 = vector.broadcast %90 : vector<1x18xf32> to vector<2x18xf32>
    %92 = arith.addf %89, %91 : vector<2x18xf32>
    %93 = math.tanh %92 : vector<2x18xf32>
    %94 = vector.extract_strided_slice %5 {offsets = [0, 0], sizes = [1, 18], strides = [1, 1]} : vector<8x18xf32> to vector<1x18xf32>
    %95 = vector.broadcast %94 : vector<1x18xf32> to vector<2x18xf32>
    %96 = arith.mulf %44, %95 : vector<2x18xf32>
    %97 = vector.broadcast %7 : vector<1x18xf32> to vector<2x18xf32>
    %98 = arith.addf %96, %97 : vector<2x18xf32>
    %99 = vector.extract_strided_slice %5 {offsets = [1, 0], sizes = [1, 18], strides = [1, 1]} : vector<8x18xf32> to vector<1x18xf32>
    %100 = vector.broadcast %99 : vector<1x18xf32> to vector<2x18xf32>
    %101 = arith.mulf %51, %100 : vector<2x18xf32>
    %102 = arith.addf %98, %101 : vector<2x18xf32>
    %103 = vector.extract_strided_slice %5 {offsets = [2, 0], sizes = [1, 18], strides = [1, 1]} : vector<8x18xf32> to vector<1x18xf32>
    %104 = vector.broadcast %103 : vector<1x18xf32> to vector<2x18xf32>
    %105 = arith.mulf %58, %104 : vector<2x18xf32>
    %106 = arith.addf %102, %105 : vector<2x18xf32>
    %107 = vector.extract_strided_slice %5 {offsets = [3, 0], sizes = [1, 18], strides = [1, 1]} : vector<8x18xf32> to vector<1x18xf32>
    %108 = vector.broadcast %107 : vector<1x18xf32> to vector<2x18xf32>
    %109 = arith.mulf %65, %108 : vector<2x18xf32>
    %110 = arith.addf %106, %109 : vector<2x18xf32>
    %111 = vector.extract_strided_slice %5 {offsets = [4, 0], sizes = [1, 18], strides = [1, 1]} : vector<8x18xf32> to vector<1x18xf32>
    %112 = vector.broadcast %111 : vector<1x18xf32> to vector<2x18xf32>
    %113 = arith.mulf %72, %112 : vector<2x18xf32>
    %114 = arith.addf %110, %113 : vector<2x18xf32>
    %115 = vector.extract_strided_slice %5 {offsets = [5, 0], sizes = [1, 18], strides = [1, 1]} : vector<8x18xf32> to vector<1x18xf32>
    %116 = vector.broadcast %115 : vector<1x18xf32> to vector<2x18xf32>
    %117 = arith.mulf %79, %116 : vector<2x18xf32>
    %118 = arith.addf %114, %117 : vector<2x18xf32>
    %119 = vector.extract_strided_slice %5 {offsets = [6, 0], sizes = [1, 18], strides = [1, 1]} : vector<8x18xf32> to vector<1x18xf32>
    %120 = vector.broadcast %119 : vector<1x18xf32> to vector<2x18xf32>
    %121 = arith.mulf %86, %120 : vector<2x18xf32>
    %122 = arith.addf %118, %121 : vector<2x18xf32>
    %123 = vector.extract_strided_slice %5 {offsets = [7, 0], sizes = [1, 18], strides = [1, 1]} : vector<8x18xf32> to vector<1x18xf32>
    %124 = vector.broadcast %123 : vector<1x18xf32> to vector<2x18xf32>
    %125 = arith.mulf %93, %124 : vector<2x18xf32>
    %126 = arith.addf %122, %125 : vector<2x18xf32>
    %c0_40 = arith.constant 0 : index
    %c0_41 = arith.constant 0 : index
    %127 = vector.load %arg17[%c0_40, %c0_41] : memref<2x18xf32, #tpu.memory_space<vmem>>, vector<2x18xf32>
    tpu.vector_store %arg17[%c0_40, %c0_41], %126 {strides = array<i32>} : memref<2x18xf32, #tpu.memory_space<vmem>>, vector<2x18xf32>,
    return
  }
  func.func @transform_0(%arg0: i32) -> (i32, i32) {
    %c0_i32 = arith.constant 0 : i32
    %c0_i32_0 = arith.constant 0 : i32
    %c0_i32_1 = arith.constant 0 : i32
    return %c0_i32, %c0_i32_0 : i32, i32
  }
  func.func @transform_1(%arg0: i32) -> (i32, i32) {
    %c0_i32 = arith.constant 0 : i32
    %c0_i32_0 = arith.constant 0 : i32
    %c0_i32_1 = arith.constant 0 : i32
    return %c0_i32, %c0_i32_0 : i32, i32
  }
  func.func @transform_2(%arg0: i32) -> (i32, i32) {
    %c0_i32 = arith.constant 0 : i32
    %c0_i32_0 = arith.constant 0 : i32
    %c0_i32_1 = arith.constant 0 : i32
    return %c0_i32, %c0_i32_0 : i32, i32
  }
  func.func @transform_3(%arg0: i32) -> (i32, i32) {
    %c0_i32 = arith.constant 0 : i32
    %c0_i32_0 = arith.constant 0 : i32
    %c0_i32_1 = arith.constant 0 : i32
    return %c0_i32, %c0_i32_0 : i32, i32
  }
  func.func @transform_4(%arg0: i32) -> (i32, i32) {
    %c0_i32 = arith.constant 0 : i32
    %c0_i32_0 = arith.constant 0 : i32
    %c0_i32_1 = arith.constant 0 : i32
    return %c0_i32, %c0_i32_0 : i32, i32
  }
  func.func @transform_5(%arg0: i32) -> (i32, i32) {
    %c0_i32 = arith.constant 0 : i32
    %c0_i32_0 = arith.constant 0 : i32
    %c0_i32_1 = arith.constant 0 : i32
    return %c0_i32, %c0_i32_0 : i32, i32
  }
  func.func @transform_6(%arg0: i32) -> (i32, i32) {
    %c0_i32 = arith.constant 0 : i32
    %c0_i32_0 = arith.constant 0 : i32
    %c0_i32_1 = arith.constant 0 : i32
    return %c0_i32, %c0_i32_0 : i32, i32
  }
  func.func @transform_7(%arg0: i32) -> (i32, i32) {
    %c0_i32 = arith.constant 0 : i32
    %c0_i32_0 = arith.constant 0 : i32
    %c0_i32_1 = arith.constant 0 : i32
    return %c0_i32, %c0_i32_0 : i32, i32
  }
  func.func @transform_8(%arg0: i32) -> (i32, i32) {
    %c0_i32 = arith.constant 0 : i32
    %c0_i32_0 = arith.constant 0 : i32
    %c0_i32_1 = arith.constant 0 : i32
    return %c0_i32, %c0_i32_0 : i32, i32
  }
  func.func @transform_9(%arg0: i32) -> (i32, i32) {
    %c0_i32 = arith.constant 0 : i32
    %c0_i32_0 = arith.constant 0 : i32
    %c0_i32_1 = arith.constant 0 : i32
    return %c0_i32, %c0_i32_0 : i32, i32
  }
  func.func @transform_10(%arg0: i32) -> (i32, i32) {
    %c0_i32 = arith.constant 0 : i32
    %c0_i32_0 = arith.constant 0 : i32
    %c0_i32_1 = arith.constant 0 : i32
    return %c0_i32, %c0_i32_0 : i32, i32
  }
  func.func @transform_11(%arg0: i32) -> (i32, i32) {
    %c0_i32 = arith.constant 0 : i32
    %c0_i32_0 = arith.constant 0 : i32
    %c0_i32_1 = arith.constant 0 : i32
    return %c0_i32, %c0_i32_0 : i32, i32
  }
  func.func @transform_12(%arg0: i32) -> (i32, i32) {
    %c0_i32 = arith.constant 0 : i32
    %c0_i32_0 = arith.constant 0 : i32
    %c0_i32_1 = arith.constant 0 : i32
    return %c0_i32, %c0_i32_0 : i32, i32
  }
  func.func @transform_13(%arg0: i32) -> (i32, i32) {
    %c0_i32 = arith.constant 0 : i32
    %c0_i32_0 = arith.constant 0 : i32
    %c0_i32_1 = arith.constant 0 : i32
    return %c0_i32, %c0_i32_0 : i32, i32
  }
  func.func @transform_14(%arg0: i32) -> (i32, i32) {
    %c0_i32 = arith.constant 0 : i32
    %c0_i32_0 = arith.constant 0 : i32
    %c0_i32_1 = arith.constant 0 : i32
    return %c0_i32, %c0_i32_0 : i32, i32
  }
  func.func @transform_15(%arg0: i32) -> (i32, i32) {
    %c0_i32 = arith.constant 0 : i32
    %c0_i32_0 = arith.constant 0 : i32
    %c0_i32_1 = arith.constant 0 : i32
    return %c0_i32, %c0_i32_0 : i32, i32
  }
  func.func @transform_16(%arg0: i32) -> (i32, i32) {
    %c0_i32 = arith.constant 0 : i32
    %c0_i32_0 = arith.constant 0 : i32
    %c0_i32_1 = arith.constant 0 : i32
    return %c0_i32, %c0_i32_0 : i32, i32
  }
}

module attributes {stable_mosaic.version = 11 : i64} {
  func.func @kernel(%arg0: i32, %arg1: memref<1x2x6xf32, #tpu.memory_space<vmem>>, %arg2: memref<1x6x3xf32, #tpu.memory_space<vmem>>, %arg3: memref<1x2x3xf32, #tpu.memory_space<vmem>>, %arg4: memref<3x3xf32, #tpu.memory_space<vmem>>, %arg5: memref<3x3xf32, #tpu.memory_space<vmem>>, %arg6: memref<1x3xf32, #tpu.memory_space<vmem>>, %arg7: memref<2x1x2x6xf32, #tpu.memory_space<vmem>>) attributes {dimension_semantics = [#tpu.dimension_semantics<parallel>], iteration_bounds = array<i64: 2>, scalar_prefetch = 0 : i64, scratch_operands = 0 : i64, tpu.core_type = #tpu.core_type<tc>, window_params = [{transform_indices = @transform_0, window_bounds = array<i64: 1, 2, 6>}, {transform_indices = @transform_1, window_bounds = array<i64: 1, 6, 3>}, {transform_indices = @transform_2, window_bounds = array<i64: 1, 2, 3>}, {pipeline_mode = #tpu.pipeline_mode<synchronous>, transform_indices = @transform_3, window_bounds = array<i64: 3, 3>}, {pipeline_mode = #tpu.pipeline_mode<synchronous>, transform_indices = @transform_4, window_bounds = array<i64: 3, 3>}, {pipeline_mode = #tpu.pipeline_mode<synchronous>, transform_indices = @transform_5, window_bounds = array<i64: 1, 3>}, {transform_indices = @transform_6, window_bounds = array<i64: 2, 1, 2, 6>}]} {
    %c0 = arith.constant 0 : index
    %c0_0 = arith.constant 0 : index
    %c0_1 = arith.constant 0 : index
    %0 = vector.load %arg1[%c0, %c0_0, %c0_1] : memref<1x2x6xf32, #tpu.memory_space<vmem>>, vector<1x2x6xf32>
    %1 = vector.shape_cast %0 : vector<1x2x6xf32> to vector<2x6xf32>
    %c0_2 = arith.constant 0 : index
    %c0_3 = arith.constant 0 : index
    %c0_4 = arith.constant 0 : index
    %2 = vector.load %arg2[%c0_2, %c0_3, %c0_4] : memref<1x6x3xf32, #tpu.memory_space<vmem>>, vector<1x6x3xf32>
    %3 = vector.shape_cast %2 : vector<1x6x3xf32> to vector<6x3xf32>
    %c0_5 = arith.constant 0 : index
    %c0_6 = arith.constant 0 : index
    %c0_7 = arith.constant 0 : index
    %4 = vector.load %arg3[%c0_5, %c0_6, %c0_7] : memref<1x2x3xf32, #tpu.memory_space<vmem>>, vector<1x2x3xf32>
    %5 = vector.shape_cast %4 : vector<1x2x3xf32> to vector<2x3xf32>
    %c0_8 = arith.constant 0 : index
    %c0_9 = arith.constant 0 : index
    %6 = vector.load %arg4[%c0_8, %c0_9] : memref<3x3xf32, #tpu.memory_space<vmem>>, vector<3x3xf32>
    %c0_10 = arith.constant 0 : index
    %c0_11 = arith.constant 0 : index
    %7 = vector.load %arg5[%c0_10, %c0_11] : memref<3x3xf32, #tpu.memory_space<vmem>>, vector<3x3xf32>
    %c0_12 = arith.constant 0 : index
    %c0_13 = arith.constant 0 : index
    %8 = vector.load %arg6[%c0_12, %c0_13] : memref<1x3xf32, #tpu.memory_space<vmem>>, vector<1x3xf32>
    %cst = arith.constant dense<0.000000e+00> : vector<2x3xf32>
    %9 = tpu.matmul %1, %3, %cst {dimension_numbers = #tpu.dot_dimension_numbers<[1], [0], [0], [1], [0, 0, 1, 1], [], []>} : vector<2x6xf32>, vector<6x3xf32>, vector<2x3xf32> -> vector<2x3xf32>
    %cst_14 = arith.constant dense<0.000000e+00> : vector<2x3xf32>
    %10 = tpu.matmul %5, %6, %cst_14 {dimension_numbers = #tpu.dot_dimension_numbers<[1], [0], [0], [1], [0, 0, 1, 1], [], []>} : vector<2x3xf32>, vector<3x3xf32>, vector<2x3xf32> -> vector<2x3xf32>
    %cst_15 = arith.constant dense<0.000000e+00> : vector<2x3xf32>
    %11 = tpu.matmul %9, %7, %cst_15 {dimension_numbers = #tpu.dot_dimension_numbers<[1], [0], [0], [1], [0, 0, 1, 1], [], []>} : vector<2x3xf32>, vector<3x3xf32>, vector<2x3xf32> -> vector<2x3xf32>
    %cst_16 = arith.constant 1.000000e-01 : f32
    %12 = vector.broadcast %cst_16 : f32 to vector<2x3xf32>
    %13 = arith.mulf %10, %12 : vector<2x3xf32>
    %14 = math.cos %13 : vector<2x3xf32>
    %cst_17 = arith.constant 1.10517097 : f32
    %15 = vector.broadcast %cst_17 : f32 to vector<2x3xf32>
    %16 = arith.mulf %14, %15 : vector<2x3xf32>
    %17 = vector.broadcast %8 : vector<1x3xf32> to vector<2x3xf32>
    %18 = arith.mulf %17, %16 : vector<2x3xf32>
    %cst_18 = arith.constant 1.000000e+00 : f32
    %19 = vector.broadcast %cst_18 : f32 to vector<1x3xf32>
    %20 = arith.subf %19, %8 : vector<1x3xf32>
    %21 = math.exp %13 : vector<2x3xf32>
    %22 = vector.broadcast %20 : vector<1x3xf32> to vector<2x3xf32>
    %23 = arith.mulf %22, %21 : vector<2x3xf32>
    %24 = arith.addf %18, %23 : vector<2x3xf32>
    %25 = math.sin %13 : vector<2x3xf32>
    %cst_19 = arith.constant 1.10517097 : f32
    %26 = vector.broadcast %cst_19 : f32 to vector<2x3xf32>
    %27 = arith.mulf %25, %26 : vector<2x3xf32>
    %28 = vector.broadcast %8 : vector<1x3xf32> to vector<2x3xf32>
    %29 = arith.mulf %28, %27 : vector<2x3xf32>
    %30 = arith.mulf %24, %9 : vector<2x3xf32>
    %31 = arith.mulf %29, %11 : vector<2x3xf32>
    %32 = arith.addf %30, %31 : vector<2x3xf32>
    %cst_20 = arith.constant dense<0.000000e+00> : vector<2x6xf32>
    %33 = tpu.matmul %32, %3, %cst_20 {dimension_numbers = #tpu.dot_dimension_numbers<[1], [1], [0], [0], [0, 0, 1, 0], [], []>} : vector<2x3xf32>, vector<6x3xf32>, vector<2x6xf32> -> vector<2x6xf32>
    %c0_21 = arith.constant 0 : index
    %c0_22 = arith.constant 0 : index
    %c0_23 = arith.constant 0 : index
    %c0_24 = arith.constant 0 : index
    %34 = vector.load %arg7[%c0_21, %c0_22, %c0_23, %c0_24] : memref<2x1x2x6xf32, #tpu.memory_space<vmem>>, vector<1x1x2x6xf32>
    %35 = vector.shape_cast %34 : vector<1x1x2x6xf32> to vector<2x6xf32>
    %36 = vector.shape_cast %33 : vector<2x6xf32> to vector<1x1x2x6xf32>
    tpu.vector_store %arg7[%c0_21, %c0_22, %c0_23, %c0_24], %36 {strides = array<i32>} : memref<2x1x2x6xf32, #tpu.memory_space<vmem>>, vector<1x1x2x6xf32>,
    %cst_25 = arith.constant 2.000000e-01 : f32
    %37 = vector.broadcast %cst_25 : f32 to vector<2x3xf32>
    %38 = arith.mulf %10, %37 : vector<2x3xf32>
    %39 = math.cos %38 : vector<2x3xf32>
    %cst_26 = arith.constant 1.22140276 : f32
    %40 = vector.broadcast %cst_26 : f32 to vector<2x3xf32>
    %41 = arith.mulf %39, %40 : vector<2x3xf32>
    %42 = vector.broadcast %8 : vector<1x3xf32> to vector<2x3xf32>
    %43 = arith.mulf %42, %41 : vector<2x3xf32>
    %cst_27 = arith.constant 1.000000e+00 : f32
    %44 = vector.broadcast %cst_27 : f32 to vector<1x3xf32>
    %45 = arith.subf %44, %8 : vector<1x3xf32>
    %46 = math.exp %38 : vector<2x3xf32>
    %47 = vector.broadcast %45 : vector<1x3xf32> to vector<2x3xf32>
    %48 = arith.mulf %47, %46 : vector<2x3xf32>
    %49 = arith.addf %43, %48 : vector<2x3xf32>
    %50 = math.sin %38 : vector<2x3xf32>
    %cst_28 = arith.constant 1.22140276 : f32
    %51 = vector.broadcast %cst_28 : f32 to vector<2x3xf32>
    %52 = arith.mulf %50, %51 : vector<2x3xf32>
    %53 = vector.broadcast %8 : vector<1x3xf32> to vector<2x3xf32>
    %54 = arith.mulf %53, %52 : vector<2x3xf32>
    %55 = arith.mulf %49, %9 : vector<2x3xf32>
    %56 = arith.mulf %54, %11 : vector<2x3xf32>
    %57 = arith.addf %55, %56 : vector<2x3xf32>
    %cst_29 = arith.constant dense<0.000000e+00> : vector<2x6xf32>
    %58 = tpu.matmul %57, %3, %cst_29 {dimension_numbers = #tpu.dot_dimension_numbers<[1], [1], [0], [0], [0, 0, 1, 0], [], []>} : vector<2x3xf32>, vector<6x3xf32>, vector<2x6xf32> -> vector<2x6xf32>
    %c1 = arith.constant 1 : index
    %c0_30 = arith.constant 0 : index
    %c0_31 = arith.constant 0 : index
    %c0_32 = arith.constant 0 : index
    %59 = vector.load %arg7[%c1, %c0_30, %c0_31, %c0_32] : memref<2x1x2x6xf32, #tpu.memory_space<vmem>>, vector<1x1x2x6xf32>
    %60 = vector.shape_cast %59 : vector<1x1x2x6xf32> to vector<2x6xf32>
    %61 = vector.shape_cast %58 : vector<2x6xf32> to vector<1x1x2x6xf32>
    tpu.vector_store %arg7[%c1, %c0_30, %c0_31, %c0_32], %61 {strides = array<i32>} : memref<2x1x2x6xf32, #tpu.memory_space<vmem>>, vector<1x1x2x6xf32>,
    return
  }
  func.func @transform_0(%arg0: i32) -> (i32, i32, i32) {
    %c0_i32 = arith.constant 0 : i32
    %c0_i32_0 = arith.constant 0 : i32
    %c0_i32_1 = arith.constant 0 : i32
    return %arg0, %c0_i32, %c0_i32_0 : i32, i32, i32
  }
  func.func @transform_1(%arg0: i32) -> (i32, i32, i32) {
    %c0_i32 = arith.constant 0 : i32
    %c0_i32_0 = arith.constant 0 : i32
    %c0_i32_1 = arith.constant 0 : i32
    return %arg0, %c0_i32, %c0_i32_0 : i32, i32, i32
  }
  func.func @transform_2(%arg0: i32) -> (i32, i32, i32) {
    %c0_i32 = arith.constant 0 : i32
    %c0_i32_0 = arith.constant 0 : i32
    %c0_i32_1 = arith.constant 0 : i32
    return %arg0, %c0_i32, %c0_i32_0 : i32, i32, i32
  }
  func.func @transform_3(%arg0: i32) -> (i32, i32) {
    %c0_i32 = arith.constant 0 : i32
    %c0_i32_0 = arith.constant 0 : i32
    %c0_i32_1 = arith.constant 0 : i32
    return %c0_i32, %c0_i32_0 : i32, i32
  }
  func.func @transform_4(%arg0: i32) -> (i32, i32) {
    %c0_i32 = arith.constant 0 : i32
    %c0_i32_0 = arith.constant 0 : i32
    %c0_i32_1 = arith.constant 0 : i32
    return %c0_i32, %c0_i32_0 : i32, i32
  }
  func.func @transform_5(%arg0: i32) -> (i32, i32) {
    %c0_i32 = arith.constant 0 : i32
    %c0_i32_0 = arith.constant 0 : i32
    %c0_i32_1 = arith.constant 0 : i32
    return %c0_i32, %c0_i32_0 : i32, i32
  }
  func.func @transform_6(%arg0: i32) -> (i32, i32, i32, i32) {
    %c0_i32 = arith.constant 0 : i32
    %c0_i32_0 = arith.constant 0 : i32
    %c0_i32_1 = arith.constant 0 : i32
    %c0_i32_2 = arith.constant 0 : i32
    return %c0_i32, %arg0, %c0_i32_0, %c0_i32_1 : i32, i32, i32, i32
  }
}

</mosaic_0001>

<bundles_post_ra>
// kernel: _lambda_.5
= control target key start
LH: loop header
LB: loop body
LE: loop exit
PB: predicated region body
PF: predicated region fallthrough
CT: control target
= control target key end

     0   :  { %s1324_s21 = smov 0   ;;  %s1326_s22 = smov 0   ;;  %s1595_s0 = inlined_call_operand.vmem [shape: f32[2,2,6], index: 0, kind: input, shape index: {}]   ;;  %s1596_s1 = inlined_call_operand.vmem [shape: f32[2,6,3], index: 1, kind: input, shape index: {}]   ;;  %s1597_s2 = inlined_call_operand.vmem [shape: f32[2,2,3], index: 2, kind: input, shape index: {}]   ;;  %s1598_s3 = inlined_call_operand.vmem [shape: f32[3,3], index: 3, kind: input, shape index: {}]   ;;  %s1599_s4 = inlined_call_operand.vmem [shape: f32[3,3], index: 4, kind: input, shape index: {}]   ;;  %s1600_s5 = inlined_call_operand.vmem [shape: f32[1,3], index: 5, kind: input, shape index: {}]   ;;  %s1601_s6 = inlined_call_operand.vmem [shape: f32[2,2,2,6], index: 6, kind: output, shape index: {}]  }
   0x1   :  { %s1328_s23 = smov 0  }
   0x2 LB: > { %s1337_s24 = sadd.s32 4294967295, %s1280_s23   ;;  %s1339_s25 = sadd.s32 1, %s1280_s23   ;;  %s1280_s23 = sphi %s1328_s23, %s1609_s23   ;;  %s1276_s22 = sphi %s1326_s22, %s1608_s22   ;;  %s1272_s21 = sphi %s1324_s21, %s1607_s21  }
   0x3   : > { %s161_s26 = ssub.s32 %s1280_s23, %s1339_s25  ;;  %s164_s27 = sadd.s32 1, %s1276_s22 }
   0x4   : > { %p162_p0 = scmp.eq.s32.totalorder %s161_s26, 0  ;;  %p174_p1 = scmp.ne.s32.totalorder %s1276_s22, %s1272_s21 }
   0x5   : > { %p175_p2 = scmp.eq.s32.totalorder %s1337_s24, 1  ;;  %p1190_p3 = scmp.ge.s32.totalorder %s1280_s23, 1 }
   0x6   : > { %s1347_s28 = scalar_select %p162_p0, %s1276_s22, %s164_s27  }
   0x7   : > { %p1349_p4 = por %p175_p2, %p174_p1  ;;  %p229_p5 = scmp.lt.s32.totalorder %s1280_s23, 3 }
   0x9   : > { %p230_p6 = pnand %p1190_p3, %p229_p5 }
   0xa   : > { %p265_p7 = scmp.lt.s32.totalorder (!%p230_p6), %s1337_s24, 1 }
   0xb   : > { %233 = sbr.rel (%p230_p6) target bundleno = 426 (0x1aa), region = 44 }
  0x10   : > { %v280_v0 = vld [vmem:[%s1598_s3] sm:$0x7]  ;;  %vm315_vm0 = vcmask 1042432   ;;  %s266_s8 = scalar_select %p265_p7, %s1337_s24, 1  ;;  %vm287_vm1 = vcmask 1045504   ;;  %vm311_vm2 = vcmask 23552  }
  0x11   : > { %1197 = vmatpush.msk.msra.mxu1 %vm315_vm0, %v280_v0  ;;  %vm283_vm3 = vcmask 48128   ;;  %v281_v4 = vld [vmem:[%s1599_s4] sm:$0x7]  ;;  %v1282_v27 = vmov 683565275   ;;  %s1219_s11 = sshll.u32 (%p1349_p4), %s1337_s24, 1 }
  0x12   : > { %s1193_s9 = sshll.u32 %s266_s8, 3  ;;  %s1192_s10 = sshll.u32 %s266_s8, 1  ;;  %1199 = vmatpush.msk.msra.mxu2 %vm315_vm0, %v281_v4  ;;  %v1283_v29 = vmov 2475754826   ;;  %v1284_v31 = vmov 2131351028  }
  0x13   : > { %s272_s13 = scalar_lea.vmem %s1596_s1, %s1193_s9  ;;  %s276_s16 = scalar_lea.vmem %s1597_s2, %s1192_s10  ;;  %v1285_v33 = vmov 2102212464   ;;  %v1286_v35 = vmov 920167782   ;;  %v1287_v43 = vmov 1326507024  }
  0x14   : > { %v278_v1 = vld [vmem:[%s272_s13] sm:$0x3f]  ;;  %s268_s19 = scalar_lea.vmem %s1595_s0, %s1192_s10  ;;  %s262_s8 = sand.u32 1, %s1272_s21  }
  0x15   : > { %v279_v2 = vld [vmem:[%s276_s16] sm:$0x3]  ;;  %1195 = vmatpush.msk.msra.mxu0 %vm287_vm1, %v278_v1  ;;  %1207 = vmatpush.xpose.msk.msra.mxu3 %vm311_vm2, %v278_v1  ;;  %s1191_s9 = sshll.u32 %s262_s8, 2  ;;  %s1074_s14 = scalar_lea.vmem (%p1349_p4), %s1601_s6, %s1219_s11 }
  0x16   : > { %1198 = vmatmul.msk.f32.vlgmr.msra.gmra.mxu1 %vm311_vm2, %v279_v2  ;;  %v277_v3 = vld [vmem:[%s268_s19] sm:$0x3]  ;;  %s264_s10 = scalar_lea.vmem [#allocation2], %s1191_s9 }
  0x17   : > { %1196 = vmatmul.msk.f32.vlgmr.msra.gmra.mxu0 %vm283_vm3, %v277_v3 }
  0x18   : > { %1215 = vmatpush.xpose.msk.msrb.mxu0 %vm311_vm2, %v278_v1 }
  0x93   : > { %v336_v5 = vpop.f32.mrf.mxu1 }
  0x94   : > { %v1375_v6 = vmul.f32 0.1, %v336_v5  ;;  %v1377_v7 = vmul.f32 0.2, %v336_v5  ;;  %v1379_v8 = vpop.f32.mrf.mxu0 }
  0x95   : > { %1200 = vmatmul.msk.f32.vlgmr.msra.gmra.mxu2 %vm311_vm2, %v1379_v8 }
  0x96   : > { %v369_v9 = vand.u32 2139095040, %v1375_v6  ;;  %v724_v10 = vand.u32 2139095040, %v1377_v7  ;;  %v366_v12 = vand.u32 2147483647, %v1375_v6  ;;  %v721_v17 = vand.u32 2147483647, %v1377_v7 }
  0x98   : > { %v370_v11 = vshrl.u32 %v369_v9, 23  ;;  %v725_v13 = vshrl.u32 %v724_v10, 23  ;;  %v373_v18 = vand.u32 8388607, %v366_v12  ;;  %v728_v22 = vand.u32 8388607, %v721_v17 }
  0x9a   : > { %v1201_v14 = vadd.s32 4294967169, %v370_v11  ;;  %v1209_v15 = vadd.s32 4294967169, %v725_v13  ;;  %v374_v24 = vor.u32 8388608, %v373_v18  ;;  %v729_v41 = vor.u32 8388608, %v728_v22 }
  0x9c   : > { %v376_v16 = vadd.s32 1, %v1201_v14  ;;  %v731_v19 = vadd.s32 1, %v1209_v15  ;;  %v1395_v45 = vshll.u32 %v374_v24, 8  ;;  %v1417_v56 = vshll.u32 %v729_v41, 8 }
  0x9d   : > { %v1288_v41 = vmov 0  }
  0x9e   : > { %vm377_vm4 = vcmp.gt.s32.totalorder %v376_v16, 0  ;;  %vm732_vm5 = vcmp.gt.s32.totalorder %v731_v19, 0  ;;  %v415_v59 = vand.u32 65535, %v1395_v45  ;;  %v416_v2 = vshrl.u32 %v1395_v45, 16 }
  0x9f   : > { %v378_v20 = vsel %vm377_vm4, %v376_v16, 0  ;;  %v733_v23 = vsel %vm732_vm5, %v731_v19, 0  ;;  %v1438_v14 = vand.u32 65535, %v1417_v56 }
  0xa0   : > { %v380_v21 = vand.u32 31, %v378_v20  ;;  %v1391_v25 = vshrl.u32 %v378_v20, 5  ;;  %v735_v37 = vand.u32 31, %v733_v23  ;;  %v1432_v5 = vshrl.u32 %v733_v23, 5 }
  0xa2   : > { %v381_v26 = vsub.s32 32, %v380_v21  ;;  %v383_v28 = vshll.u32 %v1282_v27, %v380_v21  ;;  %v386_v30 = vshll.u32 %v1283_v29, %v380_v21  ;;  %v389_v32 = vshll.u32 %v1284_v31, %v380_v21 }
  0xa3   : > { %v392_v34 = vshll.u32 %v1285_v33, %v380_v21  ;;  %v395_v36 = vshll.u32 %v1286_v35, %v380_v21  ;;  %vm398_vm6 = vcmp.lt.s32.totalorder %v1391_v25, 1  ;;  %vm401_vm7 = vcmp.lt.s32.totalorder %v1391_v25, 4 }
  0xa4   : > { %v384_v38 = vshrl.u32 %v1283_v29, %v381_v26  ;;  %v387_v39 = vshrl.u32 %v1284_v31, %v381_v26  ;;  %v390_v40 = vshrl.u32 %v1285_v33, %v381_v26  ;;  %v393_v42 = vshrl.u32 %v1286_v35, %v381_v26 }
  0xa5   : > { %v396_v44 = vshrl.u32 %v1287_v43, %v381_v26  ;;  %vm400_vm8 = vcmp.lt.s32.totalorder %v1391_v25, 3  ;;  %v1403_v51 = vsub.s32 32, %v735_v37  ;;  %vm399_vm9 = vcmp.lt.s32.totalorder %v1391_v25, 2 }
  0xa6   : > { %v1397_v46 = vor.u32 %v384_v38, %v383_v28  ;;  %v1399_v47 = vor.u32 %v387_v39, %v386_v30  ;;  %v391_v48 = vor.u32 %v390_v40, %v389_v32  ;;  %v394_v49 = vor.u32 %v393_v42, %v392_v34 }
  0xa7   : > { %v397_v50 = vor.u32 %v396_v44, %v395_v36  ;;  %v738_v60 = vshll.u32 %v1282_v27, %v735_v37  ;;  %v739_v62 = vshrl.u32 %v1283_v29, %v1403_v51  ;;  %v741_v63 = vshll.u32 %v1283_v29, %v735_v37 }
  0xa8   : > { %v410_v52 = vsel %vm398_vm6, %v1399_v47, %v391_v48  ;;  %v406_v53 = vsel %vm398_vm6, %v1397_v46, %v1399_v47  ;;  %v407_v54 = vsel %vm401_vm7, %v394_v49, 920167782  ;;  %v742_v0 = vshrl.u32 %v1284_v31, %v1403_v51 }
  0xa9   : > { %v411_v55 = vsel %vm401_vm7, %v397_v50, 1326507024  ;;  %v408_v57 = vsel %vm400_vm8, %v391_v48, %v407_v54  ;;  %v744_v9 = vshll.u32 %v1284_v31, %v735_v37  ;;  %v745_v10 = vshrl.u32 %v1285_v33, %v1403_v51 }
  0xaa   : > { %v412_v58 = vsel %vm400_vm8, %v394_v49, %v411_v55  ;;  %v409_v1 = vsel %vm399_vm9, %v406_v53, %v408_v57  ;;  %v382_v15 = vshrl.u32 %v1282_v27, %v381_v26  ;;  %v1441_v18 = vor.u32 %v739_v62, %v738_v60 }
  0xab   : > { %v413_v61 = vsel %vm399_vm9, %v410_v52, %v412_v58  ;;  %v440_v16 = vshrl.u32 %v409_v1, 16  ;;  %v1443_v19 = vor.u32 %v742_v0, %v741_v63  ;;  %v1448_v22 = vor.u32 %v745_v10, %v744_v9 }
  0xac   : > { %v417_v3 = vand.u32 65535, %v413_v61  ;;  %v418_v4 = vshrl.u32 %v413_v61, 16  ;;  %v747_v23 = vshll.u32 %v1285_v33, %v735_v37  ;;  %v748_v24 = vshrl.u32 %v1286_v35, %v1403_v51 }
  0xad   : > { %v750_v28 = vshll.u32 %v1286_v35, %v735_v37  ;;  %v751_v29 = vshrl.u32 %v1287_v43, %v1403_v51  ;;  %vm753_vm10 = vcmp.lt.s32.totalorder %v1432_v5, 1  ;;  %v403_v26 = vsel %vm401_vm7, %v391_v48, 2102212464 }
  0xae   : > { %v419_v11 = vmul.u32 %v417_v3, %v415_v59  ;;  %v1435_v13 = vmul.u32 %v418_v4, %v415_v59  ;;  %v1445_v20 = vmul.u32 %v417_v3, %v416_v2  ;;  %v422_v30 = vmul.u32 %v418_v4, %v416_v2 }
  0xaf   : > { %v439_v31 = vand.u32 65535, %v409_v1  ;;  %v749_v32 = vor.u32 %v748_v24, %v747_v23  ;;  %v752_v34 = vor.u32 %v751_v29, %v750_v28  ;;  %vm755_vm12 = vcmp.lt.s32.totalorder %v1432_v5, 3 }
  0xb0   : > { %v423_v21 = vshll.u32 %v1435_v13, 16  ;;  %vm756_vm13 = vcmp.lt.s32.totalorder %v1432_v5, 4  ;;  %v425_v33 = vshll.u32 %v1445_v20, 16  ;;  %v442_v36 = vmul.u32 %v440_v16, %v415_v59 }
  0xb1   : > { %vm754_vm14 = vcmp.lt.s32.totalorder %v1432_v5, 2  ;;  %v761_v35 = vsel %vm753_vm10, %v1441_v18, %v1443_v19  ;;  %v762_v38 = vsel %vm756_vm13, %v749_v32, 920167782  ;;  %v765_v39 = vsel %vm753_vm10, %v1443_v19, %v1448_v22 }
  0xb2   : > { %vm427_vm11 = vc.u32 %v419_v11, %v423_v21  ;;  %v429_v37 = vadd.s32 %v423_v21, %v419_v11  ;;  %v766_v40 = vsel %vm756_vm13, %v752_v34, 1326507024  ;;  %v763_v43 = vsel %vm755_vm12, %v1448_v22, %v762_v38 }
  0xb3   : > { %v428_v42 = vsel %vm427_vm11, 1, %v1288_v41  ;;  %v767_v44 = vsel %vm755_vm12, %v749_v32, %v766_v40  ;;  %v771_v48 = vshrl.u32 %v1417_v56, 16  ;;  %v402_v49 = vsel %vm398_vm6, %v382_v15, %v1397_v46 }
  0xb4   : > { %v443_v50 = vmul.u32 %v439_v31, %v416_v2  ;;  %v764_v52 = vsel %vm754_vm14, %v761_v35, %v763_v43  ;;  %v768_v53 = vsel %vm754_vm14, %v765_v39, %v767_v44  ;;  %v404_v54 = vsel %vm400_vm8, %v1399_v47, %v403_v26 }
  0xb5   : > { %v441_v55 = vmul.u32 %v439_v31, %v415_v59  ;;  %v772_v57 = vand.u32 65535, %v768_v53  ;;  %v773_v58 = vshrl.u32 %v768_v53, 16  ;;  %v430_v60 = vadd.s32 %v428_v42, %v422_v30 }
  0xb6   : > { %v795_v61 = vshrl.u32 %v764_v52, 16  ;;  %vm431_vm15 = vc.u32 %v429_v37, %v425_v33  ;;  %v445_v62 = vshll.u32 %v442_v36, 16  ;;  %v444_v63 = vmul.u32 %v440_v16, %v416_v2 }
  0xb7   : > { %v774_v46 = vmul.u32 %v772_v57, %v1438_v14  ;;  %v775_v0 = vmul.u32 %v773_v58, %v1438_v14  ;;  %v776_v1 = vmul.u32 %v772_v57, %v771_v48  ;;  %v794_v3 = vand.u32 65535, %v764_v52 }
  0xb8   : > { %v424_v4 = vshrl.u32 %v1435_v13, 16  ;;  %v426_v9 = vshrl.u32 %v1445_v20, 16  ;;  %v447_v10 = vshll.u32 %v443_v50, 16  ;;  %v777_v47 = vmul.u32 %v773_v58, %v771_v48 }
  0xb9   : > { %v778_v59 = vshll.u32 %v775_v0, 16  ;;  %v432_v11 = vsel %vm431_vm15, 1, %v1288_v41  ;;  %v446_v15 = vshrl.u32 %v442_v36, 16  ;;  %v797_v21 = vmul.u32 %v795_v61, %v1438_v14 }
  0xba   : > { %v434_v23 = vadd.s32 %v432_v11, %v430_v60  ;;  %vm449_vm0 = vc.u32 %v441_v55, %v445_v62  ;;  %v451_v2 = vadd.s32 %v445_v62, %v441_v55  ;;  %v780_v16 = vshll.u32 %v776_v1, 16 }
  0xbb   : > { %vm782_vm1 = vc.u32 %v774_v46, %v778_v59  ;;  %v784_v24 = vadd.s32 %v778_v59, %v774_v46  ;;  %v450_v28 = vsel %vm449_vm0, 1, %v1288_v41  ;;  %v405_v26 = vsel %vm399_vm9, %v402_v49, %v404_v54 }
  0xbc   : > { %v783_v13 = vsel %vm782_vm1, 1, %v1288_v41  ;;  %v435_v29 = vadd.s32 %v434_v23, %v424_v4  ;;  %v452_v20 = vadd.s32 %v450_v28, %v444_v63  ;;  %vm453_vm3 = vc.u32 %v451_v2, %v447_v10 }
  0xbd   : > { %v785_v30 = vadd.s32 %v783_v13, %v777_v47  ;;  %v798_v31 = vmul.u32 %v794_v3, %v771_v48  ;;  %v454_v32 = vsel %vm453_vm3, 1, %v1288_v41  ;;  %v796_v34 = vmul.u32 %v794_v3, %v1438_v14 }
  0xbe   : > { %v448_v33 = vshrl.u32 %v443_v50, 16  ;;  %v455_v36 = vadd.s32 %v451_v2, %v447_v10  ;;  %v456_v35 = vadd.s32 %v454_v32, %v452_v20  ;;  %v436_v37 = vadd.s32 %v435_v29, %v426_v9 }
  0xbf   : > { %v779_v38 = vshrl.u32 %v775_v0, 16  ;;  %vm786_vm4 = vc.u32 %v784_v24, %v780_v16  ;;  %v800_v39 = vshll.u32 %v797_v21, 16  ;;  %v799_v40 = vmul.u32 %v795_v61, %v771_v48 }
  0xc0   : > { %v457_v42 = vadd.s32 %v456_v35, %v446_v15  ;;  %v787_v43 = vsel %vm786_vm4, 1, %v1288_v41  ;;  %v459_v25 = vmul.u32 %v1395_v45, %v405_v26  ;;  %v737_v44 = vshrl.u32 %v1282_v27, %v1403_v51 }
  0xc1   : > { %v789_v49 = vadd.s32 %v787_v43, %v785_v30  ;;  %v802_v52 = vshll.u32 %v798_v31, 16  ;;  %v758_v14 = vsel %vm756_vm13, %v1448_v22, 2102212464  ;;  %vm804_vm5 = vc.u32 %v796_v34, %v800_v39 }
  0xc2   : > { %v458_v50 = vadd.s32 %v457_v42, %v448_v33  ;;  %v806_v53 = vadd.s32 %v800_v39, %v796_v34  ;;  %vm461_vm6 = vc.u32 %v436_v37, %v455_v36  ;;  %v781_v54 = vshrl.u32 %v776_v1, 16 }
  0xc3   : > { %v790_v48 = vadd.s32 %v789_v49, %v779_v38  ;;  %v805_v55 = vsel %vm804_vm5, 1, %v1288_v41  ;;  %v801_v58 = vshrl.u32 %v797_v21, 16  ;;  %v757_v27 = vsel %vm753_vm10, %v737_v44, %v1441_v18 }
  0xc4   : > { %v462_v57 = vadd.s32 1, %v458_v50  ;;  %v807_v45 = vadd.s32 %v805_v55, %v799_v40  ;;  %vm808_vm7 = vc.u32 %v806_v53, %v802_v52  ;;  %v759_v51 = vsel %vm755_vm12, %v1443_v19, %v758_v14 }
  0xc5   : > { %v809_v22 = vsel %vm808_vm7, 1, %v1288_v41  ;;  %v803_v61 = vshrl.u32 %v798_v31, 16  ;;  %v791_v46 = vadd.s32 %v790_v48, %v781_v54  ;;  %v810_v0 = vadd.s32 %v806_v53, %v802_v52 }
  0xc6   : > { %v463_v60 = vsel %vm461_vm6, %v462_v57, %v458_v50  ;;  %v811_v62 = vadd.s32 %v809_v22, %v807_v45  ;;  %v760_v1 = vsel %vm754_vm14, %v757_v27, %v759_v51  ;;  %v460_v13 = vadd.s32 %v455_v36, %v436_v37 }
  0xc7   : > { %v464_v63 = vadd.s32 %v463_v60, %v459_v25  ;;  %v814_v18 = vmul.u32 %v1417_v56, %v760_v1  ;;  %vm816_vm8 = vc.u32 %v791_v46, %v810_v0  ;;  %v815_v49 = vadd.s32 %v810_v0, %v791_v46 }
  0xc8   : > { %v812_v3 = vadd.s32 %v811_v62, %v801_v58  ;;  %vm368_vm13 = vcmp.lt.s32.totalorder %v1375_v6, 0  ;;  %vm1527_vm14 = vcmp.le.f32.partialorder %v366_v12, 0.7853982  ;;  %vm723_vm15 = vcmp.lt.s32.totalorder %v1377_v7, 0 }
  0xc9   : > { %v465_v4 = vadd.s32 536870912, %v464_v63  ;;  %vm1540_vm0 = vcmp.le.f32.partialorder %v721_v17, 0.7853982  ;;  %vm509_vm4 = vweird.f32 %v1375_v6  ;;  %vm864_vm6 = vweird.f32 %v1377_v7 }
  0xca   : > { %v813_v9 = vadd.s32 %v812_v3, %v803_v61 }
  0xcb   : > { %v1518_v10 = vshrl.u32 %v465_v4, 30 }
  0xcc   : > { %v817_v19 = vadd.s32 1, %v813_v9 }
  0xcd   : > { %v467_v41 = vshll.u32 %v1518_v10, 30  ;;  %v490_v3 = vsub.s32 4, %v1518_v10 }
  0xce   : > { %v818_v47 = vsel %vm816_vm8, %v817_v19, %v813_v9 }
  0xcf   : > { %v468_v59 = vsub.s32 %v464_v63, %v467_v41  ;;  %v819_v11 = vadd.s32 %v818_v47, %v814_v18 }
  0xd1   : > { %vm469_vm9 = vcmp.lt.s32.totalorder %v468_v59, 0  ;;  %v470_v15 = vsub.s32 0, %v468_v59  ;;  %v820_v21 = vadd.s32 536870912, %v819_v11 }
  0xd3   : > { %v471_v23 = vsel %vm469_vm9, %v470_v15, %v468_v59  ;;  %v1521_v2 = vshrl.u32 %v820_v21, 30  ;;  %v491_v15 = vsel %vm368_vm13, %v490_v3, %v1518_v10 }
  0xd4   : > { %v472_v5 = vclz %v471_v23 }
  0xd5   : > { %v822_v24 = vshll.u32 %v1521_v2, 30 }
  0xd6   : > { %v1202_v16 = vadd.s32 4294967294, %v472_v5 }
  0xd7   : > { %v823_v56 = vsub.s32 %v819_v11, %v822_v24 }
  0xd8   : > { %vm1203_vm10 = vcmp.lt.s32.totalorder %v1202_v16, 0 }
  0xd9   : > { %v475_v28 = vsel %vm1203_vm10, 0, %v1202_v16  ;;  %vm824_vm11 = vcmp.lt.s32.totalorder %v823_v56, 0  ;;  %v825_v26 = vsub.s32 0, %v823_v56 }
  0xda   : > { %v476_v29 = vsub.s32 32, %v475_v28  ;;  %v480_v20 = vsub.s32 4294967266, %v475_v28  ;;  %v477_v30 = vshll.u32 %v468_v59, %v475_v28  ;;  %v845_v59 = vsub.s32 4, %v1521_v2 }
  0xdb   : > { %v826_v34 = vsel %vm824_vm11, %v825_v26, %v823_v56  ;;  %v493_v28 = vsel %vm1527_vm14, 0, %v491_v15 }
  0xdc   : > { %v478_v31 = vshrl.u32 %v460_v13, %v476_v29  ;;  %v481_v32 = vadd.s32 127, %v480_v20  ;;  %v827_v38 = vclz %v826_v34  ;;  %v846_v16 = vsel %vm723_vm15, %v845_v59, %v1521_v2 }
  0xde   : > { %v479_v33 = vor.u32 %v478_v31, %v477_v30  ;;  %v482_v35 = vshll.u32 %v481_v32, 23  ;;  %v1210_v40 = vadd.s32 4294967294, %v827_v38  ;;  %v848_v30 = vsel %vm1540_vm0, 0, %v846_v16 }
  0xdf   : > { %v510_v31 = vand.u32 3, %v493_v28  ;;  %v1025_v2 = vadd.s32 3, %v848_v30 }
  0xe0   : > { %v483_v39 = vor.u32 4788187, %v482_v35  ;;  %v486_v43 = vcvt.s32.f32 %v479_v33  ;;  %vm1211_vm12 = vcmp.lt.s32.totalorder %v1210_v40, 0  ;;  %v677_v33 = vadd.s32 3, %v493_v28 }
  0xe1   : > { %v830_v25 = vsel %vm1211_vm12, 0, %v1210_v40  ;;  %vm512_vm1 = vcmp.eq.s32.totalorder %v510_v31, 0  ;;  %v526_v40 = vmul.f32 1.442695, %v1375_v6  ;;  %vm515_vm3 = vcmp.eq.s32.totalorder %v510_v31, 2 }
  0xe2   : > { %v484_v42 = vand.u32 2147483647, %v483_v39  ;;  %v831_v36 = vsub.s32 32, %v830_v25  ;;  %v835_v37 = vsub.s32 4294967266, %v830_v25  ;;  %v832_v14 = vshll.u32 %v823_v56, %v830_v25 }
  0xe3   : > { %vm511_vm5 = vcmp.lt.s32.totalorder %v510_v31, 2  ;;  %1254 = vpow2.f32 %v526_v40 }
  0xe4   : > { %v487_v44 = vmul.f32 %v486_v43, %v484_v42  ;;  %v833_v50 = vshrl.u32 %v815_v49, %v831_v36  ;;  %v836_v53 = vadd.s32 127, %v835_v37  ;;  %v877_v49 = vmul.f32 1.442695, %v1377_v7 }
  0xe5   : > { %v678_v36 = vand.u32 3, %v677_v33 }
  0xe6   : > { %v488_v52 = vxor.u32 2147483648, %v487_v44  ;;  %v834_v55 = vor.u32 %v833_v50, %v832_v14  ;;  %v837_v57 = vshll.u32 %v836_v53, 23  ;;  %v1026_v14 = vand.u32 3, %v1025_v2 }
  0xe7   : > { %1256 = vpow2.f32 %v877_v49  ;;  %vm680_vm9 = vcmp.eq.s32.totalorder %v678_v36, 0  ;;  %vm683_vm12 = vcmp.eq.s32.totalorder %v678_v36, 2 }
  0xe8   : > { %v489_v48 = vsel %vm368_vm13, %v488_v52, %v487_v44  ;;  %v838_v27 = vor.u32 4788187, %v837_v57  ;;  %v841_v61 = vcvt.s32.f32 %v834_v55  ;;  %v865_v44 = vand.u32 3, %v848_v30 }
  0xe9   : > { %v492_v58 = vsel %vm1527_vm14, %v1375_v6, %v489_v48  ;;  %v282_v48 = vld [vmem:[%s1600_s5] sm:$0x1]  ;;  %vm1028_vm11 = vcmp.eq.s32.totalorder %v1026_v14, 0  ;;  %vm1031_vm13 = vcmp.eq.s32.totalorder %v1026_v14, 2  ;;  %vm679_vm14 = vcmp.lt.s32.totalorder %v678_v36, 2 }
  0xea   : > { %v494_v45 = vmul.f32 %v492_v58, %v492_v58  ;;  %v839_v60 = vand.u32 2147483647, %v838_v27  ;;  %vm867_vm7 = vcmp.eq.s32.totalorder %v865_v44, 0  ;;  %vm870_vm8 = vcmp.eq.s32.totalorder %v865_v44, 2 }
  0xeb   : > { %vm866_vm10 = vcmp.lt.s32.totalorder %v865_v44, 2 }
  0xec   : > { %v495_v51 = vmul.f32 -0.001358992, %v494_v45  ;;  %v502_v22 = vmul.f32 -0.00019511016, %v494_v45  ;;  %v842_v63 = vmul.f32 %v841_v61, %v839_v60 }
  0xee   : > { %v496_v62 = vadd.f32 0.041655596, %v495_v51  ;;  %v503_v12 = vadd.f32 0.008332121, %v502_v22  ;;  %v843_v1 = vxor.u32 2147483648, %v842_v63  ;;  %v525_v22 = vsub.f32 1.0, %v282_v48 }
  0xf0   : > { %v497_v46 = vmul.f32 %v496_v62, %v494_v45  ;;  %v504_v0 = vmul.f32 %v503_v12, %v494_v45  ;;  %v844_v18 = vsel %vm723_vm15, %v843_v1, %v842_v63  ;;  %vm1027_vm15 = vcmp.lt.s32.totalorder %v1026_v14, 2  ;;  %v1255_v12 = vpop.eup %1254 }
  0xf1   : > { %v847_v41 = vsel %vm1540_vm0, %v1377_v7, %v844_v18  ;;  %v529_v9 = vperm.slane %v525_v22, 0  ;;  %vm718_vm0 = vcmask 41984  }
  0xf2   : > { %v505_v4 = vadd.f32 -0.16666654, %v504_v0  ;;  %v498_v19 = vadd.f32 -0.4999988, %v497_v46  ;;  %v849_v11 = vmul.f32 %v847_v41, %v847_v41  ;;  %v1253_v46 = vld [vmem:[%s1600_s5] ss:$0 sm:$0xff] }
  0xf3   : > { %v531_v59 = vmul.f32 %v1255_v12, %v529_v9 }
  0xf4   : > { %v506_v47 = vmul.f32 %v505_v4, %v494_v45  ;;  %v850_v23 = vmul.f32 -0.001358992, %v849_v11  ;;  %v857_v17 = vmul.f32 -0.00019511016, %v849_v11  ;;  %v499_v5 = vmul.f32 %v498_v19, %v494_v45  ;;  %v1257_v4 = vpop.eup %1256 }
  0xf6   : > { %v507_v21 = vadd.f32 1.0, %v506_v47  ;;  %v851_v24 = vadd.f32 0.041655596, %v850_v23  ;;  %v858_v56 = vadd.f32 0.008332121, %v857_v17  ;;  %v500_v26 = vadd.f32 1.0, %v499_v5 }
  0xf8   : > { %v508_v13 = vmul.f32 %v507_v21, %v492_v58  ;;  %v852_v29 = vmul.f32 %v851_v24, %v849_v11  ;;  %v859_v20 = vmul.f32 %v858_v56, %v849_v11  ;;  %v516_v39 = vxor.u32 2147483648, %v500_v26 }
  0xfa   : > { %v853_v10 = vadd.f32 -0.4999988, %v852_v29  ;;  %v860_v32 = vadd.f32 -0.16666654, %v859_v20  ;;  %v513_v34 = vxor.u32 2147483648, %v508_v13  ;;  %v517_v50 = vsel %vm515_vm3, %v516_v39, %v508_v13 }
  0xfb   : > { %v685_v61 = vsel %vm683_vm12, %v516_v39, %v508_v13 }
  0xfc   : > { %v854_v35 = vmul.f32 %v853_v10, %v849_v11  ;;  %v861_v38 = vmul.f32 %v860_v32, %v849_v11  ;;  %v514_v25 = vsel %vm512_vm1, %v500_v26, %v513_v34  ;;  %v682_v27 = vsel %vm680_vm9, %v500_v26, %v513_v34 }
  0xfd   : > { %v518_v53 = vsel %vm511_vm5, %v514_v25, %v517_v50  ;;  %v686_v1 = vsel %vm679_vm14, %v682_v27, %v685_v61  ;;  %v879_v11 = vmul.f32 %v1257_v4, %v529_v9 }
  0xfe   : > { %v855_v42 = vadd.f32 1.0, %v854_v35  ;;  %v862_v43 = vadd.f32 1.0, %v861_v38  ;;  %v519_v58 = vsel %vm509_vm4, nan, %v518_v53  ;;  %v687_v18 = vsel %vm509_vm4, nan, %v686_v1 }
  0xff   : > { %v520_v63 = vmul.f32 1.105171, %v519_v58  ;;  %v688_v15 = vmul.f32 1.105171, %v687_v18 }
 0x100   : > { %v863_v37 = vmul.f32 %v862_v43, %v847_v41  ;;  %v871_v52 = vxor.u32 2147483648, %v855_v42 }
 0x101   : > { %v524_v41 = vmul.f32 %v1253_v46, %v520_v63  ;;  %v689_v5 = vmul.f32 %v1253_v46, %v688_v15 }
 0x102   : > { %v868_v54 = vxor.u32 2147483648, %v863_v37  ;;  %v872_v57 = vsel %vm870_vm8, %v871_v52, %v863_v37  ;;  %v1033_v62 = vsel %vm1031_vm13, %v871_v52, %v863_v37 }
 0x103   : > { %v532_v23 = vadd.f32 %v531_v59, %v524_v41 }
 0x104   : > { %v869_v55 = vsel %vm867_vm7, %v855_v42, %v868_v54  ;;  %v1030_v51 = vsel %vm1028_vm11, %v855_v42, %v868_v54 }
 0x105   : > { %v873_v45 = vsel %vm866_vm10, %v869_v55, %v872_v57  ;;  %v1034_v3 = vsel %vm1027_vm15, %v1030_v51, %v1033_v62  ;;  %v690_v56 = vmul.f32 %v532_v23, %v1379_v8 }
 0x106   : > { %v874_v60 = vsel %vm864_vm6, nan, %v873_v45  ;;  %v1035_v19 = vsel %vm864_vm6, nan, %v1034_v3 }
 0x107   : > { %v875_v0 = vmul.f32 1.2214028, %v874_v60  ;;  %v1036_v21 = vmul.f32 1.2214028, %v1035_v19 }
 0x109   : > { %v876_v47 = vmul.f32 %v1253_v46, %v875_v0  ;;  %v1037_v16 = vmul.f32 %v1253_v46, %v1036_v21 }
 0x10b   : > { %v880_v17 = vadd.f32 %v879_v11, %v876_v47 }
 0x10d   : > { %v1038_v6 = vmul.f32 %v880_v17, %v1379_v8 }
 0x118   : > { %v362_v24 = vpop.f32.mrf.mxu2 }
 0x119   : > { %v691_v28 = vmul.f32 %v689_v5, %v362_v24  ;;  %v1039_v13 = vmul.f32 %v1037_v16, %v362_v24 }
 0x11b   : > { %v692_v7 = vadd.f32 %v691_v28, %v690_v56  ;;  %v1040_v29 = vadd.f32 %v1039_v13, %v1038_v6 }
 0x11d   : > { %1208 = vmatmul.msk.f32.vlgmr.msra.gmra.mxu3 %vm311_vm2, %v692_v7  ;;  %1216 = vmatmul.msk.f32.vlgmr.msrb.gmra.mxu0 %vm311_vm2, %v1040_v29 }
 0x19a   : > { %v1061_v20 = vpop.f32.mrf.mxu0 }
 0x19b   : > { %1217 = vst.msk [vmem:[%s264_s10 + $0x2] sm:$0x3] %vm718_vm0, %v1061_v20 }
 0x19d   : > { %1072 = sbr.rel (!%p1349_p4) target bundleno = 426 (0x1aa), region = 48 }
 0x1a0   : > { %v715_v26 = vpop.f32.mrf.mxu3 }
 0x1a1   : > { %719 = vst.msk [vmem:[%s264_s10] sm:$0x3] %vm718_vm0, %v715_v26 }
 0x1a2   : > { %v1093_v30 = vld [vmem:[%s264_s10 + $0x2] sm:$0x3] }
 0x1a3   : > { %1094 = vst [vmem:[%s1074_s14 + $0x4] sm:$0x3] %v1093_v30 }
 0x1a8   : > { %v1091_v8 = vld [vmem:[%s264_s10] sm:$0x3] }
 0x1a9   : > { %1092 = vst [vmem:[%s1074_s14] sm:$0x3] %v1091_v8 }
 0x1aa PF: > { %p13_p8 = scmp.ge.s32.totalorder %s1339_s25, 4   ;;  %s1607_s21 = smov %s1276_s22 }
 0x1ab   : > { %s1608_s22 = smov %s1347_s28  ;;  %s1609_s23 = smov %s1339_s25 }
 0x1ac   :  { %15 = sbr.rel (!%p13_p8) target bundleno = 2 (0x2), region = 115 }

// kernel: _lambda_.3
= control target key start
LH: loop header
LB: loop body
LE: loop exit
PB: predicated region body
PF: predicated region fallthrough
CT: control target
= control target key end

     0   :  { %s1751_s0 = inlined_call_operand.vmem [shape: f32[2,64], index: 0, kind: input, shape index: {}]   ;;  %s1752_s1 = inlined_call_operand.vmem [shape: bf16[64,192], index: 1, kind: input, shape index: {}]   ;;  %s1753_s2 = inlined_call_operand.vmem [shape: bf16[192,96], index: 2, kind: input, shape index: {}]   ;;  %s1754_s3 = inlined_call_operand.hbm [shape: f32[1,192], index: 3, kind: input, shape index: {}]   ;;  %s1755_s4 = inlined_call_operand.hbm [shape: f32[1,96], index: 4, kind: input, shape index: {}]   ;;  %s1756_s5 = inlined_call_operand.vmem [shape: f32[8,18], index: 5, kind: input, shape index: {}]   ;;  %s1757_s6 = inlined_call_operand.hbm [shape: f32[8,18], index: 6, kind: input, shape index: {}]   ;;  %s1758_s7 = inlined_call_operand.hbm [shape: f32[8,18], index: 7, kind: input, shape index: {}]   ;;  %s1759_s8 = inlined_call_operand.hbm [shape: f32[1,18], index: 8, kind: input, shape index: {}]   ;;  %s1760_s9 = inlined_call_operand.vmem [shape: f32[96,96], index: 9, kind: input, shape index: {}]   ;;  %s1761_s10 = inlined_call_operand.vmem [shape: f32[96,240], index: 10, kind: input, shape index: {}]   ;;  %s1762_s11 = inlined_call_operand.vmem [shape: f32[96,240], index: 11, kind: input, shape index: {}]   ;;  %s1763_s12 = inlined_call_operand.vmem [shape: f32[240,18], index: 12, kind: input, shape index: {}]   ;;  %s1764_s13 = inlined_call_operand.vmem [shape: f32[240,12], index: 13, kind: input, shape index: {}]   ;;  %s1765_s14 = inlined_call_operand.hbm [shape: f32[12,18], index: 14, kind: input, shape index: {}]   ;;  %s1766_s15 = inlined_call_operand.hbm [shape: f32[12,18], index: 15, kind: input, shape index: {}]   ;;  %s1767_s16 = inlined_call_operand.vmem [shape: f32[2,18], index: 16, kind: output, shape index: {}]  }
   0x1   :  { %1768 = sst [smem:[#allocation17_spill]] %s1751_s0 }
   0x2   :  { %21 = vsyncpa [#allocation3], 0 }
   0x3   :  { %22 = vsyncpa [#allocation5], 0 }
   0x4   :  { %23 = vsyncpa [#allocation8], 0  ;;  %s47_s23 = sshll.u32 %s1755_s4, 4  ;;  %s48_s23 = int_to_ptr.hbm [resolvable:$true] %s47_s23 }
   0x5   :  { %24 = vsyncpa [#allocation11], 0  ;;  %s1175_s24 = smov [#allocation4]   ;;  %s71_s28 = sshll.u32 %s1758_s7, 4  ;;  %s72_s28 = int_to_ptr.hbm [resolvable:$true] %s71_s28 }
   0x6   :  { %s49_s25 = sshll.u32 %s1175_s24, 4  ;;  %s1176_s29 = smov [#allocation7]   ;;  %s50_s25 = int_to_ptr.vmem [resolvable:$true] %s49_s25 }
   0x7   :  { %52 = dma.hbm_to_vmem [thread:$0]  %s48_s23, 16, %s50_s25, [#allocation5]  }
   0x8   :  { %s73_s30 = sshll.u32 %s1176_s29, 4  ;;  %s102_s18 = sshll.u32 %s1765_s14, 4  ;;  %s74_s30 = int_to_ptr.vmem [resolvable:$true] %s73_s30  ;;  %s103_s18 = int_to_ptr.hbm [resolvable:$true] %s102_s18 }
   0x9   :  { %76 = dma.hbm_to_vmem [thread:$0]  %s72_s28, 128, %s74_s30, [#allocation8]  }
   0xa   :  { %s1177_s4 = smov [#allocation10]   ;;  %s36_s22 = sshll.u32 %s1754_s3, 4  ;;  %s37_s22 = int_to_ptr.hbm [resolvable:$true] %s36_s22 }
   0xb   :  { %s104_s19 = sshll.u32 %s1177_s4, 4  ;;  %s1178_s24 = smov 128   ;;  %s105_s19 = int_to_ptr.vmem [resolvable:$true] %s104_s19 }
   0xc   :  { %s1179_s7 = smov 8   ;;  %s1180_s23 = smov [#allocation2]  }
   0xd   :  { %110 = dma.hbm_to_vmem [thread:$0]  %s103_s18, 256, %s105_s19, [#allocation11], %s1178_s24, %s1178_s24, %s1179_s7  }
   0xe   :  { %s38_s25 = sshll.u32 %s1180_s23, 4  ;;  %s60_s14 = sshll.u32 %s1757_s6, 4  ;;  %s39_s25 = int_to_ptr.vmem [resolvable:$true] %s38_s25  ;;  %s61_s14 = int_to_ptr.hbm [resolvable:$true] %s60_s14 }
   0xf   :  { %41 = dma.hbm_to_vmem [thread:$0]  %s37_s22, 32, %s39_s25, [#allocation3]  }
  0x10   :  { %s82_s30 = sshll.u32 %s1759_s8, 4  ;;  %s1181_s0 = smov [#allocation6]   ;;  %s83_s30 = int_to_ptr.hbm [resolvable:$true] %s82_s30 }
  0x11   :  { %s62_s17 = sshll.u32 %s1181_s0, 4  ;;  %s1182_s3 = smov [#allocation9]   ;;  %s63_s17 = int_to_ptr.vmem [resolvable:$true] %s62_s17 }
  0x12   :  { %65 = dma.hbm_to_vmem [thread:$0]  %s61_s14, 128, %s63_s17, [#allocation5]  }
  0x13   :  { %s84_s18 = sshll.u32 %s1182_s3, 4  ;;  %s115_s20 = sshll.u32 %s1766_s15, 4  ;;  %s85_s18 = int_to_ptr.vmem [resolvable:$true] %s84_s18  ;;  %s116_s20 = int_to_ptr.hbm [resolvable:$true] %s115_s20 }
  0x14   :  { %87 = dma.hbm_to_vmem [thread:$0]  %s83_s30, 16, %s85_s18, [#allocation8]  }
  0x15   :  { %s1183_s6 = smov [#allocation12]  }
  0x16   :  { %s117_s21 = sshll.u32 %s1183_s6, 4  ;;  %s118_s21 = int_to_ptr.vmem [resolvable:$true] %s117_s21 }
  0x17   :  { %123 = dma.hbm_to_vmem [thread:$0]  %s116_s20, 256, %s118_s21, [#allocation11], %s1178_s24, %s1178_s24, %s1179_s7  }
  0x18   :  { %1167 = dma.done.wait [#allocation3], 32  }
  0x19   :  { %1168 = vsyncadd [#allocation3], 4294967264 }
  0x1a   :  { %1169 = dma.done.wait [#allocation5], 144  }
  0x1b   :  { %1170 = vsyncadd [#allocation5], 4294967152 }
  0x1c   :  { %1171 = dma.done.wait [#allocation8], 144  }
  0x1d   :  { %1172 = vsyncadd [#allocation8], 4294967152 }
  0x1e   :  { %1173 = dma.done.wait [#allocation11], 512  }
  0x1f   :  { %1174 = vsyncadd [#allocation11], 4294966784  ;;  %v876_v0 = vld [vmem:[%s1752_s1 + $0x30] sm:$0xf]  ;;  %v951_v1 = vld [vmem:[%s1752_s1 + $0x34] sm:$0xf0] }
  0x20   :  { %v950_v2 = vld [vmem:[%s1752_s1 + $0x34] sm:$0xf]  ;;  %v877_v3 = vor.u32 %v951_v1, %v876_v0  ;;  %v878_v4 = vld [vmem:[%s1752_s1 + $0x38] sm:$0xf0]  ;;  %v868_v5 = vld [vmem:[%s1752_s1 + $0x20] sm:$0xf] }
  0x21   :  { %v949_v6 = vld [vmem:[%s1752_s1 + $0x24] sm:$0xf0]  ;;  %v881_v7 = vor.u32 %v950_v2, %v878_v4  ;;  %v948_v8 = vld [vmem:[%s1752_s1 + $0x24] sm:$0xf]  ;;  %v870_v9 = vld [vmem:[%s1752_s1 + $0x28] sm:$0xf0] }
  0x22   :  { %370 = vmatpush.bf16.msra.mxu0 %v877_v3  ;;  %v869_v10 = vor.u32 %v949_v6, %v868_v5  ;;  %v873_v11 = vor.u32 %v948_v8, %v870_v9  ;;  %v860_v12 = vld [vmem:[%s1752_s1 + $0x10] sm:$0xf]  ;;  %v947_v13 = vld [vmem:[%s1752_s1 + $0x14] sm:$0xf0]  ;;  %v946_v14 = vld [vmem:[%s1752_s1 + $0x14] sm:$0xf] }
  0x23   :  { %383 = vmatpush.bf16.msra.mxu1 %v881_v7  ;;  %v862_v15 = vld [vmem:[%s1752_s1 + $0x18] sm:$0xf0]  ;;  %v861_v17 = vor.u32 %v947_v13, %v860_v12  ;;  %v852_v18 = vld [vmem:[%s1752_s1] sm:$0xf]  ;;  %v958_v19 = vld [vmem:[%s1753_s2 + $0x30] sm:$0xff]  ;;  %s1769_s19 = sld [smem:[#allocation17_spill]] }
  0x24   :  { %v959_v16 = vld [vmem:[%s1753_s2 + $0x38] sm:$0xff]  ;;  %v865_v21 = vor.u32 %v946_v14, %v862_v15  ;;  %v945_v22 = vld [vmem:[%s1752_s1 + $0x4] sm:$0xf0]  ;;  %v944_v23 = vld [vmem:[%s1752_s1 + $0x4] sm:$0xf]  ;;  %vm362_vm0 = vcmask 523264  }
  0x25   :  { %474 = vmatpush.bf16.msra.mxu2 %v959_v16  ;;  %v963_v20 = vld [vmem:[%s1753_s2 + $0x58] sm:$0xff]  ;;  %v854_v24 = vld [vmem:[%s1752_s1 + $0x8] sm:$0xf0]  ;;  %v853_v25 = vor.u32 %v945_v22, %v852_v18  ;;  %v956_v30 = vld [vmem:[%s1753_s2 + $0x20] sm:$0xff]  ;;  %vm500_vm1 = vcmask 785408   ;;  %vm609_vm2 = vcmask 916480  }
  0x26   :  { %371 = vmatpush.bf16.msra.mxu0 %v869_v10  ;;  %491 = vmatpush.bf16.msra.mxu3 %v963_v20  ;;  %v957_v27 = vld [vmem:[%s1753_s2 + $0x28] sm:$0xff]  ;;  %v857_v28 = vor.u32 %v944_v23, %v854_v24  ;;  %v955_v31 = vld [vmem:[%s1753_s2 + $0x18] sm:$0xff]  ;;  %v954_v32 = vld [vmem:[%s1753_s2 + $0x10] sm:$0xff]  ;;  %vm709_vm3 = vcmask 1043456   ;;  %vm705_vm5 = vcmask 97280   ;;  %vm840_vm11 = vcmask 140288  }
  0x27   :  { %384 = vmatpush.bf16.msra.mxu1 %v873_v11  ;;  %v962_v33 = vld [vmem:[%s1753_s2 + $0x50] sm:$0xff]  ;;  %v953_v34 = vld [vmem:[%s1753_s2 + $0x8] sm:$0xff]  ;;  %v952_v36 = vld [vmem:[%s1753_s2] sm:$0xff] }
  0x28   :  { %v961_v35 = vld [vmem:[%s1753_s2 + $0x48] sm:$0xff]  ;;  %v960_v37 = vld [vmem:[%s1753_s2 + $0x40] sm:$0xff]  ;;  %v202_v38 = vld [vmem:[%s1760_s9 + $0x58] sm:$0xff] }
  0x29   :  { %v315_v26 = vld [vmem:[%s1769_s19] sm:$0x3]  ;;  %475 = vmatpush.bf16.msra.mxu2 %v958_v19  ;;  %v201_v39 = vld [vmem:[%s1760_s9 + $0x50] sm:$0xff]  ;;  %v200_v40 = vld [vmem:[%s1760_s9 + $0x48] sm:$0xff] }
  0x2a   :  { %372 = vmatpush.bf16.msra.mxu0 %v861_v17  ;;  %v316_v29 = vpack.c.bf16 %v315_v26, %v315_v26  ;;  %492 = vmatpush.bf16.msra.mxu3 %v962_v33  ;;  %v199_v41 = vld [vmem:[%s1760_s9 + $0x40] sm:$0xff]  ;;  %v198_v42 = vld [vmem:[%s1760_s9 + $0x38] sm:$0xff]  ;;  %v197_v43 = vld [vmem:[%s1760_s9 + $0x30] sm:$0xff] }
  0x2b   :  { %385 = vmatpush.bf16.msra.mxu1 %v865_v21  ;;  %v196_v44 = vld [vmem:[%s1760_s9 + $0x28] sm:$0xff]  ;;  %v195_v45 = vld [vmem:[%s1760_s9 + $0x20] sm:$0xff]  ;;  %v194_v47 = vld [vmem:[%s1760_s9 + $0x18] sm:$0xff] }
  0x2c   :  { %v185_v46 = vld [vmem:[#allocation2] sm:$0x3]  ;;  %v193_v60 = vld [vmem:[%s1760_s9 + $0x10] sm:$0xff]  ;;  %v192_v61 = vld [vmem:[%s1760_s9 + $0x8] sm:$0xff] }
  0x2d   :  { %476 = vmatpush.bf16.msra.mxu2 %v957_v27  ;;  %v318_v48 = vperm.slane %v185_v46, 0  ;;  %v319_v49 = vperm.slane %v185_v46, 1  ;;  %v191_v62 = vld [vmem:[%s1760_s9] sm:$0xff]  ;;  %v225_v63 = vld [vmem:[%s1761_s10 + $0xb0] sm:$0xff]  ;;  %v226_v0 = vld [vmem:[%s1761_s10 + $0xb8] sm:$0xff] }
  0x2e   :  { %373 = vmatpush.bf16.msra.mxu0 %v853_v25  ;;  %493 = vmatpush.bf16.msra.mxu3 %v961_v35  ;;  %v249_v1 = vld [vmem:[%s1762_s11 + $0xb0] sm:$0xff]  ;;  %v250_v2 = vld [vmem:[%s1762_s11 + $0xb8] sm:$0xff]  ;;  %v223_v3 = vld [vmem:[%s1761_s10 + $0xa0] sm:$0xff] }
  0x2f   :  { %386 = vmatpush.bf16.msra.mxu1 %v857_v28  ;;  %v224_v4 = vld [vmem:[%s1761_s10 + $0xa8] sm:$0xff]  ;;  %v247_v5 = vld [vmem:[%s1762_s11 + $0xa0] sm:$0xff]  ;;  %v221_v7 = vld [vmem:[%s1761_s10 + $0x90] sm:$0xff] }
  0x30   :  { %v248_v6 = vld [vmem:[%s1762_s11 + $0xa8] sm:$0xff]  ;;  %v222_v8 = vld [vmem:[%s1761_s10 + $0x98] sm:$0xff]  ;;  %v245_v9 = vld [vmem:[%s1762_s11 + $0x90] sm:$0xff] }
  0x31   :  { %882 = vmatmul.msk.bf16.vlgmr.msra.gmra.mxu0 %vm362_vm0, %v316_v29  ;;  %477 = vmatpush.bf16.msra.mxu2 %v956_v30  ;;  %v246_v10 = vld [vmem:[%s1762_s11 + $0x98] sm:$0xff]  ;;  %v219_v11 = vld [vmem:[%s1761_s10 + $0x80] sm:$0xff]  ;;  %v220_v12 = vld [vmem:[%s1761_s10 + $0x88] sm:$0xff] }
  0x32   :  { %883 = vmatmul.msk.bf16.vlgmr.msra.gmra.mxu1 %vm362_vm0, %v316_v29  ;;  %494 = vmatpush.bf16.msra.mxu3 %v960_v37  ;;  %v243_v13 = vld [vmem:[%s1762_s11 + $0x80] sm:$0xff]  ;;  %v244_v14 = vld [vmem:[%s1762_s11 + $0x88] sm:$0xff]  ;;  %v217_v15 = vld [vmem:[%s1761_s10 + $0x70] sm:$0xff] }
  0x33   :  { %508 = vmatpush.msrb.mxu0 %v202_v38  ;;  %531 = vmatpush.msrb.mxu1 %v225_v63  ;;  %v218_v16 = vld [vmem:[%s1761_s10 + $0x78] sm:$0xff]  ;;  %v241_v17 = vld [vmem:[%s1762_s11 + $0x70] sm:$0xff]  ;;  %v215_v19 = vld [vmem:[%s1761_s10 + $0x60] sm:$0xff] }
  0x34   :  { %v242_v18 = vld [vmem:[%s1762_s11 + $0x78] sm:$0xff]  ;;  %v216_v20 = vld [vmem:[%s1761_s10 + $0x68] sm:$0xff]  ;;  %v239_v21 = vld [vmem:[%s1762_s11 + $0x60] sm:$0xff] }
  0x35   :  { %478 = vmatpush.bf16.msra.mxu2 %v955_v31  ;;  %509 = vmatpush.msrb.mxu0 %v201_v39  ;;  %v240_v22 = vld [vmem:[%s1762_s11 + $0x68] sm:$0xff]  ;;  %v213_v23 = vld [vmem:[%s1761_s10 + $0x50] sm:$0xff]  ;;  %v214_v24 = vld [vmem:[%s1761_s10 + $0x58] sm:$0xff] }
  0x36   :  { %551 = vmatpush.msrb.mxu3 %v226_v0  ;;  %532 = vmatpush.msrb.mxu1 %v223_v3  ;;  %v237_v25 = vld [vmem:[%s1762_s11 + $0x50] sm:$0xff]  ;;  %v238_v26 = vld [vmem:[%s1762_s11 + $0x58] sm:$0xff]  ;;  %v211_v27 = vld [vmem:[%s1761_s10 + $0x40] sm:$0xff] }
  0x37   :  { %510 = vmatpush.msrb.mxu0 %v200_v40  ;;  %v212_v28 = vld [vmem:[%s1761_s10 + $0x48] sm:$0xff]  ;;  %v235_v29 = vld [vmem:[%s1762_s11 + $0x40] sm:$0xff]  ;;  %v209_v31 = vld [vmem:[%s1761_s10 + $0x30] sm:$0xff] }
  0x38   :  { %552 = vmatpush.msrb.mxu3 %v224_v4  ;;  %533 = vmatpush.msrb.mxu1 %v221_v7  ;;  %v236_v30 = vld [vmem:[%s1762_s11 + $0x48] sm:$0xff]  ;;  %v233_v33 = vld [vmem:[%s1762_s11 + $0x30] sm:$0xff]  ;;  %v207_v35 = vld [vmem:[%s1761_s10 + $0x20] sm:$0xff] }
  0x39   :  { %479 = vmatpush.bf16.msra.mxu2 %v954_v32  ;;  %511 = vmatpush.msrb.mxu0 %v199_v41  ;;  %v210_v32 = vld [vmem:[%s1761_s10 + $0x38] sm:$0xff]  ;;  %v231_v37 = vld [vmem:[%s1762_s11 + $0x20] sm:$0xff]  ;;  %v232_v38 = vld [vmem:[%s1762_s11 + $0x28] sm:$0xff] }
  0x3a   :  { %553 = vmatpush.msrb.mxu3 %v222_v8  ;;  %534 = vmatpush.msrb.mxu1 %v219_v11  ;;  %v205_v39 = vld [vmem:[%s1761_s10 + $0x10] sm:$0xff]  ;;  %v206_v40 = vld [vmem:[%s1761_s10 + $0x18] sm:$0xff]  ;;  %v309_v63 = vld [vmem:[%s1764_s13 + $0xe0] sm:$0xff] }
  0x3b   :  { %512 = vmatpush.msrb.mxu0 %v198_v42  ;;  %v229_v41 = vld [vmem:[%s1762_s11 + $0x10] sm:$0xff]  ;;  %v230_v42 = vld [vmem:[%s1762_s11 + $0x18] sm:$0xff]  ;;  %v263_v0 = vld [vmem:[%s1763_s12 + $0x60] sm:$0xff] }
  0x3c   :  { %554 = vmatpush.msrb.mxu3 %v220_v12  ;;  %535 = vmatpush.msrb.mxu1 %v217_v15  ;;  %v308_v3 = vld [vmem:[%s1764_s13 + $0xd8] sm:$0xff]  ;;  %v277_v4 = vld [vmem:[%s1763_s12 + $0xd0] sm:$0xff]  ;;  %v276_v8 = vld [vmem:[%s1763_s12 + $0xc8] sm:$0xff] }
  0x3d   :  { %480 = vmatpush.bf16.msra.mxu2 %v953_v34  ;;  %513 = vmatpush.msrb.mxu0 %v197_v43  ;;  %v234_v34 = vld [vmem:[%s1762_s11 + $0x38] sm:$0xff]  ;;  %v973_v43 = vld [vmem:[#allocation4] ss:$0 sm:$0xff]  ;;  %v307_v7 = vld [vmem:[%s1764_s13 + $0xd0] sm:$0xff] }
  0x3e   :  { %555 = vmatpush.msrb.mxu3 %v218_v16  ;;  %536 = vmatpush.msrb.mxu1 %v215_v19  ;;  %v306_v11 = vld [vmem:[%s1764_s13 + $0xc8] sm:$0xff]  ;;  %v275_v12 = vld [vmem:[%s1763_s12 + $0xc0] sm:$0xff]  ;;  %v274_v16 = vld [vmem:[%s1763_s12 + $0xb8] sm:$0xff] }
  0x3f   :  { %514 = vmatpush.msrb.mxu0 %v196_v44  ;;  %v305_v15 = vld [vmem:[%s1764_s13 + $0xc0] sm:$0xff]  ;;  %v304_v19 = vld [vmem:[%s1764_s13 + $0xb8] sm:$0xff] }
  0x40   :  { %556 = vmatpush.msrb.mxu3 %v216_v20  ;;  %537 = vmatpush.msrb.mxu1 %v213_v23  ;;  %v273_v20 = vld [vmem:[%s1763_s12 + $0xb0] sm:$0xff] }
  0x41   :  { %481 = vmatpush.bf16.msra.mxu2 %v952_v36  ;;  %515 = vmatpush.msrb.mxu0 %v195_v45  ;;  %v208_v36 = vld [vmem:[%s1761_s10 + $0x28] sm:$0xff]  ;;  %v303_v23 = vld [vmem:[%s1764_s13 + $0xb0] sm:$0xff] }
  0x42   :  { %557 = vmatpush.msrb.mxu3 %v214_v24  ;;  %538 = vmatpush.msrb.mxu1 %v211_v27  ;;  %v272_v24 = vld [vmem:[%s1763_s12 + $0xa8] sm:$0xff] }
  0x43   :  { %516 = vmatpush.msrb.mxu0 %v194_v47  ;;  %v302_v27 = vld [vmem:[%s1764_s13 + $0xa8] sm:$0xff] }
  0x44   :  { %558 = vmatpush.msrb.mxu3 %v212_v28  ;;  %539 = vmatpush.msrb.mxu1 %v209_v31  ;;  %v256_v28 = vld [vmem:[%s1763_s12 + $0x28] sm:$0xff]  ;;  %v255_v31 = vld [vmem:[%s1763_s12 + $0x20] sm:$0xff] }
  0x45   :  { %517 = vmatpush.msrb.mxu0 %v193_v60  ;;  %571 = vmatpush.msrb.mxu2 %v249_v1  ;;  %v294_v60 = vld [vmem:[%s1764_s13 + $0x68] sm:$0xff]  ;;  %v293_v1 = vld [vmem:[%s1764_s13 + $0x60] sm:$0xff] }
  0x46   :  { %559 = vmatpush.msrb.mxu3 %v210_v32  ;;  %540 = vmatpush.msrb.mxu1 %v207_v35  ;;  %v271_v32 = vld [vmem:[%s1763_s12 + $0xa0] sm:$0xff]  ;;  %v254_v35 = vld [vmem:[%s1763_s12 + $0x18] sm:$0xff] }
  0x47   :  { %518 = vmatpush.msrb.mxu0 %v192_v61  ;;  %572 = vmatpush.msrb.mxu2 %v247_v5  ;;  %v310_v61 = vld [vmem:[%s1764_s13 + $0xe8] sm:$0xff]  ;;  %v262_v5 = vld [vmem:[%s1763_s12 + $0x58] sm:$0xff] }
  0x48   :  { %560 = vmatpush.msrb.mxu3 %v208_v36  ;;  %541 = vmatpush.msrb.mxu1 %v205_v39  ;;  %v270_v36 = vld [vmem:[%s1763_s12 + $0x98] sm:$0xff]  ;;  %v253_v39 = vld [vmem:[%s1763_s12 + $0x10] sm:$0xff] }
  0x49   :  { %519 = vmatpush.msrb.mxu0 %v191_v62  ;;  %573 = vmatpush.msrb.mxu2 %v245_v9  ;;  %v279_v62 = vld [vmem:[%s1763_s12 + $0xe0] sm:$0xff]  ;;  %v261_v9 = vld [vmem:[%s1763_s12 + $0x50] sm:$0xff] }
  0x4a   :  { %561 = vmatpush.msrb.mxu3 %v206_v40  ;;  %v269_v40 = vld [vmem:[%s1763_s12 + $0x90] sm:$0xff] }
  0x4b   :  { %591 = vmatpush.msra.mxu0 %v250_v2  ;;  %574 = vmatpush.msrb.mxu2 %v243_v13  ;;  %v278_v2 = vld [vmem:[%s1763_s12 + $0xd8] sm:$0xff]  ;;  %v260_v13 = vld [vmem:[%s1763_s12 + $0x48] sm:$0xff] }
  0x4d   :  { %592 = vmatpush.msra.mxu0 %v248_v6  ;;  %575 = vmatpush.msrb.mxu2 %v241_v17  ;;  %v292_v6 = vld [vmem:[%s1764_s13 + $0x58] sm:$0xff]  ;;  %v259_v17 = vld [vmem:[%s1763_s12 + $0x40] sm:$0xff] }
  0x4f   :  { %593 = vmatpush.msra.mxu0 %v246_v10  ;;  %576 = vmatpush.msrb.mxu2 %v239_v21  ;;  %v291_v10 = vld [vmem:[%s1764_s13 + $0x50] sm:$0xff]  ;;  %v258_v21 = vld [vmem:[%s1763_s12 + $0x38] sm:$0xff] }
  0x51   :  { %594 = vmatpush.msra.mxu0 %v244_v14  ;;  %577 = vmatpush.msrb.mxu2 %v237_v25  ;;  %v290_v14 = vld [vmem:[%s1764_s13 + $0x48] sm:$0xff]  ;;  %v257_v25 = vld [vmem:[%s1763_s12 + $0x30] sm:$0xff] }
  0x53   :  { %595 = vmatpush.msra.mxu0 %v242_v18  ;;  %578 = vmatpush.msrb.mxu2 %v235_v29  ;;  %v289_v18 = vld [vmem:[%s1764_s13 + $0x40] sm:$0xff]  ;;  %v286_v29 = vld [vmem:[%s1764_s13 + $0x28] sm:$0xff] }
  0x55   :  { %596 = vmatpush.msra.mxu0 %v240_v22  ;;  %579 = vmatpush.msrb.mxu2 %v233_v33  ;;  %v288_v22 = vld [vmem:[%s1764_s13 + $0x38] sm:$0xff]  ;;  %v285_v33 = vld [vmem:[%s1764_s13 + $0x20] sm:$0xff] }
  0x57   :  { %597 = vmatpush.msra.mxu0 %v238_v26  ;;  %580 = vmatpush.msrb.mxu2 %v231_v37  ;;  %v287_v26 = vld [vmem:[%s1764_s13 + $0x30] sm:$0xff]  ;;  %v284_v37 = vld [vmem:[%s1764_s13 + $0x18] sm:$0xff] }
  0x59   :  { %598 = vmatpush.msra.mxu0 %v236_v30  ;;  %581 = vmatpush.msrb.mxu2 %v229_v41  ;;  %v283_v41 = vld [vmem:[%s1764_s13 + $0x10] sm:$0xff] }
  0x5b   :  { %599 = vmatpush.msra.mxu0 %v234_v34  ;;  %v301_v34 = vld [vmem:[%s1764_s13 + $0xa0] sm:$0xff] }
  0x5d   :  { %600 = vmatpush.msra.mxu0 %v232_v38  ;;  %v300_v38 = vld [vmem:[%s1764_s13 + $0x98] sm:$0xff] }
  0x5f   :  { %601 = vmatpush.msra.mxu0 %v230_v42  ;;  %v299_v42 = vld [vmem:[%s1764_s13 + $0x90] sm:$0xff] }
  0xae   :  { %v375_v50 = vpop.f32.mrf.mxu0 }
  0xaf   :  { %v376_v51 = vadd.f32 %v375_v50, %v318_v48  ;;  %v388_v52 = vpop.f32.mrf.mxu1  ;;  %v203_v50 = vld [vmem:[%s1761_s10] sm:$0xff] }
  0xb0   :  { %v389_v53 = vadd.f32 %v388_v52, %v319_v49  ;;  %v227_v52 = vld [vmem:[%s1762_s11] sm:$0xff]  ;;  %542 = vmatpush.msrb.mxu1 %v203_v50 }
  0xb1   :  { %975 = vtanh.f32 %v376_v51  ;;  %v204_v51 = vld [vmem:[%s1761_s10 + $0x8] sm:$0xff]  ;;  %582 = vmatpush.msrb.mxu2 %v227_v52  ;;  %v297_v50 = vld [vmem:[%s1764_s13 + $0x80] sm:$0xff] }
  0xb2   :  { %977 = vtanh.f32 %v389_v53  ;;  %562 = vmatpush.msrb.mxu3 %v204_v51  ;;  %v228_v53 = vld [vmem:[%s1762_s11 + $0x8] sm:$0xff] }
  0xb3   :  { %602 = vmatpush.msra.mxu0 %v228_v53 }
  0xb6   :  { %v377_v54 = vpop.f32.mrf.mxu0 }
  0xb7   :  { %v976_v55 = vpop.eup %975  ;;  %v390_v56 = vpop.f32.mrf.mxu1  ;;  %v266_v54 = vld [vmem:[%s1763_s12 + $0x78] sm:$0xff] }
  0xb8   :  { %v978_v57 = vpop.eup %977  ;;  %v394_v58 = vpack.c.bf16 %v976_v55, %v976_v55  ;;  %v296_v55 = vld [vmem:[%s1764_s13 + $0x78] sm:$0xff]  ;;  %v265_v56 = vld [vmem:[%s1763_s12 + $0x70] sm:$0xff]  ;;  %613 = vmatpush.msra.mxu1 %v266_v54 }
  0xb9   :  { %v395_v59 = vpack.c.bf16 %v978_v57, %v978_v57  ;;  %v295_v57 = vld [vmem:[%s1764_s13 + $0x70] sm:$0xff] }
  0xba   :  { %482 = vmatmul.bf16.vlgmr.msra.gmra.mxu2 %v394_v58  ;;  %v280_v58 = vld [vmem:[%s1763_s12 + $0xe8] sm:$0xff]  ;;  %614 = vmatpush.msra.mxu1 %v265_v56 }
  0xbb   :  { %932 = vmatmul.msk.bf16.vlgmr.msra.gmra.mxu3 %vm362_vm0, %v395_v59  ;;  %653 = vmatpush.msra.mxu2 %v296_v55  ;;  %v264_v59 = vld [vmem:[%s1763_s12 + $0x68] sm:$0xff] }
  0xbc   :  { %635 = vmatpush.msra.mxu3 %v280_v58  ;;  %615 = vmatpush.msra.mxu1 %v264_v59  ;;  %v311_v58 = vld [vmem:[#allocation10] sm:$0xff]  ;;  %v314_v59 = vld [vmem:[#allocation12 + $0x8] sm:$0xf] }
  0xbd   :  { %654 = vmatpush.msra.mxu2 %v295_v57  ;;  %v312_v57 = vld [vmem:[#allocation10 + $0x8] sm:$0xf] }
  0xbe   :  { %636 = vmatpush.msra.mxu3 %v279_v62  ;;  %616 = vmatpush.msra.mxu1 %v263_v0 }
  0xbf   :  { %655 = vmatpush.msra.mxu2 %v294_v60  ;;  %v313_v60 = vld [vmem:[#allocation12] sm:$0xff] }
  0xc0   :  { %637 = vmatpush.msra.mxu3 %v278_v2  ;;  %617 = vmatpush.msra.mxu1 %v262_v5 }
  0xc1   :  { %656 = vmatpush.msra.mxu2 %v293_v1 }
  0xc2   :  { %638 = vmatpush.msra.mxu3 %v277_v4  ;;  %618 = vmatpush.msra.mxu1 %v261_v9 }
  0xc3   :  { %657 = vmatpush.msra.mxu2 %v292_v6 }
  0xc4   :  { %639 = vmatpush.msra.mxu3 %v276_v8  ;;  %619 = vmatpush.msra.mxu1 %v260_v13 }
  0xc5   :  { %658 = vmatpush.msra.mxu2 %v291_v10 }
  0xc6   :  { %640 = vmatpush.msra.mxu3 %v275_v12  ;;  %620 = vmatpush.msra.mxu1 %v259_v17 }
  0xc7   :  { %659 = vmatpush.msra.mxu2 %v290_v14 }
  0xc8   :  { %641 = vmatpush.msra.mxu3 %v274_v16  ;;  %621 = vmatpush.msra.mxu1 %v258_v21 }
  0xc9   :  { %660 = vmatpush.msra.mxu2 %v289_v18 }
  0xca   :  { %642 = vmatpush.msra.mxu3 %v273_v20  ;;  %622 = vmatpush.msra.mxu1 %v257_v25  ;;  %v187_v20 = vld [vmem:[%s1756_s5] sm:$0xff] }
  0xcb   :  { %661 = vmatpush.msra.mxu2 %v288_v22 }
  0xcc   :  { %643 = vmatpush.msra.mxu3 %v272_v24  ;;  %623 = vmatpush.msra.mxu1 %v256_v28  ;;  %v778_v28 = vperm.slane %v187_v20, 1 }
  0xcd   :  { %662 = vmatpush.msra.mxu2 %v287_v26 }
  0xce   :  { %624 = vmatpush.msra.mxu1 %v255_v31  ;;  %644 = vmatpush.msra.mxu3 %v271_v32  ;;  %v788_v31 = vperm.slane %v187_v20, 3 }
  0xcf   :  { %663 = vmatpush.msra.mxu2 %v286_v29 }
  0xd0   :  { %625 = vmatpush.msra.mxu1 %v254_v35  ;;  %645 = vmatpush.msra.mxu3 %v270_v36 }
  0xd1   :  { %664 = vmatpush.msra.mxu2 %v285_v33 }
  0xd2   :  { %626 = vmatpush.msra.mxu1 %v253_v39  ;;  %646 = vmatpush.msra.mxu3 %v269_v40  ;;  %v798_v39 = vperm.slane %v187_v20, 5 }
  0xd3   :  { %665 = vmatpush.msra.mxu2 %v284_v37  ;;  %v793_v37 = vperm.slane %v187_v20, 4 }
  0xd5   :  { %666 = vmatpush.msra.mxu2 %v283_v41 }
 0x13d   :  { %v483_v44 = vpop.f32.mrf.mxu2 }
 0x13e   :  { %v484_v45 = vadd.f32 %v973_v43, %v483_v44  ;;  %v496_v46 = vpop.f32.mrf.mxu3  ;;  %v252_v43 = vld [vmem:[%s1763_s12 + $0x8] sm:$0xff] }
 0x13f   :  { %v268_v44 = vld [vmem:[%s1763_s12 + $0x88] sm:$0xff]  ;;  %627 = vmatpush.msra.mxu1 %v252_v43 }
 0x140   :  { %v497_v47 = vadd.f32 %v496_v46, %v484_v45  ;;  %v282_v45 = vld [vmem:[%s1764_s13 + $0x8] sm:$0xff]  ;;  %647 = vmatpush.msra.mxu3 %v268_v44 }
 0x141   :  { %v298_v46 = vld [vmem:[%s1764_s13 + $0x88] sm:$0xff]  ;;  %667 = vmatpush.msra.mxu2 %v282_v45  ;;  %v803_v45 = vperm.slane %v187_v20, 6 }
 0x142   :  { %933 = vmatmul.msk.f32.vlgmr.msrb.gmra.mxu0 %vm500_vm1, %v497_v47  ;;  %v251_v47 = vld [vmem:[%s1763_s12] sm:$0xff] }
 0x143   :  { %675 = vmatpush.msrb.mxu0 %v310_v61  ;;  %628 = vmatpush.msra.mxu1 %v251_v47 }
 0x145   :  { %v485_v48 = vpop.f32.mrf.mxu2  ;;  %676 = vmatpush.msrb.mxu0 %v309_v63 }
 0x146   :  { %v498_v49 = vpop.f32.mrf.mxu3  ;;  %v267_v48 = vld [vmem:[%s1763_s12 + $0x80] sm:$0xff] }
 0x147   :  { %677 = vmatpush.msrb.mxu0 %v308_v3  ;;  %v281_v49 = vld [vmem:[%s1764_s13] sm:$0xff]  ;;  %648 = vmatpush.msra.mxu3 %v267_v48 }
 0x148   :  { %668 = vmatpush.msra.mxu2 %v281_v49 }
 0x149   :  { %678 = vmatpush.msrb.mxu0 %v307_v7 }
 0x14b   :  { %679 = vmatpush.msrb.mxu0 %v306_v11 }
 0x14d   :  { %680 = vmatpush.msrb.mxu0 %v305_v15 }
 0x14f   :  { %681 = vmatpush.msrb.mxu0 %v304_v19 }
 0x151   :  { %682 = vmatpush.msrb.mxu0 %v303_v23  ;;  %v189_v23 = vld [vmem:[#allocation7] sm:$0xff] }
 0x152   :  { %v775_v33 = vperm.slane %v189_v23, 0  ;;  %v780_v35 = vperm.slane %v189_v23, 1  ;;  %v785_v36 = vperm.slane %v189_v23, 2  ;;  %v795_v44 = vperm.slane %v189_v23, 4 }
 0x153   :  { %683 = vmatpush.msrb.mxu0 %v302_v27  ;;  %v773_v27 = vperm.slane %v187_v20, 0 }
 0x155   :  { %684 = vmatpush.msrb.mxu0 %v301_v34 }
 0x157   :  { %685 = vmatpush.msrb.mxu0 %v300_v38  ;;  %v790_v38 = vperm.slane %v189_v23, 3 }
 0x159   :  { %686 = vmatpush.msrb.mxu0 %v299_v42 }
 0x15b   :  { %687 = vmatpush.msrb.mxu0 %v298_v46 }
 0x15d   :  { %688 = vmatpush.msrb.mxu0 %v297_v50  ;;  %v800_v50 = vperm.slane %v189_v23, 5 }
 0x1bf   :  { %v521_v30 = vpop.f32.mrf.mxu0 }
 0x1c0   :  { %934 = vmatmul.msk.f32.vlgmr.msrb.gmra.mxu1 %vm500_vm1, %v521_v30  ;;  %935 = vmatmul.msk.f32.vlgmr.msrb.gmra.mxu3 %vm500_vm1, %v521_v30 }
 0x1c1   :  { %936 = vmatmul.msk.f32.vlgmr.msrb.gmra.mxu2 %vm500_vm1, %v521_v30  ;;  %937 = vmatmul.msk.f32.vlgmr.msra.gmra.mxu0 %vm500_vm1, %v521_v30  ;;  %v783_v30 = vperm.slane %v187_v20, 2 }
 0x1c2   :  { %940 = vmatpush.msk.msrb.mxu3 %vm709_vm3, %v312_v57  ;;  %942 = vmatpush.msk.msrb.mxu1 %vm709_vm3, %v314_v59  ;;  %v805_v57 = vperm.slane %v189_v23, 6 }
 0x1c4   :  { %728 = vmatpush.msrb.mxu3 %v311_v58  ;;  %751 = vmatpush.msrb.mxu1 %v313_v60 }
 0x23d   :  { %v544_v53 = vpop.f32.mrf.mxu1 }
 0x23e   :  { %v604_v51 = vpop.f32.mrf.mxu0 }
 0x243   :  { %v564_v52 = vpop.f32.mrf.mxu3 }
 0x244   :  { %v608_v54 = vmul.f32 %v604_v51, %v564_v52  ;;  %v584_v55 = vpop.f32.mrf.mxu2  ;;  %v188_v51 = vld [vmem:[#allocation6] sm:$0xff] }
 0x245   :  { %v607_v56 = vmul.f32 %v584_v55, %v544_v53  ;;  %v813_v58 = vperm.slane %v188_v51, 0 }
 0x246   :  { %938 = vmatmul.msk.f32.vlgmr.msra.gmra.mxu3 %vm609_vm2, %v608_v54  ;;  %939 = vmatmul.msk.f32.vlgmr.msrb.gmra.mxu0 %vm609_vm2, %v608_v54  ;;  %v808_v54 = vperm.slane %v187_v20, 7 }
 0x247   :  { %629 = vmatmul.f32.vlgmr.msra.gmra.mxu1 %v607_v56  ;;  %669 = vmatmul.f32.vlgmr.msra.gmra.mxu2 %v607_v56 }
 0x2c3   :  { %v690_v61 = vpop.f32.mrf.mxu0 }
 0x2c4   :  { %v630_v10 = vpop.f32.mrf.mxu1 }
 0x2c9   :  { %v650_v11 = vpop.f32.mrf.mxu3 }
 0x2ca   :  { %v670_v62 = vpop.f32.mrf.mxu2  ;;  %v651_v25 = vadd.f32 %v650_v11, %v630_v10 }
 0x2cb   :  { %v691_v63 = vadd.f32 %v690_v61, %v670_v62  ;;  %v810_v61 = vperm.slane %v189_v23, 7  ;;  %v974_v62 = vld [vmem:[#allocation9] ss:$0 sm:$0xff] }
 0x2cd   :  { %979 = vrsqrt.f32 %v691_v63  ;;  %vm700_vm4 = vcmp.eq.f32.partialorder %v691_v63, inf  ;;  %v703_v7 = vand.u32 2147483648, %v691_v63  ;;  %vm702_vm6 = vcmp.eq.f32.partialorder %v691_v63, 0.0 }
 0x2d3   :  { %v980_v0 = vpop.eup %979 }
 0x2d4   :  { %v694_v1 = vmul.f32 %v980_v0, %v691_v63 }
 0x2d6   :  { %v695_v2 = vmul.f32 %v980_v0, %v694_v1 }
 0x2d8   :  { %v696_v3 = vmul.f32 0.5, %v695_v2 }
 0x2da   :  { %v697_v4 = vsub.f32 1.5, %v696_v3 }
 0x2dc   :  { %v698_v5 = vmul.f32 %v980_v0, %v697_v4  ;;  %v822_v4 = vperm.slane %v188_v51, 2 }
 0x2de   :  { %v699_v6 = vmul.f32 %v698_v5, %v691_v63 }
 0x2e0   :  { %v701_v8 = vsel %vm700_vm4, %v691_v63, %v699_v6  ;;  %v819_v63 = vperm.slane %v188_v51, 1 }
 0x2e1   :  { %v704_v9 = vsel %vm702_vm6, %v703_v7, %v701_v8 }
 0x2e2   :  { %941 = vmatmul.msk.f32.vlgmr.msrb.gmra.mxu3 %vm705_vm5, %v704_v9  ;;  %943 = vmatmul.msk.f32.vlgmr.msrb.gmra.mxu1 %vm705_vm5, %v704_v9  ;;  %v825_v9 = vperm.slane %v188_v51, 3 }
 0x35f   :  { %v753_v12 = vpop.f32.mrf.mxu1 }
 0x365   :  { %v730_v13 = vpop.f32.mrf.mxu3 }
 0x366   :  { %v756_v14 = vmul.f32 %v753_v12, %v730_v13  ;;  %v828_v13 = vperm.slane %v188_v51, 4 }
 0x368   :  { %v757_v15 = vadd.f32 1e-05, %v756_v14 }
 0x36a   :  { %981 = vrcp.f32 %v757_v15  ;;  %v769_v19 = vand.u32 2147483648, %v757_v15  ;;  %v767_v22 = vand.u32 2147483647, %v757_v15  ;;  %vm763_vm8 = vweird.f32 %v757_v15 }
 0x36c   :  { %v770_v26 = vor.u32 1.1754944e-38, %v769_v19  ;;  %vm768_vm10 = vcmp.eq.f32.partialorder %v767_v22, 8.507059e+37 }
 0x370   :  { %v982_v16 = vpop.eup %981 }
 0x371   :  { %v759_v17 = vmul.f32 %v982_v16, %v757_v15  ;;  %vm764_vm7 = vweird.f32 %v982_v16 }
 0x372   :  { %vm765_vm9 = vmor %vm763_vm8, %vm764_vm7 }
 0x373   :  { %v760_v18 = vsub.f32 1.0, %v759_v17  ;;  %v831_v17 = vperm.slane %v188_v51, 5 }
 0x375   :  { %v761_v21 = vmul.f32 %v982_v16, %v760_v18 }
 0x377   :  { %v762_v24 = vadd.f32 %v982_v16, %v761_v21  ;;  %v834_v21 = vperm.slane %v188_v51, 6 }
 0x379   :  { %v766_v29 = vsel %vm765_vm9, %v982_v16, %v762_v24 }
 0x37a   :  { %v771_v32 = vsel %vm768_vm10, %v770_v26, %v766_v29 }
 0x37b   :  { %v772_v34 = vmul.f32 %v771_v32, %v651_v25  ;;  %v837_v25 = vperm.slane %v188_v51, 7 }
 0x37d   :  { %v774_v40 = vmul.f32 %v773_v27, %v772_v34  ;;  %v779_v41 = vmul.f32 %v778_v28, %v772_v34  ;;  %v784_v42 = vmul.f32 %v783_v30, %v772_v34  ;;  %v789_v43 = vmul.f32 %v788_v31, %v772_v34 }
 0x37e   :  { %v794_v49 = vmul.f32 %v793_v37, %v772_v34  ;;  %v799_v53 = vmul.f32 %v798_v39, %v772_v34  ;;  %v804_v56 = vmul.f32 %v803_v45, %v772_v34  ;;  %v809_v60 = vmul.f32 %v808_v54, %v772_v34 }
 0x37f   :  { %v776_v46 = vadd.f32 %v775_v33, %v774_v40  ;;  %v781_v47 = vadd.f32 %v780_v35, %v779_v41  ;;  %v786_v48 = vadd.f32 %v785_v36, %v784_v42  ;;  %v791_v52 = vadd.f32 %v790_v38, %v789_v43 }
 0x380   :  { %v796_v55 = vadd.f32 %v795_v44, %v794_v49  ;;  %v801_v59 = vadd.f32 %v800_v50, %v799_v53  ;;  %v806_v1 = vadd.f32 %v805_v57, %v804_v56  ;;  %v811_v6 = vadd.f32 %v810_v61, %v809_v60 }
 0x381   :  { %983 = vtanh.f32 %v776_v46 }
 0x382   :  { %985 = vtanh.f32 %v781_v47 }
 0x383   :  { %987 = vtanh.f32 %v786_v48 }
 0x384   :  { %989 = vtanh.f32 %v791_v52 }
 0x385   :  { %991 = vtanh.f32 %v796_v55 }
 0x386   :  { %993 = vtanh.f32 %v801_v59 }
 0x387   :  { %v984_v0 = vpop.eup %983  ;;  %995 = vtanh.f32 %v806_v1 }
 0x388   :  { %v986_v2 = vpop.eup %985  ;;  %v814_v3 = vmul.f32 %v984_v0, %v813_v58  ;;  %997 = vtanh.f32 %v811_v6 }
 0x389   :  { %v988_v5 = vpop.eup %987  ;;  %v820_v8 = vmul.f32 %v986_v2, %v819_v63 }
 0x38a   :  { %v818_v7 = vadd.f32 %v974_v62, %v814_v3  ;;  %v990_v10 = vpop.eup %989  ;;  %v823_v12 = vmul.f32 %v988_v5, %v822_v4 }
 0x38b   :  { %v992_v14 = vpop.eup %991  ;;  %v826_v16 = vmul.f32 %v990_v10, %v825_v9 }
 0x38c   :  { %v821_v11 = vadd.f32 %v820_v8, %v818_v7  ;;  %v994_v18 = vpop.eup %993  ;;  %v829_v20 = vmul.f32 %v992_v14, %v828_v13 }
 0x38d   :  { %v996_v22 = vpop.eup %995  ;;  %v832_v24 = vmul.f32 %v994_v18, %v831_v17 }
 0x38e   :  { %v824_v15 = vadd.f32 %v823_v12, %v821_v11  ;;  %v998_v26 = vpop.eup %997  ;;  %v835_v28 = vmul.f32 %v996_v22, %v834_v21 }
 0x38f   :  { %v838_v30 = vmul.f32 %v998_v26, %v837_v25 }
 0x390   :  { %v827_v19 = vadd.f32 %v826_v16, %v824_v15 }
 0x392   :  { %v830_v23 = vadd.f32 %v829_v20, %v827_v19 }
 0x394   :  { %v833_v27 = vadd.f32 %v832_v24, %v830_v23 }
 0x396   :  { %v836_v29 = vadd.f32 %v835_v28, %v833_v27 }
 0x398   :  { %v839_v31 = vadd.f32 %v838_v30, %v836_v29 }
 0x39a   :  { %841 = vst.msk [vmem:[%s1767_s16] sm:$0x3] %vm840_vm11, %v839_v31 }
 0x39b   :  { %846 = vsyncpa [#allocation3], 1 }
 0x39c   :  { %847 = vsyncpa [#allocation5], 1 }
 0x39d   :  { %848 = vsyncpa [#allocation8], 1 }
 0x39e   :  { %849 = vsyncpa [#allocation11], 1 }

// kernel: _lambda_.4
= control target key start
LH: loop header
LB: loop body
LE: loop exit
PB: predicated region body
PF: predicated region fallthrough
CT: control target
= control target key end

     0   :  { %s1427_s6 = smov 1   ;;  %s1428_s10 = smov 2   ;;  %s1760_s0 = inlined_call_operand.smem [shape: u32[32], index: -1, kind: input, shape index: {}] }
   0x1   :  { %s1469_s5 = sld [smem:[%s1760_s0]]   ;;  %s1429_s14 = smov 3  }
   0x2   :  { %s1474_s9 = sld [smem:[%s1760_s0 + %s1427_s6]]   ;;  %s1430_s18 = smov 4  }
   0x3   :  { %s1479_s13 = sld [smem:[%s1760_s0 + %s1428_s10]]   ;;  %s1431_s22 = smov 5  }
   0x4   :  { %s1484_s17 = sld [smem:[%s1760_s0 + %s1429_s14]]   ;;  %s1432_s26 = smov 6  }
   0x5   :  { %s1489_s21 = sld [smem:[%s1760_s0 + %s1430_s18]]   ;;  %s1433_s30 = smov 7  }
   0x6   :  { %s1494_s25 = sld [smem:[%s1760_s0 + %s1431_s22]]   ;;  %s1434_s4 = smov 8  }
   0x7   :  { %s1499_s29 = sld [smem:[%s1760_s0 + %s1432_s26]]   ;;  %s1435_s10 = smov 9  }
   0x8   :  { %s1504_s3 = sld [smem:[%s1760_s0 + %s1433_s30]]   ;;  %s1436_s15 = smov 10  }
   0x9   :  { %s1509_s8 = sld [smem:[%s1760_s0 + %s1434_s4]]   ;;  %s1437_s20 = smov 11  }
   0xa   :  { %s1514_s14 = sld [smem:[%s1760_s0 + %s1435_s10]]   ;;  %s1438_s26 = smov 12  }
   0xb   :  { %s1519_s19 = sld [smem:[%s1760_s0 + %s1436_s15]]   ;;  %s1439_s1 = smov 13  }
   0xc   :  { %s1524_s24 = sld [smem:[%s1760_s0 + %s1437_s20]]   ;;  %s1440_s7 = smov 14  }
   0xd   :  { %s1529_s30 = sld [smem:[%s1760_s0 + %s1438_s26]]   ;;  %s1441_s15 = smov 15  }
   0xe   :  { %1765 = sst [smem:[#allocation9_spill]] %s1504_s3  ;;  %s1442_s22 = smov 16  }
   0xf   :  { %1766 = sst [smem:[#allocation10_spill]] %s1509_s8  ;;  %s1443_s28 = smov 17  }
  0x10   :  { %s1534_s6 = sld [smem:[%s1760_s0 + %s1439_s1]]   ;;  %s1447_s1 = smov 21  }
  0x11   :  { %s1539_s12 = sld [smem:[%s1760_s0 + %s1440_s7]]   ;;  %s1444_s7 = smov 18  }
  0x12   :  { %1767 = sst [smem:[#allocation11_spill]] %s1524_s24  ;;  %s1448_s10 = smov 22  }
  0x13   :  { %1768 = sst [smem:[#allocation12_spill]] %s1529_s30  ;;  %s1449_s16 = smov 23  }
  0x14   :  { %s1544_s20 = sld [smem:[%s1760_s0 + %s1441_s15]]   ;;  %s1445_s15 = smov 19  }
  0x15   :  { %s1549_s27 = sld [smem:[%s1760_s0 + %s1442_s22]]   ;;  %s1446_s22 = smov 20  }
  0x16   :  { %1769 = sst [smem:[#allocation13_spill]] %s1534_s6  ;;  %s1450_s23 = smov 24  }
  0x17   :  { %1770 = sst [smem:[#allocation14_spill]] %s1539_s12 }
  0x18   :  { %s1554_s4 = sld [smem:[%s1760_s0 + %s1443_s28]]  }
  0x19   :  { %s1559_s8 = sld [smem:[%s1760_s0 + %s1444_s7]]  }
  0x1a   :  { %1771 = sst [smem:[#allocation15_spill]] %s1544_s20 }
  0x1b   :  { %1772 = sst [smem:[#allocation16_spill]] %s1549_s27 }
  0x1c   :  { %s1564_s20 = sld [smem:[%s1760_s0 + %s1445_s15]]  }
  0x1d   :  { %s1037_s27 = sld [smem:[%s1760_s0 + %s1446_s22]]  }
  0x1e   :  { %1773 = sst [smem:[#allocation17_spill]] %s1554_s4 }
  0x1f   :  { %1774 = sst [smem:[#allocation18_spill]] %s1559_s8 }
  0x20   :  { %s1572_s4 = sld [smem:[%s1760_s0 + %s1447_s1]]   ;;  %s1451_s1 = smov 25  }
  0x21   :  { %s1577_s8 = sld [smem:[%s1760_s0 + %s1448_s10]]   ;;  %s1452_s10 = smov 26  }
  0x22   :  { %1775 = sst [smem:[#allocation19_spill]] %s1564_s20 }
  0x23   :  { %s1582_s20 = sld [smem:[%s1760_s0 + %s1449_s16]]   ;;  %v69_v0 = vstv %s1037_s27  ;;  %s1453_s16 = smov 27  }
  0x24   :  { %s1587_s12 = sld [smem:[%s1760_s0 + %s1450_s23]]   ;;  %70 = vst [vmem:[#allocation2] sm:$0x1] %v69_v0  ;;  %s1454_s23 = smov 28  }
  0x25   :  { %s1592_s30 = sld [smem:[%s1760_s0 + %s1451_s1]]   ;;  %s1455_s1 = smov 29  }
  0x26   :  { %s1043_s3 = sld [smem:[%s1760_s0 + %s1452_s10]]   ;;  %s1456_s27 = smov 30  }
  0x27   :  { %s1600_s6 = sld [smem:[%s1760_s0 + %s1453_s16]]   ;;  %s1457_s16 = smov 31  }
  0x28   :  { %s1605_s28 = sld [smem:[%s1760_s0 + %s1454_s23]]  }
  0x29   :  { %s1610_s7 = sld [smem:[%s1760_s0 + %s1455_s1]]  }
  0x2a   :  { %1776 = sst [smem:[#allocation20_spill]] %s1587_s12 }
  0x2b   :  { %1777 = sst [smem:[#allocation21_spill]] %s1592_s30 }
  0x2c   :  { %s1615_s15 = sld [smem:[%s1760_s0 + %s1456_s27]]  }
  0x2d   :  { %s1620_s24 = sld [smem:[%s1760_s0 + %s1457_s16]]  }
  0x2e   :  { %71 = vsyncpa [#allocation4], 0  ;;  %s130_s23 = sshll.u32 %s1043_s3, 4  ;;  %s131_s23 = int_to_ptr.hbm [resolvable:$true] %s130_s23 }
  0x2f   :  { %72 = vsyncpa [#allocation6], 0  ;;  %s1458_s30 = smov [#allocation3]   ;;  %s141_s26 = sshll.u32 %s1600_s6, 4  ;;  %s142_s26 = int_to_ptr.hbm [resolvable:$true] %s141_s26 }
  0x30   :  { %s132_s22 = sshll.u32 %s1458_s30, 4  ;;  %s1375_s1 = sshra.s32 %s131_s23, 4  ;;  %s133_s22 = int_to_ptr.vmem [resolvable:$true] %s132_s22  ;;  %s1376_s1 = int_to_ptr.hbm [resolvable:$true] %s1375_s1 }
  0x31   :  { %s1377_s2 = scalar_lea.hbm %s1376_s1, 4  ;;  %s1379_s27 = scalar_lea.hbm %s1043_s3, 4 }
  0x32   :  { %p1378_p0 = scmp.ne.s32.totalorder %s1376_s1, %s1377_s2  ;;  %p1380_p1 = scmp.lt.s32.totalorder %s1376_s1, %s1043_s3 }
  0x33   :  { %p1381_p2 = scmp.lt.s32.totalorder %s1379_s27, %s1377_s2 }
  0x35   :  { %p1382_p3 = por %p1381_p2, %p1380_p1 }
  0x37   :  { %p1383_p4 = pnand %p1382_p3, %p1378_p0 }
  0x39   :  { %1386 = shalt.err (!%p1383_p4)
}
  0x3a   :  { %135 = dma.hbm_to_vmem [thread:$0]  %s131_s23, 64, %s133_s22, [#allocation4]  }
  0x3b   :  { %s1459_s0 = smov [#allocation5]   ;;  %s1399_s10 = sshra.s32 %s142_s26, 4  ;;  %s1400_s10 = int_to_ptr.hbm [resolvable:$true] %s1399_s10 }
  0x3c   :  { %s143_s12 = sshll.u32 %s1459_s0, 4  ;;  %s1401_s11 = scalar_lea.hbm %s1400_s10, 4  ;;  %s144_s12 = int_to_ptr.vmem [resolvable:$true] %s143_s12 }
  0x3d   :  { %p1402_p5 = scmp.ne.s32.totalorder %s1400_s10, %s1401_s11  ;;  %s1403_s16 = scalar_lea.hbm %s1600_s6, 4 }
  0x3e   :  { %p1404_p6 = scmp.lt.s32.totalorder %s1400_s10, %s1600_s6  ;;  %p1405_p7 = scmp.lt.s32.totalorder %s1403_s16, %s1401_s11 }
  0x40   :  { %p1406_p8 = por %p1405_p7, %p1404_p6 }
  0x42   :  { %p1407_p9 = pnand %p1406_p8, %p1402_p5 }
  0x44   :  { %1410 = shalt.err (!%p1407_p9)
}
  0x45   :  { %146 = dma.hbm_to_vmem [thread:$0]  %s142_s26, 64, %s144_s12, [#allocation6]  }
  0x46   :  { %1423 = dma.done.wait [#allocation4], 64  }
  0x47   :  { %1424 = vsyncadd [#allocation4], 4294967232 }
  0x48   :  { %1425 = dma.done.wait [#allocation6], 64  }
  0x49   :  { %1426 = vsyncadd [#allocation6], 4294967232  ;;  %v1216_v1 = vld [vmem:[%s1474_s9 + $0x8] sm:$0xff]  ;;  %v1215_v2 = vld [vmem:[%s1474_s9] sm:$0xff]  ;;  %vm295_vm0 = vcmask 261120   ;;  %vm341_vm1 = vcmask 523264  }
  0x4a   :  { %v278_v3 = vld [vmem:[%s1469_s5] sm:$0xff]  ;;  %v1220_v4 = vld [vmem:[%s1479_s13 + $0x18] sm:$0xff]  ;;  %305 = vmatpush.bf16.msra.mxu0 %v1216_v1  ;;  %v1219_v6 = vld [vmem:[%s1479_s13 + $0x10] sm:$0xff]  ;;  %s1778_s5 = sld [smem:[#allocation11_spill]]  ;;  %vm732_vm2 = vcmask 654336   ;;  %vm792_vm3 = vcmask 1043456  }
  0x4b   :  { %349 = vmatpush.bf16.msra.mxu1 %v1220_v4  ;;  %v279_v5 = vpack.c.bf16 %v278_v3, %v278_v3  ;;  %v1218_v7 = vld [vmem:[%s1479_s13 + $0x8] sm:$0xff]  ;;  %v1217_v8 = vld [vmem:[%s1479_s13] sm:$0xff]  ;;  %v247_v19 = vld [vmem:[%s1572_s4 + $0x18] sm:$0xff]  ;;  %s1779_s9 = sld [smem:[#allocation20_spill]]  ;;  %vm788_vm5 = vcmask 31744   ;;  %vm663_vm7 = vcmask 23552  }
  0x4c   :  { %v1228_v9 = vld [vmem:[%s1514_s14 + $0x8] sm:$0xff]  ;;  %v1227_v11 = vld [vmem:[%s1514_s14] sm:$0xff]  ;;  %v246_v20 = vld [vmem:[%s1572_s4 + $0x10] sm:$0xff]  ;;  %s1780_s13 = sld [smem:[#allocation13_spill]]  ;;  %vm998_vm12 = vcmask 48128  }
  0x4d   :  { %v1222_v10 = vld [vmem:[%s1494_s25 + $0x8] sm:$0xff]  ;;  %v1336_v12 = vld [vmem:[%s1484_s17] ss:$0 sm:$0xff]  ;;  %v1236_v23 = vld [vmem:[%s1519_s19 + $0x38] sm:$0xff]  ;;  %s1781_s17 = sld [smem:[#allocation9_spill]] }
  0x4e   :  { %306 = vmatpush.bf16.msra.mxu0 %v1215_v2  ;;  %384 = vmatpush.bf16.msra.mxu2 %v1222_v10  ;;  %v1221_v18 = vld [vmem:[%s1494_s25] sm:$0xff]  ;;  %v245_v21 = vld [vmem:[%s1572_s4 + $0x8] sm:$0xff]  ;;  %v1235_v24 = vld [vmem:[%s1519_s19 + $0x30] sm:$0xff]  ;;  %s1783_s25 = sld [smem:[#allocation12_spill]] }
  0x4f   :  { %350 = vmatpush.bf16.msra.mxu1 %v1219_v6  ;;  %v244_v22 = vld [vmem:[%s1572_s4] sm:$0xff]  ;;  %v1234_v25 = vld [vmem:[%s1519_s19 + $0x28] sm:$0xff]  ;;  %v1232_v31 = vld [vmem:[%s1519_s19 + $0x18] sm:$0xff]  ;;  %s1785_s3 = sld [smem:[#allocation10_spill]] }
  0x50   :  { %v1337_v26 = vld [vmem:[%s1489_s21] ss:$0 sm:$0xff]  ;;  %v1231_v33 = vld [vmem:[%s1519_s19 + $0x10] sm:$0xff]  ;;  %v1226_v34 = vld [vmem:[%s1499_s29 + $0x18] sm:$0xff]  ;;  %s1782_s21 = sld [smem:[#allocation21_spill]] }
  0x51   :  { %1057 = vmatmul.msk.bf16.vlgmr.msra.gmra.mxu0 %vm295_vm0, %v279_v5  ;;  %v1233_v27 = vld [vmem:[%s1519_s19 + $0x20] sm:$0xff]  ;;  %427 = vmatpush.bf16.msra.mxu3 %v1226_v34  ;;  %v1230_v35 = vld [vmem:[%s1519_s19 + $0x8] sm:$0xff]  ;;  %v1225_v36 = vld [vmem:[%s1499_s29 + $0x10] sm:$0xff]  ;;  %s1787_s14 = sld [smem:[#allocation17_spill]] }
  0x52   :  { %458 = vmatpush.bf16.msrb.mxu0 %v1228_v9  ;;  %385 = vmatpush.bf16.msra.mxu2 %v1221_v18  ;;  %v1229_v37 = vld [vmem:[%s1519_s19] sm:$0xff]  ;;  %v251_v38 = vld [vmem:[%s1577_s8 + $0x18] sm:$0xff]  ;;  %v1224_v39 = vld [vmem:[%s1499_s29 + $0x8] sm:$0xff]  ;;  %s1788_s19 = sld [smem:[#allocation19_spill]] }
  0x53   :  { %351 = vmatpush.bf16.msra.mxu1 %v1218_v7  ;;  %v250_v40 = vld [vmem:[%s1577_s8 + $0x10] sm:$0xff]  ;;  %v249_v41 = vld [vmem:[%s1577_s8 + $0x8] sm:$0xff]  ;;  %v1223_v42 = vld [vmem:[%s1499_s29] sm:$0xff]  ;;  %s1784_s29 = sld [smem:[#allocation14_spill]] }
  0x54   :  { %v248_v43 = vld [vmem:[%s1577_s8] sm:$0xff]  ;;  %v255_v44 = vld [vmem:[%s1582_s20 + $0x18] sm:$0xff]  ;;  %v254_v45 = vld [vmem:[%s1582_s20 + $0x10] sm:$0xff]  ;;  %s1786_s8 = sld [smem:[#allocation15_spill]] }
  0x55   :  { %428 = vmatpush.bf16.msra.mxu3 %v1225_v36  ;;  %v253_v46 = vld [vmem:[%s1582_s20 + $0x8] sm:$0xff]  ;;  %v252_v47 = vld [vmem:[%s1582_s20] sm:$0xff]  ;;  %v1244_v48 = vld [vmem:[%s1778_s5 + $0x38] sm:$0xff]  ;;  %s1790_s6 = sld [smem:[#allocation16_spill]] }
  0x56   :  { %459 = vmatpush.bf16.msrb.mxu0 %v1227_v11  ;;  %518 = vmatpush.bf16.msrb.mxu2 %v1236_v23  ;;  %v265_v49 = vld [vmem:[%s1779_s9 + $0x48] sm:$0xff]  ;;  %v264_v50 = vld [vmem:[%s1779_s9 + $0x40] sm:$0xff]  ;;  %v1243_v51 = vld [vmem:[%s1778_s5 + $0x30] sm:$0xff] }
  0x57   :  { %352 = vmatpush.bf16.msra.mxu1 %v1217_v8  ;;  %v263_v52 = vld [vmem:[%s1779_s9 + $0x38] sm:$0xff]  ;;  %v1338_v53 = vld [vmem:[%s1780_s13] ss:$0 sm:$0xff]  ;;  %v262_v54 = vld [vmem:[%s1779_s9 + $0x30] sm:$0xff] }
  0x58   :  { %v1242_v55 = vld [vmem:[%s1778_s5 + $0x28] sm:$0xff]  ;;  %v1339_v58 = vld [vmem:[%s1781_s17] ss:$0 sm:$0xff]  ;;  %v1240_v62 = vld [vmem:[%s1778_s5 + $0x18] sm:$0xff] }
  0x59   :  { %429 = vmatpush.bf16.msra.mxu3 %v1224_v39  ;;  %v1241_v59 = vld [vmem:[%s1778_s5 + $0x20] sm:$0xff]  ;;  %v261_v6 = vld [vmem:[%s1779_s9 + $0x28] sm:$0xff]  ;;  %v1239_v7 = vld [vmem:[%s1778_s5 + $0x10] sm:$0xff] }
  0x5a   :  { %680 = vmatpush.msra.mxu0 %v247_v19  ;;  %519 = vmatpush.bf16.msrb.mxu2 %v1235_v24  ;;  %v260_v8 = vld [vmem:[%s1779_s9 + $0x20] sm:$0xff]  ;;  %v259_v9 = vld [vmem:[%s1779_s9 + $0x18] sm:$0xff]  ;;  %v1238_v10 = vld [vmem:[%s1778_s5 + $0x8] sm:$0xff] }
  0x5b   :  { %584 = vmatpush.bf16.msrb.mxu1 %v1244_v48  ;;  %v258_v11 = vld [vmem:[%s1779_s9 + $0x10] sm:$0xff]  ;;  %v271_v19 = vld [vmem:[%s1782_s21 + $0x28] sm:$0xff]  ;;  %v266_v24 = vld [vmem:[%s1782_s21] sm:$0xff] }
  0x5c   :  { %681 = vmatpush.msra.mxu0 %v246_v20  ;;  %v272_v18 = vld [vmem:[%s1782_s21 + $0x30] sm:$0xff]  ;;  %v270_v20 = vld [vmem:[%s1782_s21 + $0x20] sm:$0xff]  ;;  %v267_v23 = vld [vmem:[%s1782_s21 + $0x8] sm:$0xff] }
  0x5d   :  { %430 = vmatpush.bf16.msra.mxu3 %v1223_v42  ;;  %v1249_v34 = vld [vmem:[%s1783_s25 + $0x20] sm:$0xff] }
  0x5e   :  { %682 = vmatpush.msra.mxu0 %v245_v21  ;;  %520 = vmatpush.bf16.msrb.mxu2 %v1234_v25  ;;  %v269_v21 = vld [vmem:[%s1782_s21 + $0x18] sm:$0xff] }
  0x5f   :  { %585 = vmatpush.bf16.msrb.mxu1 %v1243_v51  ;;  %v1252_v25 = vld [vmem:[%s1783_s25 + $0x38] sm:$0xff]  ;;  %v1343_v51 = vld [vmem:[#allocation2] ss:$0 sm:$0xff] }
  0x60   :  { %683 = vmatpush.msra.mxu0 %v244_v22  ;;  %v268_v22 = vld [vmem:[%s1782_s21 + $0x10] sm:$0xff] }
  0x61   :  { %650 = vmatpush.bf16.msrb.mxu3 %v1252_v25 }
  0x62   :  { %521 = vmatpush.bf16.msrb.mxu2 %v1233_v27  ;;  %v1251_v27 = vld [vmem:[%s1783_s25 + $0x30] sm:$0xff] }
  0x63   :  { %586 = vmatpush.bf16.msrb.mxu1 %v1242_v55 }
  0x65   :  { %651 = vmatpush.bf16.msrb.mxu3 %v1251_v27  ;;  %v1344_v27 = vld [vmem:[%s1790_s6] ss:$0 sm:$0xff] }
  0x66   :  { %522 = vmatpush.bf16.msrb.mxu2 %v1232_v31  ;;  %v1250_v31 = vld [vmem:[%s1783_s25 + $0x28] sm:$0xff] }
  0x67   :  { %587 = vmatpush.bf16.msrb.mxu1 %v1241_v59 }
  0x69   :  { %652 = vmatpush.bf16.msrb.mxu3 %v1250_v31 }
  0x6a   :  { %523 = vmatpush.bf16.msrb.mxu2 %v1231_v33 }
  0x6b   :  { %588 = vmatpush.bf16.msrb.mxu1 %v1240_v62 }
  0x6d   :  { %653 = vmatpush.bf16.msrb.mxu3 %v1249_v34 }
  0x6e   :  { %524 = vmatpush.bf16.msrb.mxu2 %v1230_v35 }
  0x6f   :  { %589 = vmatpush.bf16.msrb.mxu1 %v1239_v7 }
  0x72   :  { %525 = vmatpush.bf16.msrb.mxu2 %v1229_v37 }
  0x73   :  { %590 = vmatpush.bf16.msrb.mxu1 %v1238_v10 }
  0xce   :  { %v308_v13 = vpop.f32.mrf.mxu0 }
  0xcf   :  { %v309_v14 = vadd.f32 %v1336_v12, %v308_v13  ;;  %v257_v12 = vld [vmem:[%s1779_s9 + $0x8] sm:$0xff]  ;;  %v1237_v13 = vld [vmem:[%s1778_s5] sm:$0xff] }
  0xd0   :  { %591 = vmatpush.bf16.msrb.mxu1 %v1237_v13 }
  0xd1   :  { %1345 = vtanh.f32 %v309_v14  ;;  %v256_v14 = vld [vmem:[%s1779_s9] sm:$0xff] }
  0xd6   :  { %v310_v15 = vpop.f32.mrf.mxu0 }
  0xd7   :  { %v1346_v16 = vpop.eup %1345  ;;  %v275_v15 = vld [vmem:[%s1782_s21 + $0x48] sm:$0xff] }
  0xd8   :  { %v313_v17 = vpack.c.bf16 %v1346_v16, %v1346_v16  ;;  %v274_v16 = vld [vmem:[%s1782_s21 + $0x40] sm:$0xff] }
  0xda   :  { %1074 = vmatmul.msk.bf16.vlgmr.msra.gmra.mxu1 %vm341_vm1, %v313_v17  ;;  %v273_v17 = vld [vmem:[%s1782_s21 + $0x38] sm:$0xff] }
  0xdb   :  { %762 = vmatpush.msra.mxu1 %v275_v15 }
  0xdd   :  { %763 = vmatpush.msra.mxu1 %v274_v16 }
  0xdf   :  { %764 = vmatpush.msra.mxu1 %v273_v17 }
  0xe1   :  { %765 = vmatpush.msra.mxu1 %v272_v18 }
  0xe3   :  { %766 = vmatpush.msra.mxu1 %v271_v19 }
  0xe5   :  { %767 = vmatpush.msra.mxu1 %v270_v20 }
  0xe7   :  { %768 = vmatpush.msra.mxu1 %v269_v21 }
  0xe9   :  { %769 = vmatpush.msra.mxu1 %v268_v22 }
  0xeb   :  { %770 = vmatpush.msra.mxu1 %v267_v23 }
  0xed   :  { %771 = vmatpush.msra.mxu1 %v266_v24 }
 0x157   :  { %v354_v28 = vpop.f32.mrf.mxu1 }
 0x158   :  { %v355_v29 = vadd.f32 %v1337_v26, %v354_v28  ;;  %v1340_v26 = vld [vmem:[%s1784_s29] ss:$0 sm:$0xff] }
 0x15a   :  { %358 = vst.msk [vmem:[%s1605_s28] sm:$0xff] %vm295_vm0, %v355_v29  ;;  %v359_v30 = vpack.c.bf16 %v355_v29, %v355_v29 }
 0x15c   :  { %1083 = vmatmul.msk.bf16.vlgmr.msra.gmra.mxu2 %vm295_vm0, %v359_v30  ;;  %1109 = vmatmul.msk.bf16.vlgmr.msrb.gmra.mxu0 %vm295_vm0, %v359_v30 }
 0x15d   :  { %703 = vmatpush.msrb.mxu0 %v251_v38  ;;  %742 = vmatpush.msra.mxu2 %v265_v49  ;;  %v277_v49 = vld [vmem:[#allocation5] sm:$0xf] }
 0x15f   :  { %v356_v32 = vpop.f32.mrf.mxu1  ;;  %704 = vmatpush.msrb.mxu0 %v250_v40  ;;  %743 = vmatpush.msra.mxu2 %v264_v50  ;;  %v276_v50 = vld [vmem:[#allocation3] sm:$0xf] }
 0x160   :  { %v1341_v32 = vld [vmem:[%s1785_s3] ss:$0 sm:$0xff] }
 0x161   :  { %705 = vmatpush.msrb.mxu0 %v249_v41  ;;  %744 = vmatpush.msra.mxu2 %v263_v52  ;;  %v1248_v41 = vld [vmem:[%s1783_s25 + $0x18] sm:$0xff]  ;;  %v240_v52 = vld [vmem:[%s1787_s14] sm:$0xff] }
 0x162   :  { %654 = vmatpush.bf16.msrb.mxu3 %v1248_v41  ;;  %1253 = vpush %v240_v52  ;;  %v867_v55 = vrot.slane %v240_v52, 1  ;;  %v933_v7 = vrot.slane %v240_v52, 7 }
 0x163   :  { %706 = vmatpush.msrb.mxu0 %v248_v43  ;;  %745 = vmatpush.msra.mxu2 %v262_v54  ;;  %v1247_v43 = vld [vmem:[%s1783_s25 + $0x10] sm:$0xff]  ;;  %v1460_v54 = vmov 0  }
 0x164   :  { %1335 = vset.pattern.permute.xlu0 %v1460_v54 }
 0x165   :  { %746 = vmatpush.msra.mxu2 %v261_v6  ;;  %952 = vperm.xlu0 %1335, %v1343_v51  }
 0x166   :  { %655 = vmatpush.bf16.msrb.mxu3 %v1247_v43 }
 0x167   :  { %747 = vmatpush.msra.mxu2 %v260_v8 }
 0x169   :  { %748 = vmatpush.msra.mxu2 %v259_v9 }
 0x16b   :  { %749 = vmatpush.msra.mxu2 %v258_v11 }
 0x16c   :  { %1206 = vmatmul.msk.f32.vlgmr.msra.gmra.mxu0 %vm295_vm0, %v355_v29 }
 0x16d   :  { %723 = vmatpush.msra.mxu0 %v255_v44  ;;  %750 = vmatpush.msra.mxu2 %v257_v12  ;;  %v1246_v44 = vld [vmem:[%s1783_s25 + $0x8] sm:$0xff] }
 0x16e   :  { %656 = vmatpush.bf16.msrb.mxu3 %v1246_v44 }
 0x16f   :  { %724 = vmatpush.msra.mxu0 %v254_v45  ;;  %751 = vmatpush.msra.mxu2 %v256_v14  ;;  %v1245_v45 = vld [vmem:[%s1783_s25] sm:$0xff] }
 0x171   :  { %725 = vmatpush.msra.mxu0 %v253_v46  ;;  %v1342_v46 = vld [vmem:[%s1786_s8] ss:$0 sm:$0xff] }
 0x172   :  { %657 = vmatpush.bf16.msrb.mxu3 %v1245_v45 }
 0x173   :  { %726 = vmatpush.msra.mxu0 %v252_v47 }
 0x193   :  { %s1720_s20 = spop %1253 }
 0x194   :  { %v858_v44 = vstv %s1720_s20 }
 0x1d9   :  { %v461_v56 = vpop.f32.mrf.mxu0 }
 0x1da   :  { %v462_v57 = vadd.f32 %v1338_v53, %v461_v56  ;;  %v242_v53 = vld [vmem:[%s1788_s19] sm:$0xff] }
 0x1db   :  { %v872_v56 = vrot.slane %v242_v53, 1  ;;  %1255 = vpush %v242_v53  ;;  %v883_v59 = vrot.slane %v242_v53, 2  ;;  %v927_v6 = vrot.slane %v242_v53, 6  ;;  %v938_v18 = vrot.slane %v242_v53, 7 }
 0x1dc   :  { %1347 = vtanh.f32 %v462_v57  ;;  %v878_v57 = vrot.slane %v240_v52, 2  ;;  %1257 = vpush %v867_v55 }
 0x1dd   :  { %1259 = vpush %v872_v56 }
 0x1de   :  { %1261 = vpush %v878_v57 }
 0x1df   :  { %v387_v60 = vpop.f32.mrf.mxu2  ;;  %1263 = vpush %v883_v59 }
 0x1e0   :  { %v388_v61 = vadd.f32 %v1339_v58, %v387_v60 }
 0x1e1   :  { %v463_v63 = vpop.f32.mrf.mxu0 }
 0x1e2   :  { %v1348_v0 = vpop.eup %1347  ;;  %1349 = vtanh.f32 %v388_v61  ;;  %v889_v61 = vrot.slane %v240_v52, 3  ;;  %v894_v63 = vrot.slane %v242_v53, 3 }
 0x1e3   :  { %v466_v1 = vpack.c.bf16 %v1348_v0, %v1348_v0  ;;  %v900_v0 = vrot.slane %v240_v52, 4 }
 0x1e4   :  { %1265 = vpush %v889_v61 }
 0x1e5   :  { %526 = vmatmul.bf16.vlgmr.msrb.gmra.mxu2 %v466_v1  ;;  %v905_v1 = vrot.slane %v242_v53, 4  ;;  %1267 = vpush %v894_v63 }
 0x1e6   :  { %1269 = vpush %v900_v0 }
 0x1e7   :  { %v389_v2 = vpop.f32.mrf.mxu2  ;;  %1271 = vpush %v905_v1 }
 0x1e8   :  { %v1350_v3 = vpop.eup %1349  ;;  %v911_v2 = vrot.slane %v240_v52, 5 }
 0x1e9   :  { %v392_v4 = vpack.c.bf16 %v1350_v3, %v1350_v3  ;;  %v685_v5 = vpop.f32.mrf.mxu0  ;;  %v916_v3 = vrot.slane %v242_v53, 5 }
 0x1ea   :  { %1207 = vmatmul.msk.f32.vlgmr.msrb.gmra.mxu0 %vm295_vm0, %v685_v5  ;;  %1273 = vpush %v911_v2 }
 0x1eb   :  { %1100 = vmatmul.msk.bf16.vlgmr.msra.gmra.mxu3 %vm341_vm1, %v392_v4  ;;  %1211 = vmatpush.msk.msrb.mxu0 %vm792_vm3, %v276_v50  ;;  %v922_v4 = vrot.slane %v240_v52, 6  ;;  %1275 = vpush %v916_v3 }
 0x1ec   :  { %1213 = vmatpush.msk.msra.mxu3 %vm792_vm3, %v277_v49 }
 0x1ed   :  { %1277 = vpush %v922_v4 }
 0x1ee   :  { %1279 = vpush %v927_v6 }
 0x1ef   :  { %1281 = vpush %v933_v7 }
 0x1f0   :  { %1283 = vpush %v938_v18 }
 0x1f2   :  { %1208 = vmatmul.msk.f32.vlgmr.msra.gmra.mxu0 %vm295_vm0, %v685_v5 }
 0x20c   :  { %s1722_s4 = spop %1255 }
 0x20d   :  { %s1724_s28 = spop %1257  ;;  %v863_v51 = vstv %s1722_s4 }
 0x20e   :  { %s1726_s18 = spop %1259 }
 0x20f   :  { %s1728_s23 = spop %1261  ;;  %v874_v52 = vstv %s1726_s18 }
 0x210   :  { %s1730_s30 = spop %1263 }
 0x211   :  { %v885_v53 = vstv %s1730_s30 }
 0x215   :  { %s1732_s22 = spop %1265 }
 0x216   :  { %v891_v49 = vstv %s1732_s22 }
 0x267   :  { %v708_v28 = vpop.f32.mrf.mxu0 }
 0x268   :  { %v527_v29 = vpop.f32.mrf.mxu2 }
 0x269   :  { %v528_v30 = vadd.f32 %v1340_v26, %v527_v29 }
 0x26b   :  { %1351 = vtanh.f32 %v528_v30 }
 0x26e   :  { %v432_v33 = vpop.f32.mrf.mxu3 }
 0x26f   :  { %v433_v35 = vadd.f32 %v1341_v32, %v432_v33  ;;  %v728_v36 = vpop.f32.mrf.mxu0 }
 0x270   :  { %v731_v37 = vmul.f32 %v728_v36, %v708_v28  ;;  %v529_v38 = vpop.f32.mrf.mxu2 }
 0x271   :  { %v1352_v39 = vpop.eup %1351  ;;  %436 = vst.msk [vmem:[%s1620_s24] sm:$0xff] %vm295_vm0, %v433_v35  ;;  %s1789_s24 = sld [smem:[#allocation18_spill]] }
 0x272   :  { %v532_v40 = vpack.c.bf16 %v1352_v39, %v1352_v39  ;;  %1209 = vmatmul.msk.f32.vlgmr.msra.gmra.mxu2 %vm732_vm2, %v731_v37 }
 0x274   :  { %592 = vmatmul.bf16.vlgmr.msrb.gmra.mxu1 %v532_v40 }
 0x276   :  { %v434_v42 = vpop.f32.mrf.mxu3 }
 0x277   :  { %v241_v19 = vld [vmem:[%s1789_s24] sm:$0xff] }
 0x278   :  { %1285 = vpush %v241_v19  ;;  %v956_v20 = vrot.slane %v241_v19, 1  ;;  %v962_v21 = vrot.slane %v241_v19, 2  ;;  %v968_v22 = vrot.slane %v241_v19, 3  ;;  %v974_v23 = vrot.slane %v241_v19, 4 }
 0x279   :  { %v980_v24 = vrot.slane %v241_v19, 5  ;;  %v986_v25 = vrot.slane %v241_v19, 6  ;;  %v992_v26 = vrot.slane %v241_v19, 7 }
 0x27a   :  { %1287 = vpush %v956_v20 }
 0x27b   :  { %1289 = vpush %v962_v21 }
 0x27c   :  { %1291 = vpush %v968_v22 }
 0x27d   :  { %1293 = vpush %v974_v23 }
 0x27e   :  { %1295 = vpush %v980_v24 }
 0x27f   :  { %1297 = vpush %v986_v25 }
 0x280   :  { %1299 = vpush %v992_v26 }
 0x284   :  { %1210 = vmatmul.msk.f32.vlgmr.msra.gmra.mxu1 %vm732_vm2, %v731_v37 }
 0x2f1   :  { %v593_v47 = vpop.f32.mrf.mxu1 }
 0x2f2   :  { %v594_v48 = vadd.f32 %v1342_v46, %v593_v47  ;;  %v869_v47 = vstv %s1724_s28 }
 0x2f4   :  { %1353 = vtanh.f32 %v594_v48  ;;  %v880_v48 = vstv %s1728_s23 }
 0x2f5   :  { %v753_v45 = vpop.f32.mrf.mxu2 }
 0x2f9   :  { %v595_v58 = vpop.f32.mrf.mxu1 }
 0x2fa   :  { %v1354_v60 = vpop.eup %1353 }
 0x2fb   :  { %v598_v62 = vpack.c.bf16 %v1354_v60, %v1354_v60 }
 0x2fd   :  { %658 = vmatmul.bf16.vlgmr.msrb.gmra.mxu3 %v598_v62 }
 0x301   :  { %v773_v5 = vpop.f32.mrf.mxu1 }
 0x302   :  { %1355 = vrsqrt.f32 %v773_v5  ;;  %vm783_vm4 = vcmp.eq.f32.partialorder %v773_v5, inf  ;;  %v786_v15 = vand.u32 2147483648, %v773_v5  ;;  %vm785_vm6 = vcmp.eq.f32.partialorder %v773_v5, 0.0 }
 0x308   :  { %v1356_v8 = vpop.eup %1355 }
 0x309   :  { %v777_v9 = vmul.f32 %v1356_v8, %v773_v5 }
 0x30b   :  { %v778_v10 = vmul.f32 %v1356_v8, %v777_v9 }
 0x30d   :  { %v779_v11 = vmul.f32 0.5, %v778_v10 }
 0x30f   :  { %v780_v12 = vsub.f32 1.5, %v779_v11 }
 0x311   :  { %v781_v13 = vmul.f32 %v1356_v8, %v780_v12 }
 0x313   :  { %v782_v14 = vmul.f32 %v781_v13, %v773_v5 }
 0x315   :  { %v784_v16 = vsel %vm783_vm4, %v773_v5, %v782_v14 }
 0x316   :  { %v787_v17 = vsel %vm785_vm6, %v786_v15, %v784_v16 }
 0x317   :  { %1212 = vmatmul.msk.f32.vlgmr.msrb.gmra.mxu0 %vm788_vm5, %v787_v17  ;;  %1214 = vmatmul.msk.f32.vlgmr.msra.gmra.mxu3 %vm788_vm5, %v787_v17  ;;  %v953_v17 = vpop.permute.xlu0 %952 }
 0x380   :  { %v659_v28 = vpop.f32.mrf.mxu3 }
 0x381   :  { %v660_v29 = vadd.f32 %v1344_v27, %v659_v28 }
 0x383   :  { %664 = vst.msk [vmem:[%s1615_s15] sm:$0xff] %vm663_vm7, %v660_v29  ;;  %s1734_s15 = spop %1267 }
 0x384   :  { %s1736_s26 = spop %1269  ;;  %v896_v59 = vstv %s1734_s15 }
 0x385   :  { %s1738_s1 = spop %1271  ;;  %v902_v54 = vstv %s1736_s26 }
 0x386   :  { %s1740_s2 = spop %1273  ;;  %v907_v1 = vstv %s1738_s1 }
 0x387   :  { %s1743_s27 = spop %1275  ;;  %v913_v60 = vstv %s1740_s2 }
 0x388   :  { %v661_v30 = vpop.f32.mrf.mxu3  ;;  %s1278_s0 = spop %1277  ;;  %v918_v5 = vstv %s1743_s27 }
 0x389   :  { %s1752_s12 = spop %1279  ;;  %v924_v2 = vstv %s1278_s0 }
 0x38a   :  { %s1282_s10 = spop %1281  ;;  %v929_v9 = vstv %s1752_s12 }
 0x38b   :  { %s1284_s11 = spop %1283  ;;  %v935_v6 = vstv %s1282_s10 }
 0x38c   :  { %s1286_s16 = spop %1285  ;;  %v940_v13 = vstv %s1284_s11 }
 0x38d   :  { %s1288_s5 = spop %1287  ;;  %v946_v12 = vstv %s1286_s16 }
 0x38e   :  { %s1290_s9 = spop %1289  ;;  %v958_v16 = vstv %s1288_s5 }
 0x38f   :  { %s1292_s13 = spop %1291  ;;  %v964_v22 = vstv %s1290_s9 }
 0x390   :  { %s1294_s17 = spop %1293  ;;  %v970_v26 = vstv %s1292_s13 }
 0x391   :  { %s1296_s21 = spop %1295  ;;  %v976_v30 = vstv %s1294_s17 }
 0x392   :  { %s1298_s25 = spop %1297 }
 0x393   :  { %s1300_s29 = spop %1299 }
 0x394   :  { %v813_v31 = vpop.f32.mrf.mxu0 }
 0x39a   :  { %v836_v32 = vpop.f32.mrf.mxu3 }
 0x39b   :  { %v839_v33 = vmul.f32 %v836_v32, %v813_v31 }
 0x39d   :  { %v840_v34 = vadd.f32 1e-05, %v839_v33 }
 0x39f   :  { %1357 = vrcp.f32 %v840_v34  ;;  %v852_v38 = vand.u32 2147483648, %v840_v34  ;;  %v850_v40 = vand.u32 2147483647, %v840_v34  ;;  %vm846_vm9 = vweird.f32 %v840_v34 }
 0x3a1   :  { %v853_v42 = vor.u32 1.1754944e-38, %v852_v38  ;;  %vm851_vm11 = vcmp.eq.f32.partialorder %v850_v40, 8.507059e+37  ;;  %v988_v38 = vstv %s1298_s25 }
 0x3a5   :  { %v1358_v35 = vpop.eup %1357 }
 0x3a6   :  { %v842_v36 = vmul.f32 %v1358_v35, %v840_v34  ;;  %vm847_vm8 = vweird.f32 %v1358_v35  ;;  %v982_v34 = vstv %s1296_s21 }
 0x3a7   :  { %vm848_vm10 = vmor %vm846_vm9, %vm847_vm8 }
 0x3a8   :  { %v843_v37 = vsub.f32 1.0, %v842_v36 }
 0x3aa   :  { %v844_v39 = vmul.f32 %v1358_v35, %v843_v37 }
 0x3ac   :  { %v845_v41 = vadd.f32 %v1358_v35, %v844_v39 }
 0x3ae   :  { %v849_v43 = vsel %vm848_vm10, %v1358_v35, %v845_v41 }
 0x3af   :  { %v854_v46 = vsel %vm851_vm11, %v853_v42, %v849_v43  ;;  %v994_v42 = vstv %s1300_s29 }
 0x3b0   :  { %v855_v50 = vmul.f32 %v854_v46, %v753_v45 }
 0x3b2   :  { %v860_v55 = vmul.f32 %v858_v44, %v855_v50  ;;  %v871_v56 = vmul.f32 %v869_v47, %v855_v50  ;;  %v882_v57 = vmul.f32 %v880_v48, %v855_v50  ;;  %v893_v58 = vmul.f32 %v891_v49, %v855_v50 }
 0x3b3   :  { %v904_v0 = vmul.f32 %v902_v54, %v855_v50  ;;  %v915_v4 = vmul.f32 %v913_v60, %v855_v50  ;;  %v926_v8 = vmul.f32 %v924_v2, %v855_v50  ;;  %v937_v11 = vmul.f32 %v935_v6, %v855_v50 }
 0x3b4   :  { %v865_v61 = vadd.f32 %v863_v51, %v860_v55  ;;  %v876_v62 = vadd.f32 %v874_v52, %v871_v56  ;;  %v887_v63 = vadd.f32 %v885_v53, %v882_v57  ;;  %v898_v3 = vadd.f32 %v896_v59, %v893_v58 }
 0x3b5   :  { %v909_v7 = vadd.f32 %v907_v1, %v904_v0  ;;  %v920_v10 = vadd.f32 %v918_v5, %v915_v4  ;;  %v931_v15 = vadd.f32 %v929_v9, %v926_v8  ;;  %v942_v21 = vadd.f32 %v940_v13, %v937_v11 }
 0x3b6   :  { %1359 = vtanh.f32 %v865_v61 }
 0x3b7   :  { %1361 = vtanh.f32 %v876_v62 }
 0x3b8   :  { %1363 = vtanh.f32 %v887_v63 }
 0x3b9   :  { %1365 = vtanh.f32 %v898_v3 }
 0x3ba   :  { %1367 = vtanh.f32 %v909_v7 }
 0x3bb   :  { %1369 = vtanh.f32 %v920_v10 }
 0x3bc   :  { %v1360_v14 = vpop.eup %1359  ;;  %1371 = vtanh.f32 %v931_v15 }
 0x3bd   :  { %v1362_v18 = vpop.eup %1361  ;;  %v948_v19 = vmul.f32 %v1360_v14, %v946_v12  ;;  %1373 = vtanh.f32 %v942_v21 }
 0x3be   :  { %v1364_v20 = vpop.eup %1363  ;;  %v960_v23 = vmul.f32 %v1362_v18, %v958_v16 }
 0x3bf   :  { %v955_v24 = vadd.f32 %v953_v17, %v948_v19  ;;  %v1366_v25 = vpop.eup %1365  ;;  %v966_v27 = vmul.f32 %v1364_v20, %v964_v22 }
 0x3c0   :  { %v1368_v29 = vpop.eup %1367  ;;  %v972_v31 = vmul.f32 %v1366_v25, %v970_v26 }
 0x3c1   :  { %v961_v28 = vadd.f32 %v960_v23, %v955_v24  ;;  %v1370_v33 = vpop.eup %1369  ;;  %v978_v35 = vmul.f32 %v1368_v29, %v976_v30 }
 0x3c2   :  { %v1372_v37 = vpop.eup %1371  ;;  %v984_v39 = vmul.f32 %v1370_v33, %v982_v34 }
 0x3c3   :  { %v967_v32 = vadd.f32 %v966_v27, %v961_v28  ;;  %v1374_v41 = vpop.eup %1373  ;;  %v990_v43 = vmul.f32 %v1372_v37, %v988_v38 }
 0x3c4   :  { %v996_v45 = vmul.f32 %v1374_v41, %v994_v42 }
 0x3c5   :  { %v973_v36 = vadd.f32 %v972_v31, %v967_v32 }
 0x3c7   :  { %v979_v40 = vadd.f32 %v978_v35, %v973_v36 }
 0x3c9   :  { %v985_v44 = vadd.f32 %v984_v39, %v979_v40 }
 0x3cb   :  { %v991_v46 = vadd.f32 %v990_v43, %v985_v44 }
 0x3cd   :  { %v997_v47 = vadd.f32 %v996_v45, %v991_v46 }
 0x3cf   :  { %999 = vst.msk [vmem:[%s1610_s7] sm:$0xff] %vm998_vm12, %v997_v47 }
 0x3d0   :  { %1016 = vsyncpa [#allocation4], 1 }
 0x3d1   :  { %1017 = vsyncpa [#allocation6], 1 }

</bundles_post_ra>
